<compile_context>
chip_gen: v7x
topology: tpu7x:2x2x1
jax: 0.10.0
libtpu: 0.0.40
codegen_flags: <defaults>
</compile_context>

<pallas_src>
import functools

import numpy as np
import jax
import jax.numpy as jnp
from jax import lax
from jax.experimental import pallas as pl
from jax.experimental.pallas import tpu as pltpu


# bf16 MXU operands per perf review (native MXU input dtype on v5e/v6e/v7x);
# accumulation and all GroupNorm math remain f32.
MXU_DTYPE = jnp.bfloat16


# ----------------------------------------------------------------------------
# Fused kernel: conv3x3 (taps folded into K) + GroupNorm + MaxPool(2,2,pad=1)
# + ReLU.  One sample per grid step; spatial on the lane axis.
# ----------------------------------------------------------------------------
def _conv_gn_pool_relu_kernel(x_ref, w_ref, gamma_ref, beta_ref, mask_ref, out_ref,
                              *, qpad, hw, num_groups, gsize, eps):
    """x_ref:    (Kpad, 4*qpad)  bf16 im2col, columns grouped by pooling window
       w_ref:    (Cout, Kpad)    bf16
       gamma/beta_ref: (Cout, 1) f32
       mask_ref: (1, 4*qpad)     f32 — 1 where the contributor conv position exists
       out_ref:  (Cout, qpad)    f32 pooled output (columns >= Ho*Wo are zero)"""
    # --- Conv: one MXU matmul, all 9 taps folded into K; output is lane-dense. --
    y = jnp.dot(w_ref[...], x_ref[...],
                preferred_element_type=jnp.float32)             # (C, 4*qpad) f32
    mask = mask_ref[...]                                        # (1, 4*qpad) f32
    inv_n = 1.0 / float(hw * gsize)

    def group_mix(v):
        # (C,1) per-channel sums -> per-channel *group* sums.  Pure sublane work
        # on 16 values; no MXU on the serial dependency chain.
        if gsize == 1:
            return v                      # GroupNorm(groups == channels): identity
        parts = []
        for g in range(num_groups):       # tiny static loop (<= 8 groups)
            s = jnp.sum(v[g * gsize:(g + 1) * gsize, :], axis=0, keepdims=True)
            parts.append(jnp.broadcast_to(s, (gsize, 1)))
        return jnp.concatenate(parts, axis=0)

    # --- GroupNorm statistics (two-pass / centered, all f32). -------------------
    # Invalid (padding/alignment) columns of the im2col are all-zero and the conv
    # has no bias, so they contribute exactly 0 to csum; they are masked out of the
    # centered sum of squares below.
    csum = jnp.sum(y, axis=1, keepdims=True)                    # (C, 1)
    mean = group_mix(csum) * inv_n
    d = (y - mean) * mask                                       # centered, 0 at invalid cols
    csq = jnp.sum(d * d, axis=1, keepdims=True)                 # (C, 1)
    var = group_mix(csq) * inv_n                                # biased group variance
    scale = lax.rsqrt(var + eps) * gamma_ref[...]
    # ReLU before pool is valid: values are >= 0 afterwards and every pooling
    # window contains at least one valid conv output, so the 0-filled invalid
    # slots can never win the max.  (Relies on kernel=stride=2, pad=1.)
    r = jnp.maximum(d * scale + beta_ref[...], 0.0) * mask      # (C, 4*qpad)

    # --- MaxPool(2,2,pad=1) + ReLU: max over the four 128-aligned contributor ---
    # segments, single dense lane-major store.
    p0 = r[:, 0 * qpad:1 * qpad]
    p1 = r[:, 1 * qpad:2 * qpad]
    p2 = r[:, 2 * qpad:3 * qpad]
    p3 = r[:, 3 * qpad:4 * qpad]
    out_ref[...] = jnp.maximum(jnp.maximum(p0, p1),
                               jnp.maximum(p2, p3)).astype(out_ref.dtype)


def conv_gn_pool_relu_block(x_nchw, w_oihw, gamma, beta, num_groups, eps=1e-5):
    n, cin, h, w = x_nchw.shape
    cout = w_oihw.shape[0]
    gsize = cout // num_groups
    ho, wo = h // 2 + 1, w // 2 + 1            # MaxPool2d(2, stride=2, pad=1) output size
    q = ho * wo
    qpad = ((q + 127) // 128) * 128            # 128-aligned segment length (lane axis)
    l = 4 * qpad
    k = 9 * cin
    kpad = ((k + 15) // 16) * 16               # bf16 sublane-tile aligned K

    # --- XLA glue: im2col with the 9 taps folded into K and columns grouped by ---
    # pooling window.  The kernel then never needs strided access or reshapes.
    xp = jnp.pad(x_nchw, ((0, 0), (0, 0), (1, 1), (1, 1)))
    t = jnp.concatenate(
        [xp[:, :, dy:dy + h, dx:dx + w] for dy in range(3) for dx in range(3)],
        axis=1)                                                  # (N, 9Cin, H, W)
    # pooled output (oi, oj) reads conv positions (2oi-1+sy, 2oj-1+sx), sy,sx in {0,1};
    # pad the conv-position frame so those indices are always addressable.
    tp = jnp.pad(t, ((0, 0), (0, 0), (1, 2 * ho - h - 1), (1, 2 * wo - w - 1)))
    segs = []
    for sy in range(2):
        for sx in range(2):
            s = tp[:, :, sy::2, sx::2].reshape(n, k, q)          # (N, 9Cin, Ho*Wo)
            segs.append(jnp.pad(s, ((0, 0), (0, 0), (0, qpad - q))))
    xcol = jnp.concatenate(segs, axis=2)                         # (N, 9Cin, 4*qpad)
    xcol = jnp.pad(xcol, ((0, 0), (0, kpad - k), (0, 0))).astype(MXU_DTYPE)

    # Weights as (Cout, 9Cin) with K ordered (dy, dx, cin) to match the tap concat.
    wmat = jnp.transpose(w_oihw, (0, 2, 3, 1)).reshape(cout, k)
    wmat = jnp.pad(wmat, ((0, 0), (0, kpad - k))).astype(MXU_DTYPE)

    # Column-validity mask (host-built, shape-only constant): 1 where the
    # contributor conv position exists, 0 for pool-padding slots / lane padding.
    mnp = np.zeros((1, l), np.float32)
    for si, (sy, sx) in enumerate(((0, 0), (0, 1), (1, 0), (1, 1))):
        rv = (2 * np.arange(ho) - 1 + sy >= 0) & (2 * np.arange(ho) - 1 + sy < h)
        cv = (2 * np.arange(wo) - 1 + sx >= 0) & (2 * np.arange(wo) - 1 + sx < w)
        mnp[0, si * qpad:si * qpad + q] = (rv[:, None] & cv[None, :]).reshape(-1)
    mask = jnp.asarray(mnp)

    kernel = functools.partial(_conv_gn_pool_relu_kernel,
                               qpad=qpad, hw=h * w,
                               num_groups=num_groups, gsize=gsize, eps=eps)
    out = pl.pallas_call(
        kernel,
        out_shape=jax.ShapeDtypeStruct((n, cout, qpad), jnp.float32),
        grid=(n,),
        in_specs=[
            pl.BlockSpec((None, kpad, l), lambda i: (i, 0, 0)),
            pl.BlockSpec((cout, kpad), lambda i: (0, 0)),
            pl.BlockSpec((cout, 1), lambda i: (0, 0)),
            pl.BlockSpec((cout, 1), lambda i: (0, 0)),
            pl.BlockSpec((1, l), lambda i: (0, 0)),
        ],
        out_specs=pl.BlockSpec((None, cout, qpad), lambda i: (i, 0, 0)),
        compiler_params=pltpu.CompilerParams(
            dimension_semantics=("parallel",)),
    )(xcol, wmat,
      gamma.astype(jnp.float32).reshape(cout, 1),
      beta.astype(jnp.float32).reshape(cout, 1),
      mask)
    # (N, Cout, qpad) -> NCHW activation for the next block / classifier.
    return out[:, :, :q].reshape(n, cout, ho, wo)


# ----------------------------------------------------------------------------
# Glue: AdaptiveAvgPool2d((5,5)) — identity for the 64x64 path (features end at
# 5x5); general plain-JAX fallback kept for other input sizes.
# ----------------------------------------------------------------------------
def adaptive_avg_pool_nchw(x, out_h, out_w):
    n, c, h, w = x.shape
    if (h, w) == (out_h, out_w):
        return x                                      # identity: skip dead glue
    rows = []
    for i in range(out_h):
        h0 = (i * h) // out_h
        h1 = -(-((i + 1) * h) // out_h)
        cols = []
        for j in range(out_w):
            w0 = (j * w) // out_w
            w1 = -(-((j + 1) * w) // out_w)
            cols.append(jnp.mean(x[:, :, h0:h1, w0:w1], axis=(2, 3)))
        rows.append(jnp.stack(cols, axis=-1))
    return jnp.stack(rows, axis=-2)


# ----------------------------------------------------------------------------
# Full forward pass (PyTorch NCHW in / (N, num_classes) out)
# ----------------------------------------------------------------------------
def celeba_cnn_forward(x_nchw, blocks, lin_w, lin_b):
    x = x_nchw.astype(jnp.float32)
    for (wconv, gamma, beta, groups) in blocks:
        x = conv_gn_pool_relu_block(x, wconv, gamma, beta, groups)
    x = adaptive_avg_pool_nchw(x, 5, 5)
    n, c, ph, pw = x.shape
    feat = x.reshape(n, c * ph * pw)                  # NCHW flatten order
    # Final Linear stays in plain JAX: (N,400)@(400,8) is pure launch overhead
    # as a Pallas kernel (per perf review).
    return jnp.dot(feat, lin_w.T, precision=lax.Precision.HIGHEST) + lin_b


# ----------------------------------------------------------------------------
# Pure-JAX reference for verification
# ----------------------------------------------------------------------------
def reference_forward(x_nchw, blocks, lin_w, lin_b, eps=1e-5):
    x = x_nchw.astype(jnp.float32)
    for (w, gamma, beta, groups) in blocks:
        y = lax.conv_general_dilated(
            x, w, (1, 1), [(1, 1), (1, 1)],
            dimension_numbers=("NCHW", "OIHW", "NCHW"),
            precision=lax.Precision.HIGHEST)
        n, c, h, ww = y.shape
        gs = c // groups
        yg = y.reshape(n, groups, gs, h, ww)
        mean = jnp.mean(yg, axis=(2, 3, 4), keepdims=True)
        var = jnp.mean(jnp.square(yg - mean), axis=(2, 3, 4), keepdims=True)
        yn = ((yg - mean) / jnp.sqrt(var + eps)).reshape(n, c, h, ww)
        yn = yn * gamma.reshape(1, c, 1, 1) + beta.reshape(1, c, 1, 1)
        yp = lax.reduce_window(yn, -jnp.inf, lax.max, (1, 1, 2, 2), (1, 1, 2, 2),
                               ((0, 0), (0, 0), (1, 1), (1, 1)))
        x = jnp.maximum(yp, 0.0)
    x = adaptive_avg_pool_nchw(x, 5, 5)
    n, c, ph, pw = x.shape
    feat = x.reshape(n, c * ph * pw)
    return jnp.dot(feat, lin_w.T, precision=lax.Precision.HIGHEST) + lin_b


# ----------------------------------------------------------------------------
# Deterministic parameter init (matches module's shapes; GN affine exercised)
# ----------------------------------------------------------------------------
def init_params(key, in_channels, hidden, num_classes):
    keys = jax.random.split(key, 14)
    blocks = []
    cin = in_channels
    group_counts = [hidden, hidden // 2, hidden // 4, hidden // 8]
    for i, groups in enumerate(group_counts):
        kw, kg, kb = keys[3 * i], keys[3 * i + 1], keys[3 * i + 2]
        std = 1.0 / float(np.sqrt(cin * 9))
        w = std * jax.random.normal(kw, (hidden, cin, 3, 3), jnp.float32)
        gamma = 1.0 + 0.1 * jax.random.normal(kg, (hidden,), jnp.float32)
        beta = 0.1 * jax.random.normal(kb, (hidden,), jnp.float32)
        blocks.append((w, gamma, beta, groups))
        cin = hidden
    lin_w = 0.05 * jax.random.normal(keys[12], (num_classes, hidden * 5 * 5), jnp.float32)
    lin_b = 0.01 * jax.random.normal(keys[13], (num_classes,), jnp.float32)
    return blocks, lin_w, lin_b


if __name__ == "__main__":
    key = jax.random.PRNGKey(0)
    kx, kp = jax.random.split(key)

    in_channels, hidden, num_classes = 3, 16, 8
    # 64x64 input -> spatial sizes 64 -> 33 -> 17 -> 9 -> 5 through the 4 pooled
    # blocks, so AdaptiveAvgPool2d((5,5)) is an identity.
    x = jax.random.normal(kx, (2, in_channels, 64, 64), jnp.float32)
    blocks, lin_w, lin_b = init_params(kp, in_channels, hidden, num_classes)

    fwd = jax.jit(lambda xx: celeba_cnn_forward(xx, blocks, lin_w, lin_b))
    out = jax.block_until_ready(fwd(x))
    assert out.shape == (2, num_classes)
    assert bool(jnp.all(jnp.isfinite(out)))

    ref = jax.block_until_ready(reference_forward(x, blocks, lin_w, lin_b))
    # Tolerance sized for bf16 MXU operands (per perf review) vs. f32 reference.
    np.testing.assert_allclose(np.asarray(out), np.asarray(ref), rtol=5e-2, atol=5e-2)

    print("KERNEL_OK")
</pallas_src>

<mosaic_0001>
module attributes {stable_mosaic.version = 11 : i64} {
  func.func @_conv_gn_pool_relu_kernel(%arg0: i32, %arg1: memref<1x32x4608xbf16, #tpu.memory_space<vmem>>, %arg2: memref<16x32xbf16, #tpu.memory_space<vmem>>, %arg3: memref<16x1xf32, #tpu.memory_space<vmem>>, %arg4: memref<16x1xf32, #tpu.memory_space<vmem>>, %arg5: memref<1x4608xf32, #tpu.memory_space<vmem>>, %arg6: memref<1x16x1152xf32, #tpu.memory_space<vmem>>) attributes {dimension_semantics = [#tpu.dimension_semantics<parallel>], iteration_bounds = array<i64: 2>, scalar_prefetch = 0 : i64, scratch_operands = 0 : i64, tpu.core_type = #tpu.core_type<tc>, window_params = [{transform_indices = @transform_0, window_bounds = array<i64: 1, 32, 4608>}, {pipeline_mode = #tpu.pipeline_mode<synchronous>, transform_indices = @transform_1, window_bounds = array<i64: 16, 32>}, {pipeline_mode = #tpu.pipeline_mode<synchronous>, transform_indices = @transform_2, window_bounds = array<i64: 16, 1>}, {pipeline_mode = #tpu.pipeline_mode<synchronous>, transform_indices = @transform_3, window_bounds = array<i64: 16, 1>}, {pipeline_mode = #tpu.pipeline_mode<synchronous>, transform_indices = @transform_4, window_bounds = array<i64: 1, 4608>}, {transform_indices = @transform_5, window_bounds = array<i64: 1, 16, 1152>}]} {
    %c0 = arith.constant 0 : index
    %c0_0 = arith.constant 0 : index
    %0 = vector.load %arg2[%c0, %c0_0] : memref<16x32xbf16, #tpu.memory_space<vmem>>, vector<16x32xbf16>
    %c0_1 = arith.constant 0 : index
    %c0_2 = arith.constant 0 : index
    %c0_3 = arith.constant 0 : index
    %1 = vector.load %arg1[%c0_1, %c0_2, %c0_3] : memref<1x32x4608xbf16, #tpu.memory_space<vmem>>, vector<1x32x4608xbf16>
    %2 = vector.shape_cast %1 : vector<1x32x4608xbf16> to vector<32x4608xbf16>
    %cst = arith.constant dense<0.000000e+00> : vector<16x4608xf32>
    %3 = tpu.matmul %0, %2, %cst {dimension_numbers = #tpu.dot_dimension_numbers<[1], [0], [0], [1], [0, 0, 1, 1], [], []>} : vector<16x32xbf16>, vector<32x4608xbf16>, vector<16x4608xf32> -> vector<16x4608xf32>
    %c0_4 = arith.constant 0 : index
    %c0_5 = arith.constant 0 : index
    %4 = vector.load %arg5[%c0_4, %c0_5] : memref<1x4608xf32, #tpu.memory_space<vmem>>, vector<1x4608xf32>
    %cst_6 = arith.constant dense<0.000000e+00> : vector<16xf32>
    %5 = vector.multi_reduction <add>, %3, %cst_6 [1] : vector<16x4608xf32> to vector<16xf32>
    %6 = vector.shape_cast %5 : vector<16xf32> to vector<16x1xf32>
    %cst_7 = arith.constant 2.44140625E-4 : f32
    %7 = vector.broadcast %cst_7 : f32 to vector<16x1xf32>
    %8 = arith.mulf %6, %7 : vector<16x1xf32>
    %9 = vector.broadcast %8 : vector<16x1xf32> to vector<16x4608xf32>
    %10 = arith.subf %3, %9 : vector<16x4608xf32>
    %11 = vector.broadcast %4 : vector<1x4608xf32> to vector<16x4608xf32>
    %12 = arith.mulf %10, %11 : vector<16x4608xf32>
    %13 = arith.mulf %12, %12 : vector<16x4608xf32>
    %cst_8 = arith.constant dense<0.000000e+00> : vector<16xf32>
    %14 = vector.multi_reduction <add>, %13, %cst_8 [1] : vector<16x4608xf32> to vector<16xf32>
    %15 = vector.shape_cast %14 : vector<16xf32> to vector<16x1xf32>
    %cst_9 = arith.constant 2.44140625E-4 : f32
    %16 = vector.broadcast %cst_9 : f32 to vector<16x1xf32>
    %17 = arith.mulf %15, %16 : vector<16x1xf32>
    %cst_10 = arith.constant 9.99999974E-6 : f32
    %18 = vector.broadcast %cst_10 : f32 to vector<16x1xf32>
    %19 = arith.addf %17, %18 : vector<16x1xf32>
    %20 = math.rsqrt %19 : vector<16x1xf32>
    %c0_11 = arith.constant 0 : index
    %c0_12 = arith.constant 0 : index
    %21 = vector.load %arg3[%c0_11, %c0_12] : memref<16x1xf32, #tpu.memory_space<vmem>>, vector<16x1xf32>
    %22 = arith.mulf %20, %21 : vector<16x1xf32>
    %23 = vector.broadcast %22 : vector<16x1xf32> to vector<16x4608xf32>
    %24 = arith.mulf %12, %23 : vector<16x4608xf32>
    %c0_13 = arith.constant 0 : index
    %c0_14 = arith.constant 0 : index
    %25 = vector.load %arg4[%c0_13, %c0_14] : memref<16x1xf32, #tpu.memory_space<vmem>>, vector<16x1xf32>
    %26 = vector.broadcast %25 : vector<16x1xf32> to vector<16x4608xf32>
    %27 = arith.addf %24, %26 : vector<16x4608xf32>
    %cst_15 = arith.constant 0.000000e+00 : f32
    %28 = vector.broadcast %cst_15 : f32 to vector<16x4608xf32>
    %29 = arith.maximumf %27, %28 : vector<16x4608xf32>
    %30 = vector.broadcast %4 : vector<1x4608xf32> to vector<16x4608xf32>
    %31 = arith.mulf %29, %30 : vector<16x4608xf32>
    %32 = vector.extract_strided_slice %31 {offsets = [0, 0], sizes = [16, 1152], strides = [1, 1]} : vector<16x4608xf32> to vector<16x1152xf32>
    %33 = vector.extract_strided_slice %31 {offsets = [0, 1152], sizes = [16, 1152], strides = [1, 1]} : vector<16x4608xf32> to vector<16x1152xf32>
    %34 = vector.extract_strided_slice %31 {offsets = [0, 2304], sizes = [16, 1152], strides = [1, 1]} : vector<16x4608xf32> to vector<16x1152xf32>
    %35 = vector.extract_strided_slice %31 {offsets = [0, 3456], sizes = [16, 1152], strides = [1, 1]} : vector<16x4608xf32> to vector<16x1152xf32>
    %36 = arith.maximumf %32, %33 : vector<16x1152xf32>
    %37 = arith.maximumf %34, %35 : vector<16x1152xf32>
    %38 = arith.maximumf %36, %37 : vector<16x1152xf32>
    %c0_16 = arith.constant 0 : index
    %c0_17 = arith.constant 0 : index
    %c0_18 = arith.constant 0 : index
    %39 = vector.load %arg6[%c0_16, %c0_17, %c0_18] : memref<1x16x1152xf32, #tpu.memory_space<vmem>>, vector<1x16x1152xf32>
    %40 = vector.shape_cast %39 : vector<1x16x1152xf32> to vector<16x1152xf32>
    %41 = vector.shape_cast %38 : vector<16x1152xf32> to vector<1x16x1152xf32>
    tpu.vector_store %arg6[%c0_16, %c0_17, %c0_18], %41 {strides = array<i32>} : memref<1x16x1152xf32, #tpu.memory_space<vmem>>, vector<1x16x1152xf32>,
    return
  }
  func.func @transform_0(%arg0: i32) -> (i32, i32, i32) {
    %c0_i32 = arith.constant 0 : i32
    %c0_i32_0 = arith.constant 0 : i32
    %c0_i32_1 = arith.constant 0 : i32
    return %arg0, %c0_i32, %c0_i32_0 : i32, i32, i32
  }
  func.func @transform_1(%arg0: i32) -> (i32, i32) {
    %c0_i32 = arith.constant 0 : i32
    %c0_i32_0 = arith.constant 0 : i32
    %c0_i32_1 = arith.constant 0 : i32
    return %c0_i32, %c0_i32_0 : i32, i32
  }
  func.func @transform_2(%arg0: i32) -> (i32, i32) {
    %c0_i32 = arith.constant 0 : i32
    %c0_i32_0 = arith.constant 0 : i32
    %c0_i32_1 = arith.constant 0 : i32
    return %c0_i32, %c0_i32_0 : i32, i32
  }
  func.func @transform_3(%arg0: i32) -> (i32, i32) {
    %c0_i32 = arith.constant 0 : i32
    %c0_i32_0 = arith.constant 0 : i32
    %c0_i32_1 = arith.constant 0 : i32
    return %c0_i32, %c0_i32_0 : i32, i32
  }
  func.func @transform_4(%arg0: i32) -> (i32, i32) {
    %c0_i32 = arith.constant 0 : i32
    %c0_i32_0 = arith.constant 0 : i32
    %c0_i32_1 = arith.constant 0 : i32
    return %c0_i32, %c0_i32_0 : i32, i32
  }
  func.func @transform_5(%arg0: i32) -> (i32, i32, i32) {
    %c0_i32 = arith.constant 0 : i32
    %c0_i32_0 = arith.constant 0 : i32
    %c0_i32_1 = arith.constant 0 : i32
    return %arg0, %c0_i32, %c0_i32_0 : i32, i32, i32
  }
}

module attributes {stable_mosaic.version = 11 : i64} {
  func.func @_conv_gn_pool_relu_kernel(%arg0: i32, %arg1: memref<1x144x1536xbf16, #tpu.memory_space<vmem>>, %arg2: memref<16x144xbf16, #tpu.memory_space<vmem>>, %arg3: memref<16x1xf32, #tpu.memory_space<vmem>>, %arg4: memref<16x1xf32, #tpu.memory_space<vmem>>, %arg5: memref<1x1536xf32, #tpu.memory_space<vmem>>, %arg6: memref<1x16x384xf32, #tpu.memory_space<vmem>>) attributes {dimension_semantics = [#tpu.dimension_semantics<parallel>], iteration_bounds = array<i64: 2>, scalar_prefetch = 0 : i64, scratch_operands = 0 : i64, tpu.core_type = #tpu.core_type<tc>, window_params = [{transform_indices = @transform_0, window_bounds = array<i64: 1, 144, 1536>}, {pipeline_mode = #tpu.pipeline_mode<synchronous>, transform_indices = @transform_1, window_bounds = array<i64: 16, 144>}, {pipeline_mode = #tpu.pipeline_mode<synchronous>, transform_indices = @transform_2, window_bounds = array<i64: 16, 1>}, {pipeline_mode = #tpu.pipeline_mode<synchronous>, transform_indices = @transform_3, window_bounds = array<i64: 16, 1>}, {pipeline_mode = #tpu.pipeline_mode<synchronous>, transform_indices = @transform_4, window_bounds = array<i64: 1, 1536>}, {transform_indices = @transform_5, window_bounds = array<i64: 1, 16, 384>}]} {
    %c0 = arith.constant 0 : index
    %c0_0 = arith.constant 0 : index
    %0 = vector.load %arg2[%c0, %c0_0] : memref<16x144xbf16, #tpu.memory_space<vmem>>, vector<16x144xbf16>
    %c0_1 = arith.constant 0 : index
    %c0_2 = arith.constant 0 : index
    %c0_3 = arith.constant 0 : index
    %1 = vector.load %arg1[%c0_1, %c0_2, %c0_3] : memref<1x144x1536xbf16, #tpu.memory_space<vmem>>, vector<1x144x1536xbf16>
    %2 = vector.shape_cast %1 : vector<1x144x1536xbf16> to vector<144x1536xbf16>
    %cst = arith.constant dense<0.000000e+00> : vector<16x1536xf32>
    %3 = tpu.matmul %0, %2, %cst {dimension_numbers = #tpu.dot_dimension_numbers<[1], [0], [0], [1], [0, 0, 1, 1], [], []>} : vector<16x144xbf16>, vector<144x1536xbf16>, vector<16x1536xf32> -> vector<16x1536xf32>
    %c0_4 = arith.constant 0 : index
    %c0_5 = arith.constant 0 : index
    %4 = vector.load %arg5[%c0_4, %c0_5] : memref<1x1536xf32, #tpu.memory_space<vmem>>, vector<1x1536xf32>
    %cst_6 = arith.constant dense<0.000000e+00> : vector<16xf32>
    %5 = vector.multi_reduction <add>, %3, %cst_6 [1] : vector<16x1536xf32> to vector<16xf32>
    %6 = vector.shape_cast %5 : vector<16xf32> to vector<16x1xf32>
    %7 = vector.extract_strided_slice %6 {offsets = [0, 0], sizes = [2, 1], strides = [1, 1]} : vector<16x1xf32> to vector<2x1xf32>
    %cst_7 = arith.constant dense<0.000000e+00> : vector<1xf32>
    %8 = vector.multi_reduction <add>, %7, %cst_7 [0] : vector<2x1xf32> to vector<1xf32>
    %9 = vector.shape_cast %8 : vector<1xf32> to vector<1x1xf32>
    %10 = vector.shape_cast %9 : vector<1x1xf32> to vector<1x1xf32>
    %11 = vector.broadcast %10 : vector<1x1xf32> to vector<2x1xf32>
    %12 = vector.extract_strided_slice %6 {offsets = [2, 0], sizes = [2, 1], strides = [1, 1]} : vector<16x1xf32> to vector<2x1xf32>
    %cst_8 = arith.constant dense<0.000000e+00> : vector<1xf32>
    %13 = vector.multi_reduction <add>, %12, %cst_8 [0] : vector<2x1xf32> to vector<1xf32>
    %14 = vector.shape_cast %13 : vector<1xf32> to vector<1x1xf32>
    %15 = vector.shape_cast %14 : vector<1x1xf32> to vector<1x1xf32>
    %16 = vector.broadcast %15 : vector<1x1xf32> to vector<2x1xf32>
    %17 = vector.extract_strided_slice %6 {offsets = [4, 0], sizes = [2, 1], strides = [1, 1]} : vector<16x1xf32> to vector<2x1xf32>
    %cst_9 = arith.constant dense<0.000000e+00> : vector<1xf32>
    %18 = vector.multi_reduction <add>, %17, %cst_9 [0] : vector<2x1xf32> to vector<1xf32>
    %19 = vector.shape_cast %18 : vector<1xf32> to vector<1x1xf32>
    %20 = vector.shape_cast %19 : vector<1x1xf32> to vector<1x1xf32>
    %21 = vector.broadcast %20 : vector<1x1xf32> to vector<2x1xf32>
    %22 = vector.extract_strided_slice %6 {offsets = [6, 0], sizes = [2, 1], strides = [1, 1]} : vector<16x1xf32> to vector<2x1xf32>
    %cst_10 = arith.constant dense<0.000000e+00> : vector<1xf32>
    %23 = vector.multi_reduction <add>, %22, %cst_10 [0] : vector<2x1xf32> to vector<1xf32>
    %24 = vector.shape_cast %23 : vector<1xf32> to vector<1x1xf32>
    %25 = vector.shape_cast %24 : vector<1x1xf32> to vector<1x1xf32>
    %26 = vector.broadcast %25 : vector<1x1xf32> to vector<2x1xf32>
    %27 = vector.extract_strided_slice %6 {offsets = [8, 0], sizes = [2, 1], strides = [1, 1]} : vector<16x1xf32> to vector<2x1xf32>
    %cst_11 = arith.constant dense<0.000000e+00> : vector<1xf32>
    %28 = vector.multi_reduction <add>, %27, %cst_11 [0] : vector<2x1xf32> to vector<1xf32>
    %29 = vector.shape_cast %28 : vector<1xf32> to vector<1x1xf32>
    %30 = vector.shape_cast %29 : vector<1x1xf32> to vector<1x1xf32>
    %31 = vector.broadcast %30 : vector<1x1xf32> to vector<2x1xf32>
    %32 = vector.extract_strided_slice %6 {offsets = [10, 0], sizes = [2, 1], strides = [1, 1]} : vector<16x1xf32> to vector<2x1xf32>
    %cst_12 = arith.constant dense<0.000000e+00> : vector<1xf32>
    %33 = vector.multi_reduction <add>, %32, %cst_12 [0] : vector<2x1xf32> to vector<1xf32>
    %34 = vector.shape_cast %33 : vector<1xf32> to vector<1x1xf32>
    %35 = vector.shape_cast %34 : vector<1x1xf32> to vector<1x1xf32>
    %36 = vector.broadcast %35 : vector<1x1xf32> to vector<2x1xf32>
    %37 = vector.extract_strided_slice %6 {offsets = [12, 0], sizes = [2, 1], strides = [1, 1]} : vector<16x1xf32> to vector<2x1xf32>
    %cst_13 = arith.constant dense<0.000000e+00> : vector<1xf32>
    %38 = vector.multi_reduction <add>, %37, %cst_13 [0] : vector<2x1xf32> to vector<1xf32>
    %39 = vector.shape_cast %38 : vector<1xf32> to vector<1x1xf32>
    %40 = vector.shape_cast %39 : vector<1x1xf32> to vector<1x1xf32>
    %41 = vector.broadcast %40 : vector<1x1xf32> to vector<2x1xf32>
    %42 = vector.extract_strided_slice %6 {offsets = [14, 0], sizes = [2, 1], strides = [1, 1]} : vector<16x1xf32> to vector<2x1xf32>
    %cst_14 = arith.constant dense<0.000000e+00> : vector<1xf32>
    %43 = vector.multi_reduction <add>, %42, %cst_14 [0] : vector<2x1xf32> to vector<1xf32>
    %44 = vector.shape_cast %43 : vector<1xf32> to vector<1x1xf32>
    %45 = vector.shape_cast %44 : vector<1x1xf32> to vector<1x1xf32>
    %46 = vector.broadcast %45 : vector<1x1xf32> to vector<2x1xf32>
    %47 = tpu.concatenate %11, %16, %21, %26, %31, %36, %41, %46 in 0 : vector<2x1xf32>, vector<2x1xf32>, vector<2x1xf32>, vector<2x1xf32>, vector<2x1xf32>, vector<2x1xf32>, vector<2x1xf32>, vector<2x1xf32> -> vector<16x1xf32>
    %cst_15 = arith.constant 4.5913682E-4 : f32
    %48 = vector.broadcast %cst_15 : f32 to vector<16x1xf32>
    %49 = arith.mulf %47, %48 : vector<16x1xf32>
    %50 = vector.broadcast %49 : vector<16x1xf32> to vector<16x1536xf32>
    %51 = arith.subf %3, %50 : vector<16x1536xf32>
    %52 = vector.broadcast %4 : vector<1x1536xf32> to vector<16x1536xf32>
    %53 = arith.mulf %51, %52 : vector<16x1536xf32>
    %54 = arith.mulf %53, %53 : vector<16x1536xf32>
    %cst_16 = arith.constant dense<0.000000e+00> : vector<16xf32>
    %55 = vector.multi_reduction <add>, %54, %cst_16 [1] : vector<16x1536xf32> to vector<16xf32>
    %56 = vector.shape_cast %55 : vector<16xf32> to vector<16x1xf32>
    %57 = vector.extract_strided_slice %56 {offsets = [0, 0], sizes = [2, 1], strides = [1, 1]} : vector<16x1xf32> to vector<2x1xf32>
    %cst_17 = arith.constant dense<0.000000e+00> : vector<1xf32>
    %58 = vector.multi_reduction <add>, %57, %cst_17 [0] : vector<2x1xf32> to vector<1xf32>
    %59 = vector.shape_cast %58 : vector<1xf32> to vector<1x1xf32>
    %60 = vector.shape_cast %59 : vector<1x1xf32> to vector<1x1xf32>
    %61 = vector.broadcast %60 : vector<1x1xf32> to vector<2x1xf32>
    %62 = vector.extract_strided_slice %56 {offsets = [2, 0], sizes = [2, 1], strides = [1, 1]} : vector<16x1xf32> to vector<2x1xf32>
    %cst_18 = arith.constant dense<0.000000e+00> : vector<1xf32>
    %63 = vector.multi_reduction <add>, %62, %cst_18 [0] : vector<2x1xf32> to vector<1xf32>
    %64 = vector.shape_cast %63 : vector<1xf32> to vector<1x1xf32>
    %65 = vector.shape_cast %64 : vector<1x1xf32> to vector<1x1xf32>
    %66 = vector.broadcast %65 : vector<1x1xf32> to vector<2x1xf32>
    %67 = vector.extract_strided_slice %56 {offsets = [4, 0], sizes = [2, 1], strides = [1, 1]} : vector<16x1xf32> to vector<2x1xf32>
    %cst_19 = arith.constant dense<0.000000e+00> : vector<1xf32>
    %68 = vector.multi_reduction <add>, %67, %cst_19 [0] : vector<2x1xf32> to vector<1xf32>
    %69 = vector.shape_cast %68 : vector<1xf32> to vector<1x1xf32>
    %70 = vector.shape_cast %69 : vector<1x1xf32> to vector<1x1xf32>
    %71 = vector.broadcast %70 : vector<1x1xf32> to vector<2x1xf32>
    %72 = vector.extract_strided_slice %56 {offsets = [6, 0], sizes = [2, 1], strides = [1, 1]} : vector<16x1xf32> to vector<2x1xf32>
    %cst_20 = arith.constant dense<0.000000e+00> : vector<1xf32>
    %73 = vector.multi_reduction <add>, %72, %cst_20 [0] : vector<2x1xf32> to vector<1xf32>
    %74 = vector.shape_cast %73 : vector<1xf32> to vector<1x1xf32>
    %75 = vector.shape_cast %74 : vector<1x1xf32> to vector<1x1xf32>
    %76 = vector.broadcast %75 : vector<1x1xf32> to vector<2x1xf32>
    %77 = vector.extract_strided_slice %56 {offsets = [8, 0], sizes = [2, 1], strides = [1, 1]} : vector<16x1xf32> to vector<2x1xf32>
    %cst_21 = arith.constant dense<0.000000e+00> : vector<1xf32>
    %78 = vector.multi_reduction <add>, %77, %cst_21 [0] : vector<2x1xf32> to vector<1xf32>
    %79 = vector.shape_cast %78 : vector<1xf32> to vector<1x1xf32>
    %80 = vector.shape_cast %79 : vector<1x1xf32> to vector<1x1xf32>
    %81 = vector.broadcast %80 : vector<1x1xf32> to vector<2x1xf32>
    %82 = vector.extract_strided_slice %56 {offsets = [10, 0], sizes = [2, 1], strides = [1, 1]} : vector<16x1xf32> to vector<2x1xf32>
    %cst_22 = arith.constant dense<0.000000e+00> : vector<1xf32>
    %83 = vector.multi_reduction <add>, %82, %cst_22 [0] : vector<2x1xf32> to vector<1xf32>
    %84 = vector.shape_cast %83 : vector<1xf32> to vector<1x1xf32>
    %85 = vector.shape_cast %84 : vector<1x1xf32> to vector<1x1xf32>
    %86 = vector.broadcast %85 : vector<1x1xf32> to vector<2x1xf32>
    %87 = vector.extract_strided_slice %56 {offsets = [12, 0], sizes = [2, 1], strides = [1, 1]} : vector<16x1xf32> to vector<2x1xf32>
    %cst_23 = arith.constant dense<0.000000e+00> : vector<1xf32>
    %88 = vector.multi_reduction <add>, %87, %cst_23 [0] : vector<2x1xf32> to vector<1xf32>
    %89 = vector.shape_cast %88 : vector<1xf32> to vector<1x1xf32>
    %90 = vector.shape_cast %89 : vector<1x1xf32> to vector<1x1xf32>
    %91 = vector.broadcast %90 : vector<1x1xf32> to vector<2x1xf32>
    %92 = vector.extract_strided_slice %56 {offsets = [14, 0], sizes = [2, 1], strides = [1, 1]} : vector<16x1xf32> to vector<2x1xf32>
    %cst_24 = arith.constant dense<0.000000e+00> : vector<1xf32>
    %93 = vector.multi_reduction <add>, %92, %cst_24 [0] : vector<2x1xf32> to vector<1xf32>
    %94 = vector.shape_cast %93 : vector<1xf32> to vector<1x1xf32>
    %95 = vector.shape_cast %94 : vector<1x1xf32> to vector<1x1xf32>
    %96 = vector.broadcast %95 : vector<1x1xf32> to vector<2x1xf32>
    %97 = tpu.concatenate %61, %66, %71, %76, %81, %86, %91, %96 in 0 : vector<2x1xf32>, vector<2x1xf32>, vector<2x1xf32>, vector<2x1xf32>, vector<2x1xf32>, vector<2x1xf32>, vector<2x1xf32>, vector<2x1xf32> -> vector<16x1xf32>
    %cst_25 = arith.constant 4.5913682E-4 : f32
    %98 = vector.broadcast %cst_25 : f32 to vector<16x1xf32>
    %99 = arith.mulf %97, %98 : vector<16x1xf32>
    %cst_26 = arith.constant 9.99999974E-6 : f32
    %100 = vector.broadcast %cst_26 : f32 to vector<16x1xf32>
    %101 = arith.addf %99, %100 : vector<16x1xf32>
    %102 = math.rsqrt %101 : vector<16x1xf32>
    %c0_27 = arith.constant 0 : index
    %c0_28 = arith.constant 0 : index
    %103 = vector.load %arg3[%c0_27, %c0_28] : memref<16x1xf32, #tpu.memory_space<vmem>>, vector<16x1xf32>
    %104 = arith.mulf %102, %103 : vector<16x1xf32>
    %105 = vector.broadcast %104 : vector<16x1xf32> to vector<16x1536xf32>
    %106 = arith.mulf %53, %105 : vector<16x1536xf32>
    %c0_29 = arith.constant 0 : index
    %c0_30 = arith.constant 0 : index
    %107 = vector.load %arg4[%c0_29, %c0_30] : memref<16x1xf32, #tpu.memory_space<vmem>>, vector<16x1xf32>
    %108 = vector.broadcast %107 : vector<16x1xf32> to vector<16x1536xf32>
    %109 = arith.addf %106, %108 : vector<16x1536xf32>
    %cst_31 = arith.constant 0.000000e+00 : f32
    %110 = vector.broadcast %cst_31 : f32 to vector<16x1536xf32>
    %111 = arith.maximumf %109, %110 : vector<16x1536xf32>
    %112 = vector.broadcast %4 : vector<1x1536xf32> to vector<16x1536xf32>
    %113 = arith.mulf %111, %112 : vector<16x1536xf32>
    %114 = vector.extract_strided_slice %113 {offsets = [0, 0], sizes = [16, 384], strides = [1, 1]} : vector<16x1536xf32> to vector<16x384xf32>
    %115 = vector.extract_strided_slice %113 {offsets = [0, 384], sizes = [16, 384], strides = [1, 1]} : vector<16x1536xf32> to vector<16x384xf32>
    %116 = vector.extract_strided_slice %113 {offsets = [0, 768], sizes = [16, 384], strides = [1, 1]} : vector<16x1536xf32> to vector<16x384xf32>
    %117 = vector.extract_strided_slice %113 {offsets = [0, 1152], sizes = [16, 384], strides = [1, 1]} : vector<16x1536xf32> to vector<16x384xf32>
    %118 = arith.maximumf %114, %115 : vector<16x384xf32>
    %119 = arith.maximumf %116, %117 : vector<16x384xf32>
    %120 = arith.maximumf %118, %119 : vector<16x384xf32>
    %c0_32 = arith.constant 0 : index
    %c0_33 = arith.constant 0 : index
    %c0_34 = arith.constant 0 : index
    %121 = vector.load %arg6[%c0_32, %c0_33, %c0_34] : memref<1x16x384xf32, #tpu.memory_space<vmem>>, vector<1x16x384xf32>
    %122 = vector.shape_cast %121 : vector<1x16x384xf32> to vector<16x384xf32>
    %123 = vector.shape_cast %120 : vector<16x384xf32> to vector<1x16x384xf32>
    tpu.vector_store %arg6[%c0_32, %c0_33, %c0_34], %123 {strides = array<i32>} : memref<1x16x384xf32, #tpu.memory_space<vmem>>, vector<1x16x384xf32>,
    return
  }
  func.func @transform_0(%arg0: i32) -> (i32, i32, i32) {
    %c0_i32 = arith.constant 0 : i32
    %c0_i32_0 = arith.constant 0 : i32
    %c0_i32_1 = arith.constant 0 : i32
    return %arg0, %c0_i32, %c0_i32_0 : i32, i32, i32
  }
  func.func @transform_1(%arg0: i32) -> (i32, i32) {
    %c0_i32 = arith.constant 0 : i32
    %c0_i32_0 = arith.constant 0 : i32
    %c0_i32_1 = arith.constant 0 : i32
    return %c0_i32, %c0_i32_0 : i32, i32
  }
  func.func @transform_2(%arg0: i32) -> (i32, i32) {
    %c0_i32 = arith.constant 0 : i32
    %c0_i32_0 = arith.constant 0 : i32
    %c0_i32_1 = arith.constant 0 : i32
    return %c0_i32, %c0_i32_0 : i32, i32
  }
  func.func @transform_3(%arg0: i32) -> (i32, i32) {
    %c0_i32 = arith.constant 0 : i32
    %c0_i32_0 = arith.constant 0 : i32
    %c0_i32_1 = arith.constant 0 : i32
    return %c0_i32, %c0_i32_0 : i32, i32
  }
  func.func @transform_4(%arg0: i32) -> (i32, i32) {
    %c0_i32 = arith.constant 0 : i32
    %c0_i32_0 = arith.constant 0 : i32
    %c0_i32_1 = arith.constant 0 : i32
    return %c0_i32, %c0_i32_0 : i32, i32
  }
  func.func @transform_5(%arg0: i32) -> (i32, i32, i32) {
    %c0_i32 = arith.constant 0 : i32
    %c0_i32_0 = arith.constant 0 : i32
    %c0_i32_1 = arith.constant 0 : i32
    return %arg0, %c0_i32, %c0_i32_0 : i32, i32, i32
  }
}

module attributes {stable_mosaic.version = 11 : i64} {
  func.func @_conv_gn_pool_relu_kernel(%arg0: i32, %arg1: memref<1x144x512xbf16, #tpu.memory_space<vmem>>, %arg2: memref<16x144xbf16, #tpu.memory_space<vmem>>, %arg3: memref<16x1xf32, #tpu.memory_space<vmem>>, %arg4: memref<16x1xf32, #tpu.memory_space<vmem>>, %arg5: memref<1x512xf32, #tpu.memory_space<vmem>>, %arg6: memref<1x16x128xf32, #tpu.memory_space<vmem>>) attributes {dimension_semantics = [#tpu.dimension_semantics<parallel>], iteration_bounds = array<i64: 2>, scalar_prefetch = 0 : i64, scratch_operands = 0 : i64, tpu.core_type = #tpu.core_type<tc>, window_params = [{transform_indices = @transform_0, window_bounds = array<i64: 1, 144, 512>}, {pipeline_mode = #tpu.pipeline_mode<synchronous>, transform_indices = @transform_1, window_bounds = array<i64: 16, 144>}, {pipeline_mode = #tpu.pipeline_mode<synchronous>, transform_indices = @transform_2, window_bounds = array<i64: 16, 1>}, {pipeline_mode = #tpu.pipeline_mode<synchronous>, transform_indices = @transform_3, window_bounds = array<i64: 16, 1>}, {pipeline_mode = #tpu.pipeline_mode<synchronous>, transform_indices = @transform_4, window_bounds = array<i64: 1, 512>}, {transform_indices = @transform_5, window_bounds = array<i64: 1, 16, 128>}]} {
    %c0 = arith.constant 0 : index
    %c0_0 = arith.constant 0 : index
    %0 = vector.load %arg2[%c0, %c0_0] : memref<16x144xbf16, #tpu.memory_space<vmem>>, vector<16x144xbf16>
    %c0_1 = arith.constant 0 : index
    %c0_2 = arith.constant 0 : index
    %c0_3 = arith.constant 0 : index
    %1 = vector.load %arg1[%c0_1, %c0_2, %c0_3] : memref<1x144x512xbf16, #tpu.memory_space<vmem>>, vector<1x144x512xbf16>
    %2 = vector.shape_cast %1 : vector<1x144x512xbf16> to vector<144x512xbf16>
    %cst = arith.constant dense<0.000000e+00> : vector<16x512xf32>
    %3 = tpu.matmul %0, %2, %cst {dimension_numbers = #tpu.dot_dimension_numbers<[1], [0], [0], [1], [0, 0, 1, 1], [], []>} : vector<16x144xbf16>, vector<144x512xbf16>, vector<16x512xf32> -> vector<16x512xf32>
    %c0_4 = arith.constant 0 : index
    %c0_5 = arith.constant 0 : index
    %4 = vector.load %arg5[%c0_4, %c0_5] : memref<1x512xf32, #tpu.memory_space<vmem>>, vector<1x512xf32>
    %cst_6 = arith.constant dense<0.000000e+00> : vector<16xf32>
    %5 = vector.multi_reduction <add>, %3, %cst_6 [1] : vector<16x512xf32> to vector<16xf32>
    %6 = vector.shape_cast %5 : vector<16xf32> to vector<16x1xf32>
    %7 = vector.extract_strided_slice %6 {offsets = [0, 0], sizes = [4, 1], strides = [1, 1]} : vector<16x1xf32> to vector<4x1xf32>
    %cst_7 = arith.constant dense<0.000000e+00> : vector<1xf32>
    %8 = vector.multi_reduction <add>, %7, %cst_7 [0] : vector<4x1xf32> to vector<1xf32>
    %9 = vector.shape_cast %8 : vector<1xf32> to vector<1x1xf32>
    %10 = vector.shape_cast %9 : vector<1x1xf32> to vector<1x1xf32>
    %11 = vector.broadcast %10 : vector<1x1xf32> to vector<4x1xf32>
    %12 = vector.extract_strided_slice %6 {offsets = [4, 0], sizes = [4, 1], strides = [1, 1]} : vector<16x1xf32> to vector<4x1xf32>
    %cst_8 = arith.constant dense<0.000000e+00> : vector<1xf32>
    %13 = vector.multi_reduction <add>, %12, %cst_8 [0] : vector<4x1xf32> to vector<1xf32>
    %14 = vector.shape_cast %13 : vector<1xf32> to vector<1x1xf32>
    %15 = vector.shape_cast %14 : vector<1x1xf32> to vector<1x1xf32>
    %16 = vector.broadcast %15 : vector<1x1xf32> to vector<4x1xf32>
    %17 = vector.extract_strided_slice %6 {offsets = [8, 0], sizes = [4, 1], strides = [1, 1]} : vector<16x1xf32> to vector<4x1xf32>
    %cst_9 = arith.constant dense<0.000000e+00> : vector<1xf32>
    %18 = vector.multi_reduction <add>, %17, %cst_9 [0] : vector<4x1xf32> to vector<1xf32>
    %19 = vector.shape_cast %18 : vector<1xf32> to vector<1x1xf32>
    %20 = vector.shape_cast %19 : vector<1x1xf32> to vector<1x1xf32>
    %21 = vector.broadcast %20 : vector<1x1xf32> to vector<4x1xf32>
    %22 = vector.extract_strided_slice %6 {offsets = [12, 0], sizes = [4, 1], strides = [1, 1]} : vector<16x1xf32> to vector<4x1xf32>
    %cst_10 = arith.constant dense<0.000000e+00> : vector<1xf32>
    %23 = vector.multi_reduction <add>, %22, %cst_10 [0] : vector<4x1xf32> to vector<1xf32>
    %24 = vector.shape_cast %23 : vector<1xf32> to vector<1x1xf32>
    %25 = vector.shape_cast %24 : vector<1x1xf32> to vector<1x1xf32>
    %26 = vector.broadcast %25 : vector<1x1xf32> to vector<4x1xf32>
    %27 = tpu.concatenate %11, %16, %21, %26 in 0 : vector<4x1xf32>, vector<4x1xf32>, vector<4x1xf32>, vector<4x1xf32> -> vector<16x1xf32>
    %cst_11 = arith.constant 8.6505193E-4 : f32
    %28 = vector.broadcast %cst_11 : f32 to vector<16x1xf32>
    %29 = arith.mulf %27, %28 : vector<16x1xf32>
    %30 = vector.broadcast %29 : vector<16x1xf32> to vector<16x512xf32>
    %31 = arith.subf %3, %30 : vector<16x512xf32>
    %32 = vector.broadcast %4 : vector<1x512xf32> to vector<16x512xf32>
    %33 = arith.mulf %31, %32 : vector<16x512xf32>
    %34 = arith.mulf %33, %33 : vector<16x512xf32>
    %cst_12 = arith.constant dense<0.000000e+00> : vector<16xf32>
    %35 = vector.multi_reduction <add>, %34, %cst_12 [1] : vector<16x512xf32> to vector<16xf32>
    %36 = vector.shape_cast %35 : vector<16xf32> to vector<16x1xf32>
    %37 = vector.extract_strided_slice %36 {offsets = [0, 0], sizes = [4, 1], strides = [1, 1]} : vector<16x1xf32> to vector<4x1xf32>
    %cst_13 = arith.constant dense<0.000000e+00> : vector<1xf32>
    %38 = vector.multi_reduction <add>, %37, %cst_13 [0] : vector<4x1xf32> to vector<1xf32>
    %39 = vector.shape_cast %38 : vector<1xf32> to vector<1x1xf32>
    %40 = vector.shape_cast %39 : vector<1x1xf32> to vector<1x1xf32>
    %41 = vector.broadcast %40 : vector<1x1xf32> to vector<4x1xf32>
    %42 = vector.extract_strided_slice %36 {offsets = [4, 0], sizes = [4, 1], strides = [1, 1]} : vector<16x1xf32> to vector<4x1xf32>
    %cst_14 = arith.constant dense<0.000000e+00> : vector<1xf32>
    %43 = vector.multi_reduction <add>, %42, %cst_14 [0] : vector<4x1xf32> to vector<1xf32>
    %44 = vector.shape_cast %43 : vector<1xf32> to vector<1x1xf32>
    %45 = vector.shape_cast %44 : vector<1x1xf32> to vector<1x1xf32>
    %46 = vector.broadcast %45 : vector<1x1xf32> to vector<4x1xf32>
    %47 = vector.extract_strided_slice %36 {offsets = [8, 0], sizes = [4, 1], strides = [1, 1]} : vector<16x1xf32> to vector<4x1xf32>
    %cst_15 = arith.constant dense<0.000000e+00> : vector<1xf32>
    %48 = vector.multi_reduction <add>, %47, %cst_15 [0] : vector<4x1xf32> to vector<1xf32>
    %49 = vector.shape_cast %48 : vector<1xf32> to vector<1x1xf32>
    %50 = vector.shape_cast %49 : vector<1x1xf32> to vector<1x1xf32>
    %51 = vector.broadcast %50 : vector<1x1xf32> to vector<4x1xf32>
    %52 = vector.extract_strided_slice %36 {offsets = [12, 0], sizes = [4, 1], strides = [1, 1]} : vector<16x1xf32> to vector<4x1xf32>
    %cst_16 = arith.constant dense<0.000000e+00> : vector<1xf32>
    %53 = vector.multi_reduction <add>, %52, %cst_16 [0] : vector<4x1xf32> to vector<1xf32>
    %54 = vector.shape_cast %53 : vector<1xf32> to vector<1x1xf32>
    %55 = vector.shape_cast %54 : vector<1x1xf32> to vector<1x1xf32>
    %56 = vector.broadcast %55 : vector<1x1xf32> to vector<4x1xf32>
    %57 = tpu.concatenate %41, %46, %51, %56 in 0 : vector<4x1xf32>, vector<4x1xf32>, vector<4x1xf32>, vector<4x1xf32> -> vector<16x1xf32>
    %cst_17 = arith.constant 8.6505193E-4 : f32
    %58 = vector.broadcast %cst_17 : f32 to vector<16x1xf32>
    %59 = arith.mulf %57, %58 : vector<16x1xf32>
    %cst_18 = arith.constant 9.99999974E-6 : f32
    %60 = vector.broadcast %cst_18 : f32 to vector<16x1xf32>
    %61 = arith.addf %59, %60 : vector<16x1xf32>
    %62 = math.rsqrt %61 : vector<16x1xf32>
    %c0_19 = arith.constant 0 : index
    %c0_20 = arith.constant 0 : index
    %63 = vector.load %arg3[%c0_19, %c0_20] : memref<16x1xf32, #tpu.memory_space<vmem>>, vector<16x1xf32>
    %64 = arith.mulf %62, %63 : vector<16x1xf32>
    %65 = vector.broadcast %64 : vector<16x1xf32> to vector<16x512xf32>
    %66 = arith.mulf %33, %65 : vector<16x512xf32>
    %c0_21 = arith.constant 0 : index
    %c0_22 = arith.constant 0 : index
    %67 = vector.load %arg4[%c0_21, %c0_22] : memref<16x1xf32, #tpu.memory_space<vmem>>, vector<16x1xf32>
    %68 = vector.broadcast %67 : vector<16x1xf32> to vector<16x512xf32>
    %69 = arith.addf %66, %68 : vector<16x512xf32>
    %cst_23 = arith.constant 0.000000e+00 : f32
    %70 = vector.broadcast %cst_23 : f32 to vector<16x512xf32>
    %71 = arith.maximumf %69, %70 : vector<16x512xf32>
    %72 = vector.broadcast %4 : vector<1x512xf32> to vector<16x512xf32>
    %73 = arith.mulf %71, %72 : vector<16x512xf32>
    %74 = vector.extract_strided_slice %73 {offsets = [0, 0], sizes = [16, 128], strides = [1, 1]} : vector<16x512xf32> to vector<16x128xf32>
    %75 = vector.extract_strided_slice %73 {offsets = [0, 128], sizes = [16, 128], strides = [1, 1]} : vector<16x512xf32> to vector<16x128xf32>
    %76 = vector.extract_strided_slice %73 {offsets = [0, 256], sizes = [16, 128], strides = [1, 1]} : vector<16x512xf32> to vector<16x128xf32>
    %77 = vector.extract_strided_slice %73 {offsets = [0, 384], sizes = [16, 128], strides = [1, 1]} : vector<16x512xf32> to vector<16x128xf32>
    %78 = arith.maximumf %74, %75 : vector<16x128xf32>
    %79 = arith.maximumf %76, %77 : vector<16x128xf32>
    %80 = arith.maximumf %78, %79 : vector<16x128xf32>
    %c0_24 = arith.constant 0 : index
    %c0_25 = arith.constant 0 : index
    %c0_26 = arith.constant 0 : index
    %81 = vector.load %arg6[%c0_24, %c0_25, %c0_26] : memref<1x16x128xf32, #tpu.memory_space<vmem>>, vector<1x16x128xf32>
    %82 = vector.shape_cast %81 : vector<1x16x128xf32> to vector<16x128xf32>
    %83 = vector.shape_cast %80 : vector<16x128xf32> to vector<1x16x128xf32>
    tpu.vector_store %arg6[%c0_24, %c0_25, %c0_26], %83 {strides = array<i32>} : memref<1x16x128xf32, #tpu.memory_space<vmem>>, vector<1x16x128xf32>,
    return
  }
  func.func @transform_0(%arg0: i32) -> (i32, i32, i32) {
    %c0_i32 = arith.constant 0 : i32
    %c0_i32_0 = arith.constant 0 : i32
    %c0_i32_1 = arith.constant 0 : i32
    return %arg0, %c0_i32, %c0_i32_0 : i32, i32, i32
  }
  func.func @transform_1(%arg0: i32) -> (i32, i32) {
    %c0_i32 = arith.constant 0 : i32
    %c0_i32_0 = arith.constant 0 : i32
    %c0_i32_1 = arith.constant 0 : i32
    return %c0_i32, %c0_i32_0 : i32, i32
  }
  func.func @transform_2(%arg0: i32) -> (i32, i32) {
    %c0_i32 = arith.constant 0 : i32
    %c0_i32_0 = arith.constant 0 : i32
    %c0_i32_1 = arith.constant 0 : i32
    return %c0_i32, %c0_i32_0 : i32, i32
  }
  func.func @transform_3(%arg0: i32) -> (i32, i32) {
    %c0_i32 = arith.constant 0 : i32
    %c0_i32_0 = arith.constant 0 : i32
    %c0_i32_1 = arith.constant 0 : i32
    return %c0_i32, %c0_i32_0 : i32, i32
  }
  func.func @transform_4(%arg0: i32) -> (i32, i32) {
    %c0_i32 = arith.constant 0 : i32
    %c0_i32_0 = arith.constant 0 : i32
    %c0_i32_1 = arith.constant 0 : i32
    return %c0_i32, %c0_i32_0 : i32, i32
  }
  func.func @transform_5(%arg0: i32) -> (i32, i32, i32) {
    %c0_i32 = arith.constant 0 : i32
    %c0_i32_0 = arith.constant 0 : i32
    %c0_i32_1 = arith.constant 0 : i32
    return %arg0, %c0_i32, %c0_i32_0 : i32, i32, i32
  }
}

module attributes {stable_mosaic.version = 11 : i64} {
  func.func @_conv_gn_pool_relu_kernel(%arg0: i32, %arg1: memref<1x144x512xbf16, #tpu.memory_space<vmem>>, %arg2: memref<16x144xbf16, #tpu.memory_space<vmem>>, %arg3: memref<16x1xf32, #tpu.memory_space<vmem>>, %arg4: memref<16x1xf32, #tpu.memory_space<vmem>>, %arg5: memref<1x512xf32, #tpu.memory_space<vmem>>, %arg6: memref<1x16x128xf32, #tpu.memory_space<vmem>>) attributes {dimension_semantics = [#tpu.dimension_semantics<parallel>], iteration_bounds = array<i64: 2>, scalar_prefetch = 0 : i64, scratch_operands = 0 : i64, tpu.core_type = #tpu.core_type<tc>, window_params = [{transform_indices = @transform_0, window_bounds = array<i64: 1, 144, 512>}, {pipeline_mode = #tpu.pipeline_mode<synchronous>, transform_indices = @transform_1, window_bounds = array<i64: 16, 144>}, {pipeline_mode = #tpu.pipeline_mode<synchronous>, transform_indices = @transform_2, window_bounds = array<i64: 16, 1>}, {pipeline_mode = #tpu.pipeline_mode<synchronous>, transform_indices = @transform_3, window_bounds = array<i64: 16, 1>}, {pipeline_mode = #tpu.pipeline_mode<synchronous>, transform_indices = @transform_4, window_bounds = array<i64: 1, 512>}, {transform_indices = @transform_5, window_bounds = array<i64: 1, 16, 128>}]} {
    %c0 = arith.constant 0 : index
    %c0_0 = arith.constant 0 : index
    %0 = vector.load %arg2[%c0, %c0_0] : memref<16x144xbf16, #tpu.memory_space<vmem>>, vector<16x144xbf16>
    %c0_1 = arith.constant 0 : index
    %c0_2 = arith.constant 0 : index
    %c0_3 = arith.constant 0 : index
    %1 = vector.load %arg1[%c0_1, %c0_2, %c0_3] : memref<1x144x512xbf16, #tpu.memory_space<vmem>>, vector<1x144x512xbf16>
    %2 = vector.shape_cast %1 : vector<1x144x512xbf16> to vector<144x512xbf16>
    %cst = arith.constant dense<0.000000e+00> : vector<16x512xf32>
    %3 = tpu.matmul %0, %2, %cst {dimension_numbers = #tpu.dot_dimension_numbers<[1], [0], [0], [1], [0, 0, 1, 1], [], []>} : vector<16x144xbf16>, vector<144x512xbf16>, vector<16x512xf32> -> vector<16x512xf32>
    %c0_4 = arith.constant 0 : index
    %c0_5 = arith.constant 0 : index
    %4 = vector.load %arg5[%c0_4, %c0_5] : memref<1x512xf32, #tpu.memory_space<vmem>>, vector<1x512xf32>
    %cst_6 = arith.constant dense<0.000000e+00> : vector<16xf32>
    %5 = vector.multi_reduction <add>, %3, %cst_6 [1] : vector<16x512xf32> to vector<16xf32>
    %6 = vector.shape_cast %5 : vector<16xf32> to vector<16x1xf32>
    %7 = vector.extract_strided_slice %6 {offsets = [0, 0], sizes = [8, 1], strides = [1, 1]} : vector<16x1xf32> to vector<8x1xf32>
    %cst_7 = arith.constant dense<0.000000e+00> : vector<1xf32>
    %8 = vector.multi_reduction <add>, %7, %cst_7 [0] : vector<8x1xf32> to vector<1xf32>
    %9 = vector.shape_cast %8 : vector<1xf32> to vector<1x1xf32>
    %10 = vector.shape_cast %9 : vector<1x1xf32> to vector<1x1xf32>
    %11 = vector.broadcast %10 : vector<1x1xf32> to vector<8x1xf32>
    %12 = vector.extract_strided_slice %6 {offsets = [8, 0], sizes = [8, 1], strides = [1, 1]} : vector<16x1xf32> to vector<8x1xf32>
    %cst_8 = arith.constant dense<0.000000e+00> : vector<1xf32>
    %13 = vector.multi_reduction <add>, %12, %cst_8 [0] : vector<8x1xf32> to vector<1xf32>
    %14 = vector.shape_cast %13 : vector<1xf32> to vector<1x1xf32>
    %15 = vector.shape_cast %14 : vector<1x1xf32> to vector<1x1xf32>
    %16 = vector.broadcast %15 : vector<1x1xf32> to vector<8x1xf32>
    %17 = tpu.concatenate %11, %16 in 0 : vector<8x1xf32>, vector<8x1xf32> -> vector<16x1xf32>
    %cst_9 = arith.constant 0.00154320989 : f32
    %18 = vector.broadcast %cst_9 : f32 to vector<16x1xf32>
    %19 = arith.mulf %17, %18 : vector<16x1xf32>
    %20 = vector.broadcast %19 : vector<16x1xf32> to vector<16x512xf32>
    %21 = arith.subf %3, %20 : vector<16x512xf32>
    %22 = vector.broadcast %4 : vector<1x512xf32> to vector<16x512xf32>
    %23 = arith.mulf %21, %22 : vector<16x512xf32>
    %24 = arith.mulf %23, %23 : vector<16x512xf32>
    %cst_10 = arith.constant dense<0.000000e+00> : vector<16xf32>
    %25 = vector.multi_reduction <add>, %24, %cst_10 [1] : vector<16x512xf32> to vector<16xf32>
    %26 = vector.shape_cast %25 : vector<16xf32> to vector<16x1xf32>
    %27 = vector.extract_strided_slice %26 {offsets = [0, 0], sizes = [8, 1], strides = [1, 1]} : vector<16x1xf32> to vector<8x1xf32>
    %cst_11 = arith.constant dense<0.000000e+00> : vector<1xf32>
    %28 = vector.multi_reduction <add>, %27, %cst_11 [0] : vector<8x1xf32> to vector<1xf32>
    %29 = vector.shape_cast %28 : vector<1xf32> to vector<1x1xf32>
    %30 = vector.shape_cast %29 : vector<1x1xf32> to vector<1x1xf32>
    %31 = vector.broadcast %30 : vector<1x1xf32> to vector<8x1xf32>
    %32 = vector.extract_strided_slice %26 {offsets = [8, 0], sizes = [8, 1], strides = [1, 1]} : vector<16x1xf32> to vector<8x1xf32>
    %cst_12 = arith.constant dense<0.000000e+00> : vector<1xf32>
    %33 = vector.multi_reduction <add>, %32, %cst_12 [0] : vector<8x1xf32> to vector<1xf32>
    %34 = vector.shape_cast %33 : vector<1xf32> to vector<1x1xf32>
    %35 = vector.shape_cast %34 : vector<1x1xf32> to vector<1x1xf32>
    %36 = vector.broadcast %35 : vector<1x1xf32> to vector<8x1xf32>
    %37 = tpu.concatenate %31, %36 in 0 : vector<8x1xf32>, vector<8x1xf32> -> vector<16x1xf32>
    %cst_13 = arith.constant 0.00154320989 : f32
    %38 = vector.broadcast %cst_13 : f32 to vector<16x1xf32>
    %39 = arith.mulf %37, %38 : vector<16x1xf32>
    %cst_14 = arith.constant 9.99999974E-6 : f32
    %40 = vector.broadcast %cst_14 : f32 to vector<16x1xf32>
    %41 = arith.addf %39, %40 : vector<16x1xf32>
    %42 = math.rsqrt %41 : vector<16x1xf32>
    %c0_15 = arith.constant 0 : index
    %c0_16 = arith.constant 0 : index
    %43 = vector.load %arg3[%c0_15, %c0_16] : memref<16x1xf32, #tpu.memory_space<vmem>>, vector<16x1xf32>
    %44 = arith.mulf %42, %43 : vector<16x1xf32>
    %45 = vector.broadcast %44 : vector<16x1xf32> to vector<16x512xf32>
    %46 = arith.mulf %23, %45 : vector<16x512xf32>
    %c0_17 = arith.constant 0 : index
    %c0_18 = arith.constant 0 : index
    %47 = vector.load %arg4[%c0_17, %c0_18] : memref<16x1xf32, #tpu.memory_space<vmem>>, vector<16x1xf32>
    %48 = vector.broadcast %47 : vector<16x1xf32> to vector<16x512xf32>
    %49 = arith.addf %46, %48 : vector<16x512xf32>
    %cst_19 = arith.constant 0.000000e+00 : f32
    %50 = vector.broadcast %cst_19 : f32 to vector<16x512xf32>
    %51 = arith.maximumf %49, %50 : vector<16x512xf32>
    %52 = vector.broadcast %4 : vector<1x512xf32> to vector<16x512xf32>
    %53 = arith.mulf %51, %52 : vector<16x512xf32>
    %54 = vector.extract_strided_slice %53 {offsets = [0, 0], sizes = [16, 128], strides = [1, 1]} : vector<16x512xf32> to vector<16x128xf32>
    %55 = vector.extract_strided_slice %53 {offsets = [0, 128], sizes = [16, 128], strides = [1, 1]} : vector<16x512xf32> to vector<16x128xf32>
    %56 = vector.extract_strided_slice %53 {offsets = [0, 256], sizes = [16, 128], strides = [1, 1]} : vector<16x512xf32> to vector<16x128xf32>
    %57 = vector.extract_strided_slice %53 {offsets = [0, 384], sizes = [16, 128], strides = [1, 1]} : vector<16x512xf32> to vector<16x128xf32>
    %58 = arith.maximumf %54, %55 : vector<16x128xf32>
    %59 = arith.maximumf %56, %57 : vector<16x128xf32>
    %60 = arith.maximumf %58, %59 : vector<16x128xf32>
    %c0_20 = arith.constant 0 : index
    %c0_21 = arith.constant 0 : index
    %c0_22 = arith.constant 0 : index
    %61 = vector.load %arg6[%c0_20, %c0_21, %c0_22] : memref<1x16x128xf32, #tpu.memory_space<vmem>>, vector<1x16x128xf32>
    %62 = vector.shape_cast %61 : vector<1x16x128xf32> to vector<16x128xf32>
    %63 = vector.shape_cast %60 : vector<16x128xf32> to vector<1x16x128xf32>
    tpu.vector_store %arg6[%c0_20, %c0_21, %c0_22], %63 {strides = array<i32>} : memref<1x16x128xf32, #tpu.memory_space<vmem>>, vector<1x16x128xf32>,
    return
  }
  func.func @transform_0(%arg0: i32) -> (i32, i32, i32) {
    %c0_i32 = arith.constant 0 : i32
    %c0_i32_0 = arith.constant 0 : i32
    %c0_i32_1 = arith.constant 0 : i32
    return %arg0, %c0_i32, %c0_i32_0 : i32, i32, i32
  }
  func.func @transform_1(%arg0: i32) -> (i32, i32) {
    %c0_i32 = arith.constant 0 : i32
    %c0_i32_0 = arith.constant 0 : i32
    %c0_i32_1 = arith.constant 0 : i32
    return %c0_i32, %c0_i32_0 : i32, i32
  }
  func.func @transform_2(%arg0: i32) -> (i32, i32) {
    %c0_i32 = arith.constant 0 : i32
    %c0_i32_0 = arith.constant 0 : i32
    %c0_i32_1 = arith.constant 0 : i32
    return %c0_i32, %c0_i32_0 : i32, i32
  }
  func.func @transform_3(%arg0: i32) -> (i32, i32) {
    %c0_i32 = arith.constant 0 : i32
    %c0_i32_0 = arith.constant 0 : i32
    %c0_i32_1 = arith.constant 0 : i32
    return %c0_i32, %c0_i32_0 : i32, i32
  }
  func.func @transform_4(%arg0: i32) -> (i32, i32) {
    %c0_i32 = arith.constant 0 : i32
    %c0_i32_0 = arith.constant 0 : i32
    %c0_i32_1 = arith.constant 0 : i32
    return %c0_i32, %c0_i32_0 : i32, i32
  }
  func.func @transform_5(%arg0: i32) -> (i32, i32, i32) {
    %c0_i32 = arith.constant 0 : i32
    %c0_i32_0 = arith.constant 0 : i32
    %c0_i32_1 = arith.constant 0 : i32
    return %arg0, %c0_i32, %c0_i32_0 : i32, i32, i32
  }
}

</mosaic_0001>

<bundles_post_ra>
// kernel: _lambda_.4
= control target key start
LH: loop header
LB: loop body
LE: loop exit
PB: predicated region body
PF: predicated region fallthrough
CT: control target
= control target key end

     0   :  { %s2711_s18 = smov 0   ;;  %s4146_s0 = inlined_call_operand.vmem [shape: bf16[2,32,4608], index: 0, kind: input, shape index: {}]   ;;  %s4147_s1 = inlined_call_operand.vmem [shape: bf16[16,32], index: 1, kind: input, shape index: {}]   ;;  %s4148_s2 = inlined_call_operand.vmem [shape: f32[16,1], index: 2, kind: input, shape index: {}]   ;;  %s4149_s3 = inlined_call_operand.vmem [shape: f32[16,1], index: 3, kind: input, shape index: {}]   ;;  %s4150_s4 = inlined_call_operand.vmem [shape: f32[1,4608], index: 4, kind: input, shape index: {}]   ;;  %s4151_s5 = inlined_call_operand.vmem [shape: f32[2,16,1152], index: 5, kind: output, shape index: {}]  }
   0x1 LB: > { %s2446_s19 = sadd.s32 4294967295, %s2678_s18   ;;  %p2450_p0 = scmp.ge.s32.totalorder %s2678_s18, 1  ;;  %s2678_s18 = sphi %s2711_s18, %s15_s18  }
   0x2   : > { %p187_p1 = scmp.lt.s32.totalorder %s2678_s18, 3 }
   0x4   : > { %p188_p2 = pnand %p2450_p0, %p187_p1 }
   0x6   : > { %191 = sbr.rel (%p188_p2) target bundleno = 912 (0x390), region = 40 }
   0xd   : > { %p215_p3 = scmp.lt.s32.totalorder %s2446_s19, 1  ;;  %v2680_v0 = vmov 0   ;;  %v2742_v9 = vld [vmem:[%s4147_s1] sm:$0xff]   ;;  %vm665_vm0 = vcmask 261120  }
   0xe   : > { %701 = vmatprep.mubr.bf16.mxu0 %v2680_v0  ;;  %744 = vmatprep.mubr.bf16.mxu1 %v2680_v0 }
   0xf   : > { %s4581_s19 = smov (!%p215_p3, %s2446_s19), 1  ;;  %2558 = vset.pattern.permute.xlu1 %v2680_v0  ;;  %2557 = vset.pattern.permute.xlu0 %v2680_v0 }
  0x10   : > { %s2546_s20 = smul.u32 576, %s4581_s19 }
  0x11   : > { %s2547_s21 = smul.u32 144, %s4581_s19 }
  0x12   : > { %s2729_s23 = scalar_lea.vmem %s4146_s0, %s2546_s20 }
  0x13   : > { %v2559_v1 = vld [vmem:[%s2729_s23 + $0x4] ss:$144 sps:$4 sm:$0xff]   ;;  %v2561_v2 = vld [vmem:[%s2729_s23] ss:$144 sps:$4 sm:$0xff]   ;;  %v2562_v3 = vld [vmem:[%s2729_s23 + $0xc] ss:$144 sps:$4 sm:$0xff]  }
  0x14   : > { %669 = vmatprep.subr.bf16.mxu0 %v2559_v1  ;;  %v2564_v4 = vld [vmem:[%s2729_s23 + $0x8] ss:$144 sps:$4 sm:$0xff]   ;;  %v2565_v5 = vld [vmem:[%s2729_s23 + $0x124] ss:$144 sps:$4 sm:$0xff]   ;;  %v2567_v6 = vld [vmem:[%s2729_s23 + $0x120] ss:$144 sps:$4 sm:$0xff]   ;;  %712 = vmatprep.subr.bf16.mxu1 %v2562_v3 }
  0x15   : > { %670 = vmatpush1.bf16.msra.mxu0 %v2561_v2  ;;  %v2568_v7 = vld [vmem:[%s2729_s23 + $0x12c] ss:$144 sps:$4 sm:$0xff]   ;;  %713 = vmatpush1.bf16.msra.mxu1 %v2564_v4  ;;  %v2570_v8 = vld [vmem:[%s2729_s23 + $0x128] ss:$144 sps:$4 sm:$0xff]   ;;  %v2574_v10 = vld [vmem:[%s2729_s23 + $0x14] ss:$144 sps:$4 sm:$0xff]  }
  0x16   : > { %671 = vmatprep.subr.bf16.mxu0 %v2565_v5  ;;  %714 = vmatprep.subr.bf16.mxu1 %v2568_v7  ;;  %v2572_v11 = vld [vmem:[%s2729_s23 + $0x10] ss:$144 sps:$4 sm:$0xff]   ;;  %v2577_v12 = vld [vmem:[%s2729_s23 + $0x1c] ss:$144 sps:$4 sm:$0xff]   ;;  %v2575_v13 = vld [vmem:[%s2729_s23 + $0x18] ss:$144 sps:$4 sm:$0xff]  }
  0x17   : > { %v2580_v14 = vld [vmem:[%s2729_s23 + $0x134] ss:$144 sps:$4 sm:$0xff]   ;;  %v2583_v15 = vld [vmem:[%s2729_s23 + $0x13c] ss:$144 sps:$4 sm:$0xff]   ;;  %v2578_v16 = vld [vmem:[%s2729_s23 + $0x130] ss:$144 sps:$4 sm:$0xff]  }
  0x18   : > { %v2586_v17 = vld [vmem:[%s2729_s23 + $0x24] ss:$144 sps:$4 sm:$0xff]   ;;  %v2581_v18 = vld [vmem:[%s2729_s23 + $0x138] ss:$144 sps:$4 sm:$0xff]   ;;  %v2589_v19 = vld [vmem:[%s2729_s23 + $0x2c] ss:$144 sps:$4 sm:$0xff]  }
  0x19   : > { %672 = vmatpush1.bf16.msra.mxu0 %v2567_v6  ;;  %715 = vmatpush1.bf16.msra.mxu1 %v2570_v8  ;;  %v2584_v20 = vld [vmem:[%s2729_s23 + $0x20] ss:$144 sps:$4 sm:$0xff]   ;;  %v2592_v21 = vld [vmem:[%s2729_s23 + $0x144] ss:$144 sps:$4 sm:$0xff]   ;;  %v2587_v22 = vld [vmem:[%s2729_s23 + $0x28] ss:$144 sps:$4 sm:$0xff]  }
  0x1a   : > { %755 = vmatprep.subr.bf16.mxu0 %v2574_v10  ;;  %798 = vmatprep.subr.bf16.mxu1 %v2577_v12  ;;  %v2595_v23 = vld [vmem:[%s2729_s23 + $0x14c] ss:$144 sps:$4 sm:$0xff]   ;;  %v2590_v24 = vld [vmem:[%s2729_s23 + $0x140] ss:$144 sps:$4 sm:$0xff]   ;;  %v2598_v25 = vld [vmem:[%s2729_s23 + $0x34] ss:$144 sps:$4 sm:$0xff]  }
  0x1b   : > { %v2593_v26 = vld [vmem:[%s2729_s23 + $0x148] ss:$144 sps:$4 sm:$0xff]   ;;  %v2601_v27 = vld [vmem:[%s2729_s23 + $0x3c] ss:$144 sps:$4 sm:$0xff]   ;;  %v2596_v28 = vld [vmem:[%s2729_s23 + $0x30] ss:$144 sps:$4 sm:$0xff]  }
  0x1c   : > { %2526 = vmatmul.mubr.msk.bf16.vlgmr.msra.gmra.mrb[0].mxu0 %vm665_vm0, %v2742_v9  ;;  %2527 = vmatmul.mubr.msk.bf16.vlgmr.msra.gmra.mrb[0].mxu1 %vm665_vm0, %v2742_v9  ;;  %v2604_v29 = vld [vmem:[%s2729_s23 + $0x154] ss:$144 sps:$4 sm:$0xff]   ;;  %v2599_v30 = vld [vmem:[%s2729_s23 + $0x38] ss:$144 sps:$4 sm:$0xff]   ;;  %v2607_v31 = vld [vmem:[%s2729_s23 + $0x15c] ss:$144 sps:$4 sm:$0xff]  }
  0x1d   : > { %756 = vmatpush1.bf16.msra.mxu0 %v2572_v11  ;;  %787 = vmatprep.mubr.bf16.mxu0 %v2680_v0  ;;  %v2602_v32 = vld [vmem:[%s2729_s23 + $0x150] ss:$144 sps:$4 sm:$0xff]   ;;  %v2610_v33 = vld [vmem:[%s2729_s23 + $0x44] ss:$144 sps:$4 sm:$0xff]   ;;  %v2605_v34 = vld [vmem:[%s2729_s23 + $0x158] ss:$144 sps:$4 sm:$0xff]  }
  0x1e   : > { %757 = vmatprep.subr.bf16.mxu0 %v2580_v14  ;;  %799 = vmatpush1.bf16.msra.mxu1 %v2575_v13  ;;  %v2613_v35 = vld [vmem:[%s2729_s23 + $0x4c] ss:$144 sps:$4 sm:$0xff]   ;;  %v2608_v36 = vld [vmem:[%s2729_s23 + $0x40] ss:$144 sps:$4 sm:$0xff]   ;;  %v2616_v37 = vld [vmem:[%s2729_s23 + $0x164] ss:$144 sps:$4 sm:$0xff]  }
  0x1f   : > { %830 = vmatprep.mubr.bf16.mxu1 %v2680_v0  ;;  %800 = vmatprep.subr.bf16.mxu1 %v2583_v15  ;;  %v2611_v38 = vld [vmem:[%s2729_s23 + $0x48] ss:$144 sps:$4 sm:$0xff]   ;;  %v2619_v39 = vld [vmem:[%s2729_s23 + $0x16c] ss:$144 sps:$4 sm:$0xff]   ;;  %v2614_v40 = vld [vmem:[%s2729_s23 + $0x160] ss:$144 sps:$4 sm:$0xff]  }
  0x20   : > { %v2622_v41 = vld [vmem:[%s2729_s23 + $0x54] ss:$144 sps:$4 sm:$0xff]   ;;  %v2617_v42 = vld [vmem:[%s2729_s23 + $0x168] ss:$144 sps:$4 sm:$0xff]   ;;  %v2625_v43 = vld [vmem:[%s2729_s23 + $0x5c] ss:$144 sps:$4 sm:$0xff]  }
  0x21   : > { %758 = vmatpush1.bf16.msra.mxu0 %v2578_v16  ;;  %v2620_v44 = vld [vmem:[%s2729_s23 + $0x50] ss:$144 sps:$4 sm:$0xff]   ;;  %v2628_v45 = vld [vmem:[%s2729_s23 + $0x174] ss:$144 sps:$4 sm:$0xff]   ;;  %v2623_v46 = vld [vmem:[%s2729_s23 + $0x58] ss:$144 sps:$4 sm:$0xff]  }
  0x22   : > { %841 = vmatprep.subr.bf16.mxu0 %v2586_v17  ;;  %801 = vmatpush1.bf16.msra.mxu1 %v2581_v18  ;;  %v2631_v47 = vld [vmem:[%s2729_s23 + $0x17c] ss:$144 sps:$4 sm:$0xff]   ;;  %v2626_v48 = vld [vmem:[%s2729_s23 + $0x170] ss:$144 sps:$4 sm:$0xff]   ;;  %v2634_v49 = vld [vmem:[%s2729_s23 + $0x64] ss:$144 sps:$4 sm:$0xff]  }
  0x23   : > { %884 = vmatprep.subr.bf16.mxu1 %v2589_v19  ;;  %v2629_v50 = vld [vmem:[%s2729_s23 + $0x178] ss:$144 sps:$4 sm:$0xff]   ;;  %v2637_v51 = vld [vmem:[%s2729_s23 + $0x6c] ss:$144 sps:$4 sm:$0xff]   ;;  %v2632_v52 = vld [vmem:[%s2729_s23 + $0x60] ss:$144 sps:$4 sm:$0xff]  }
  0x24   : > { %2528 = vmatmul.mubr.msk.bf16.vlgmr.msra.gmra.mrb[4].mxu0 %vm665_vm0, %v2742_v9  ;;  %v2640_v53 = vld [vmem:[%s2729_s23 + $0x184] ss:$144 sps:$4 sm:$0xff]   ;;  %v2635_v54 = vld [vmem:[%s2729_s23 + $0x68] ss:$144 sps:$4 sm:$0xff]   ;;  %v2643_v55 = vld [vmem:[%s2729_s23 + $0x18c] ss:$144 sps:$4 sm:$0xff]  }
  0x25   : > { %842 = vmatpush1.bf16.msra.mxu0 %v2584_v20  ;;  %873 = vmatprep.mubr.bf16.mxu0 %v2680_v0  ;;  %v2638_v56 = vld [vmem:[%s2729_s23 + $0x180] ss:$144 sps:$4 sm:$0xff]   ;;  %v2646_v57 = vld [vmem:[%s2729_s23 + $0x74] ss:$144 sps:$4 sm:$0xff]   ;;  %v2641_v58 = vld [vmem:[%s2729_s23 + $0x188] ss:$144 sps:$4 sm:$0xff]  }
  0x26   : > { %2529 = vmatmul.mubr.msk.bf16.vlgmr.msra.gmra.mrb[4].mxu1 %vm665_vm0, %v2742_v9  ;;  %843 = vmatprep.subr.bf16.mxu0 %v2592_v21  ;;  %v2649_v59 = vld [vmem:[%s2729_s23 + $0x7c] ss:$144 sps:$4 sm:$0xff]   ;;  %v2644_v60 = vld [vmem:[%s2729_s23 + $0x70] ss:$144 sps:$4 sm:$0xff]   ;;  %v2652_v61 = vld [vmem:[%s2729_s23 + $0x194] ss:$144 sps:$4 sm:$0xff]  }
  0x27   : > { %885 = vmatpush1.bf16.msra.mxu1 %v2587_v22  ;;  %916 = vmatprep.mubr.bf16.mxu1 %v2680_v0  ;;  %v2647_v62 = vld [vmem:[%s2729_s23 + $0x78] ss:$144 sps:$4 sm:$0xff]   ;;  %v2655_v63 = vld [vmem:[%s2729_s23 + $0x19c] ss:$144 sps:$4 sm:$0xff]   ;;  %v2650_v1 = vld [vmem:[%s2729_s23 + $0x190] ss:$144 sps:$4 sm:$0xff]  }
  0x28   : > { %886 = vmatprep.subr.bf16.mxu1 %v2595_v23  ;;  %v2658_v2 = vld [vmem:[%s2729_s23 + $0x84] ss:$144 sps:$4 sm:$0xff]   ;;  %v2653_v3 = vld [vmem:[%s2729_s23 + $0x198] ss:$144 sps:$4 sm:$0xff]   ;;  %v2661_v4 = vld [vmem:[%s2729_s23 + $0x8c] ss:$144 sps:$4 sm:$0xff]  }
  0x29   : > { %844 = vmatpush1.bf16.msra.mxu0 %v2590_v24  ;;  %v2656_v5 = vld [vmem:[%s2729_s23 + $0x80] ss:$144 sps:$4 sm:$0xff]   ;;  %v2664_v6 = vld [vmem:[%s2729_s23 + $0x1a4] ss:$144 sps:$4 sm:$0xff]   ;;  %v2659_v7 = vld [vmem:[%s2729_s23 + $0x88] ss:$144 sps:$4 sm:$0xff]  }
  0x2a   : > { %927 = vmatprep.subr.bf16.mxu0 %v2598_v25  ;;  %v2667_v8 = vld [vmem:[%s2729_s23 + $0x1ac] ss:$144 sps:$4 sm:$0xff]   ;;  %v2662_v10 = vld [vmem:[%s2729_s23 + $0x1a0] ss:$144 sps:$4 sm:$0xff]   ;;  %v2665_v11 = vld [vmem:[%s2729_s23 + $0x1a8] ss:$144 sps:$4 sm:$0xff]   ;;  %s3943_s23 = scalar_lea.vmem %s4151_s5, %s2547_s21 }
  0x2b   : > { %887 = vmatpush1.bf16.msra.mxu1 %v2593_v26 }
  0x2c   : > { %2530 = vmatmul.mubr.msk.bf16.vlgmr.msra.gmra.mrb[8].mxu0 %vm665_vm0, %v2742_v9  ;;  %970 = vmatprep.subr.bf16.mxu1 %v2601_v27 }
  0x2d   : > { %928 = vmatpush1.bf16.msra.mxu0 %v2596_v28  ;;  %959 = vmatprep.mubr.bf16.mxu0 %v2680_v0 }
  0x2e   : > { %2531 = vmatmul.mubr.msk.bf16.vlgmr.msra.gmra.mrb[8].mxu1 %vm665_vm0, %v2742_v9  ;;  %929 = vmatprep.subr.bf16.mxu0 %v2604_v29 }
  0x2f   : > { %971 = vmatpush1.bf16.msra.mxu1 %v2599_v30  ;;  %1002 = vmatprep.mubr.bf16.mxu1 %v2680_v0 }
  0x30   : > { %972 = vmatprep.subr.bf16.mxu1 %v2607_v31 }
  0x31   : > { %930 = vmatpush1.bf16.msra.mxu0 %v2602_v32 }
  0x32   : > { %1013 = vmatprep.subr.bf16.mxu0 %v2610_v33 }
  0x33   : > { %973 = vmatpush1.bf16.msra.mxu1 %v2605_v34 }
  0x34   : > { %2532 = vmatmul.mubr.msk.bf16.vlgmr.msra.gmra.mrb[12].mxu0 %vm665_vm0, %v2742_v9  ;;  %1056 = vmatprep.subr.bf16.mxu1 %v2613_v35 }
  0x35   : > { %1014 = vmatpush1.bf16.msra.mxu0 %v2608_v36  ;;  %1045 = vmatprep.mubr.bf16.mxu0 %v2680_v0 }
  0x36   : > { %2533 = vmatmul.mubr.msk.bf16.vlgmr.msra.gmra.mrb[12].mxu1 %vm665_vm0, %v2742_v9  ;;  %1015 = vmatprep.subr.bf16.mxu0 %v2616_v37 }
  0x37   : > { %1057 = vmatpush1.bf16.msra.mxu1 %v2611_v38  ;;  %1088 = vmatprep.mubr.bf16.mxu1 %v2680_v0 }
  0x38   : > { %1058 = vmatprep.subr.bf16.mxu1 %v2619_v39 }
  0x39   : > { %1016 = vmatpush1.bf16.msra.mxu0 %v2614_v40 }
  0x3a   : > { %1099 = vmatprep.subr.bf16.mxu0 %v2622_v41 }
  0x3b   : > { %1059 = vmatpush1.bf16.msra.mxu1 %v2617_v42 }
  0x3c   : > { %2534 = vmatmul.mubr.msk.bf16.vlgmr.msra.gmra.mrb[16].mxu0 %vm665_vm0, %v2742_v9  ;;  %1142 = vmatprep.subr.bf16.mxu1 %v2625_v43 }
  0x3d   : > { %1100 = vmatpush1.bf16.msra.mxu0 %v2620_v44  ;;  %1131 = vmatprep.mubr.bf16.mxu0 %v2680_v0 }
  0x3e   : > { %2535 = vmatmul.mubr.msk.bf16.vlgmr.msra.gmra.mrb[16].mxu1 %vm665_vm0, %v2742_v9  ;;  %1101 = vmatprep.subr.bf16.mxu0 %v2628_v45 }
  0x3f   : > { %1143 = vmatpush1.bf16.msra.mxu1 %v2623_v46  ;;  %1174 = vmatprep.mubr.bf16.mxu1 %v2680_v0 }
  0x40   : > { %1144 = vmatprep.subr.bf16.mxu1 %v2631_v47 }
  0x41   : > { %1102 = vmatpush1.bf16.msra.mxu0 %v2626_v48 }
  0x42   : > { %1185 = vmatprep.subr.bf16.mxu0 %v2634_v49 }
  0x43   : > { %1145 = vmatpush1.bf16.msra.mxu1 %v2629_v50 }
  0x44   : > { %2536 = vmatmul.mubr.msk.bf16.vlgmr.msra.gmra.mrb[20].mxu0 %vm665_vm0, %v2742_v9  ;;  %1228 = vmatprep.subr.bf16.mxu1 %v2637_v51 }
  0x45   : > { %1186 = vmatpush1.bf16.msra.mxu0 %v2632_v52  ;;  %1217 = vmatprep.mubr.bf16.mxu0 %v2680_v0 }
  0x46   : > { %2537 = vmatmul.mubr.msk.bf16.vlgmr.msra.gmra.mrb[20].mxu1 %vm665_vm0, %v2742_v9  ;;  %1187 = vmatprep.subr.bf16.mxu0 %v2640_v53 }
  0x47   : > { %1229 = vmatpush1.bf16.msra.mxu1 %v2635_v54  ;;  %1260 = vmatprep.mubr.bf16.mxu1 %v2680_v0 }
  0x48   : > { %1230 = vmatprep.subr.bf16.mxu1 %v2643_v55 }
  0x49   : > { %1188 = vmatpush1.bf16.msra.mxu0 %v2638_v56 }
  0x4a   : > { %1271 = vmatprep.subr.bf16.mxu0 %v2646_v57 }
  0x4b   : > { %1231 = vmatpush1.bf16.msra.mxu1 %v2641_v58 }
  0x4c   : > { %2538 = vmatmul.mubr.msk.bf16.vlgmr.msra.gmra.mrb[24].mxu0 %vm665_vm0, %v2742_v9  ;;  %1314 = vmatprep.subr.bf16.mxu1 %v2649_v59 }
  0x4d   : > { %1272 = vmatpush1.bf16.msra.mxu0 %v2644_v60  ;;  %1303 = vmatprep.mubr.bf16.mxu0 %v2680_v0 }
  0x4e   : > { %2539 = vmatmul.mubr.msk.bf16.vlgmr.msra.gmra.mrb[24].mxu1 %vm665_vm0, %v2742_v9  ;;  %1273 = vmatprep.subr.bf16.mxu0 %v2652_v61 }
  0x4f   : > { %1315 = vmatpush1.bf16.msra.mxu1 %v2647_v62  ;;  %1346 = vmatprep.mubr.bf16.mxu1 %v2680_v0 }
  0x50   : > { %1316 = vmatprep.subr.bf16.mxu1 %v2655_v63 }
  0x51   : > { %1274 = vmatpush1.bf16.msra.mxu0 %v2650_v1 }
  0x52   : > { %1357 = vmatprep.subr.bf16.mxu0 %v2658_v2 }
  0x53   : > { %1317 = vmatpush1.bf16.msra.mxu1 %v2653_v3 }
  0x54   : > { %2540 = vmatmul.mubr.msk.bf16.vlgmr.msra.gmra.mrb[28].mxu0 %vm665_vm0, %v2742_v9  ;;  %1400 = vmatprep.subr.bf16.mxu1 %v2661_v4 }
  0x55   : > { %1358 = vmatpush1.bf16.msra.mxu0 %v2656_v5  ;;  %1389 = vmatprep.mubr.bf16.mxu0 %v2680_v0 }
  0x56   : > { %2541 = vmatmul.mubr.msk.bf16.vlgmr.msra.gmra.mrb[28].mxu1 %vm665_vm0, %v2742_v9  ;;  %1359 = vmatprep.subr.bf16.mxu0 %v2664_v6 }
  0x57   : > { %1401 = vmatpush1.bf16.msra.mxu1 %v2659_v7  ;;  %1432 = vmatprep.mubr.bf16.mxu1 %v2680_v0 }
  0x58   : > { %1402 = vmatprep.subr.bf16.mxu1 %v2667_v8 }
  0x59   : > { %1360 = vmatpush1.bf16.msra.mxu0 %v2662_v10 }
  0x5b   : > { %1403 = vmatpush1.bf16.msra.mxu1 %v2665_v11 }
  0x5c   : > { %2542 = vmatmul.mubr.msk.bf16.vlgmr.msra.gmra.mrb[32].mxu0 %vm665_vm0, %v2742_v9 }
  0x5e   : > { %2543 = vmatmul.mubr.msk.bf16.vlgmr.msra.gmra.mrb[32].mxu1 %vm665_vm0, %v2742_v9 }
  0xef   : > { %v2860_v12 = vpop.f32.mrb[0].mxu0  ;;  %v2868_v16 = vpop.f32.mrb[0].mxu1 }
  0xf0   : > { %v2862_v13 = vpop.f32.mrb[1].mxu0  ;;  %v2872_v17 = vpop.f32.mrb[1].mxu1 }
  0xf1   : > { %v1448_v14 = vadd.f32 %v2862_v13, %v2860_v12  ;;  %v2866_v15 = vpop.f32.mrb[2].mxu0  ;;  %v2877_v19 = vpop.f32.mrb[2].mxu1 }
  0xf2   : > { %v2870_v0 = vpop.f32.mrb[3].mxu0  ;;  %v2879_v20 = vpop.f32.mrb[3].mxu1 }
  0xf3   : > { %v1449_v18 = vadd.f32 %v1448_v14, %v2868_v16  ;;  %v1485_v9 = vadd.f32 %v2870_v0, %v2866_v15 }
  0xf5   : > { %v1450_v21 = vadd.f32 %v1449_v18, %v2872_v17  ;;  %v1486_v22 = vadd.f32 %v1485_v9, %v2877_v19 }
  0xf7   : > { %v1487_v23 = vadd.f32 %v1486_v22, %v2879_v20  ;;  %v2884_v24 = vpop.f32.mrb[4].mxu0 }
  0xf8   : > { %v1451_v25 = vadd.f32 %v1450_v21, %v2884_v24  ;;  %v2887_v26 = vpop.f32.mrb[5].mxu0 }
  0xf9   : > { %v2889_v27 = vpop.f32.mrb[6].mxu0  ;;  %v2891_v28 = vpop.f32.mrb[4].mxu1 }
  0xfa   : > { %v1452_v29 = vadd.f32 %v1451_v25, %v2887_v26  ;;  %v1488_v30 = vadd.f32 %v1487_v23, %v2889_v27  ;;  %v2895_v31 = vpop.f32.mrb[7].mxu0  ;;  %v2897_v32 = vpop.f32.mrb[5].mxu1 }
  0xfb   : > { %v2899_v33 = vpop.f32.mrb[6].mxu1 }
  0xfc   : > { %v1453_v34 = vadd.f32 %v1452_v29, %v2891_v28  ;;  %v1489_v35 = vadd.f32 %v1488_v30, %v2895_v31  ;;  %v2903_v36 = vpop.f32.mrb[7].mxu1 }
  0xfe   : > { %v1454_v37 = vadd.f32 %v1453_v34, %v2897_v32  ;;  %v1490_v38 = vadd.f32 %v1489_v35, %v2899_v33 }
  0xff   : > { %v2907_v39 = vpop.f32.mrb[8].mxu0 }
 0x100   : > { %v1491_v40 = vadd.f32 %v1490_v38, %v2903_v36  ;;  %v1455_v41 = vadd.f32 %v1454_v37, %v2907_v39  ;;  %v2911_v42 = vpop.f32.mrb[9].mxu0 }
 0x101   : > { %v2913_v43 = vpop.f32.mrb[10].mxu0  ;;  %v2915_v44 = vpop.f32.mrb[8].mxu1 }
 0x102   : > { %v1456_v45 = vadd.f32 %v1455_v41, %v2911_v42  ;;  %v1492_v46 = vadd.f32 %v1491_v40, %v2913_v43  ;;  %v2919_v47 = vpop.f32.mrb[11].mxu0  ;;  %v2921_v48 = vpop.f32.mrb[9].mxu1 }
 0x103   : > { %v2923_v49 = vpop.f32.mrb[10].mxu1 }
 0x104   : > { %4303 = vst [vmem:[#allocation2_spill] sm:$0xff] %v2923_v49  ;;  %v1457_v50 = vadd.f32 %v1456_v45, %v2915_v44  ;;  %v1493_v51 = vadd.f32 %v1492_v46, %v2919_v47  ;;  %v2927_v52 = vpop.f32.mrb[11].mxu1 }
 0x105   : > { %4304 = vst [vmem:[#allocation3_spill] sm:$0xff] %v2927_v52 }
 0x106   : > { %v1458_v53 = vadd.f32 %v1457_v50, %v2921_v48  ;;  %v1494_v54 = vadd.f32 %v1493_v51, %v2923_v49 }
 0x107   : > { %v2931_v55 = vpop.f32.mrb[12].mxu0 }
 0x108   : > { %v1495_v56 = vadd.f32 %v1494_v54, %v2927_v52  ;;  %v1459_v57 = vadd.f32 %v1458_v53, %v2931_v55  ;;  %v2935_v58 = vpop.f32.mrb[13].mxu0 }
 0x109   : > { %v2937_v59 = vpop.f32.mrb[14].mxu0  ;;  %v2939_v60 = vpop.f32.mrb[12].mxu1 }
 0x10a   : > { %4305 = vst [vmem:[#allocation4_spill] sm:$0xff] %v2937_v59  ;;  %v1460_v61 = vadd.f32 %v1459_v57, %v2935_v58  ;;  %v1496_v62 = vadd.f32 %v1495_v56, %v2937_v59  ;;  %v2943_v63 = vpop.f32.mrb[15].mxu0  ;;  %v2945_v1 = vpop.f32.mrb[13].mxu1 }
 0x10b   : > { %4306 = vst [vmem:[#allocation5_spill] sm:$0xff] %v2943_v63  ;;  %v2947_v2 = vpop.f32.mrb[14].mxu1 }
 0x10c   : > { %4307 = vst [vmem:[#allocation6_spill] sm:$0xff] %v2947_v2  ;;  %v1461_v3 = vadd.f32 %v1460_v61, %v2939_v60  ;;  %v1497_v4 = vadd.f32 %v1496_v62, %v2943_v63  ;;  %v2951_v5 = vpop.f32.mrb[15].mxu1 }
 0x10d   : > { %4308 = vst [vmem:[#allocation7_spill] sm:$0xff] %v2951_v5 }
 0x10e   : > { %v1462_v6 = vadd.f32 %v1461_v3, %v2945_v1  ;;  %v1498_v7 = vadd.f32 %v1497_v4, %v2947_v2 }
 0x10f   : > { %v2955_v8 = vpop.f32.mrb[16].mxu0 }
 0x110   : > { %v1499_v10 = vadd.f32 %v1498_v7, %v2951_v5  ;;  %v1463_v11 = vadd.f32 %v1462_v6, %v2955_v8  ;;  %v2959_v14 = vpop.f32.mrb[17].mxu0  ;;  %v1444_v5 = vld [vmem:[%s4150_s4 + $0x8] sm:$0xff] }
 0x111   : > { %v2961_v18 = vpop.f32.mrb[18].mxu0  ;;  %v2963_v9 = vpop.f32.mrb[16].mxu1 }
 0x112   : > { %4309 = vst [vmem:[#allocation8_spill] sm:$0xff] %v2961_v18  ;;  %v1464_v21 = vadd.f32 %v1463_v11, %v2959_v14  ;;  %v1500_v22 = vadd.f32 %v1499_v10, %v2961_v18  ;;  %v2967_v23 = vpop.f32.mrb[19].mxu0  ;;  %v2969_v25 = vpop.f32.mrb[17].mxu1 }
 0x113   : > { %4310 = vst [vmem:[#allocation9_spill] sm:$0xff] %v2967_v23  ;;  %v2971_v29 = vpop.f32.mrb[18].mxu1 }
 0x114   : > { %4311 = vst [vmem:[#allocation10_spill] sm:$0xff] %v2971_v29  ;;  %v1465_v30 = vadd.f32 %v1464_v21, %v2963_v9  ;;  %v1501_v34 = vadd.f32 %v1500_v22, %v2967_v23  ;;  %v2975_v35 = vpop.f32.mrb[19].mxu1 }
 0x115   : > { %4312 = vst [vmem:[#allocation11_spill] sm:$0xff] %v2975_v35 }
 0x116   : > { %v1466_v37 = vadd.f32 %v1465_v30, %v2969_v25  ;;  %v1502_v38 = vadd.f32 %v1501_v34, %v2971_v29 }
 0x117   : > { %v2979_v40 = vpop.f32.mrb[20].mxu0 }
 0x118   : > { %4313 = vst [vmem:[#allocation12_spill] sm:$0xff] %v2979_v40  ;;  %v1503_v41 = vadd.f32 %v1502_v38, %v2975_v35  ;;  %v1467_v45 = vadd.f32 %v1466_v37, %v2979_v40  ;;  %v2983_v46 = vpop.f32.mrb[21].mxu0 }
 0x119   : > { %4314 = vst [vmem:[#allocation13_spill] sm:$0xff] %v2983_v46  ;;  %v2985_v50 = vpop.f32.mrb[22].mxu0  ;;  %v2987_v51 = vpop.f32.mrb[20].mxu1 }
 0x11a   : > { %4315 = vst [vmem:[#allocation14_spill] sm:$0xff] %v2985_v50  ;;  %4316 = vst [vmem:[#allocation15_spill] sm:$0xff] %v2987_v51  ;;  %v1468_v53 = vadd.f32 %v1467_v45, %v2983_v46  ;;  %v1504_v54 = vadd.f32 %v1503_v41, %v2985_v50  ;;  %v2991_v56 = vpop.f32.mrb[23].mxu0  ;;  %v2993_v57 = vpop.f32.mrb[21].mxu1 }
 0x11b   : > { %4317 = vst [vmem:[#allocation16_spill] sm:$0xff] %v2991_v56  ;;  %4318 = vst [vmem:[#allocation17_spill] sm:$0xff] %v2993_v57  ;;  %v2995_v61 = vpop.f32.mrb[22].mxu1 }
 0x11c   : > { %4319 = vst [vmem:[#allocation18_spill] sm:$0xff] %v2995_v61  ;;  %v1469_v62 = vadd.f32 %v1468_v53, %v2987_v51  ;;  %v1505_v3 = vadd.f32 %v1504_v54, %v2991_v56  ;;  %v2999_v4 = vpop.f32.mrb[23].mxu1 }
 0x11d   : > { %4320 = vst [vmem:[#allocation19_spill] sm:$0xff] %v2999_v4 }
 0x11e   : > { %v1470_v6 = vadd.f32 %v1469_v62, %v2993_v57  ;;  %v1506_v7 = vadd.f32 %v1505_v3, %v2995_v61 }
 0x11f   : > { %v3003_v10 = vpop.f32.mrb[24].mxu0 }
 0x120   : > { %4321 = vst [vmem:[#allocation20_spill] sm:$0xff] %v3003_v10  ;;  %v1507_v11 = vadd.f32 %v1506_v7, %v2999_v4  ;;  %v1471_v21 = vadd.f32 %v1470_v6, %v3003_v10  ;;  %v3007_v22 = vpop.f32.mrb[25].mxu0 }
 0x121   : > { %4322 = vst [vmem:[#allocation21_spill] sm:$0xff] %v3007_v22  ;;  %v3009_v30 = vpop.f32.mrb[26].mxu0  ;;  %v3011_v34 = vpop.f32.mrb[24].mxu1 }
 0x122   : > { %4323 = vst [vmem:[#allocation22_spill] sm:$0xff] %v3009_v30  ;;  %4324 = vst [vmem:[#allocation23_spill] sm:$0xff] %v3011_v34  ;;  %v1472_v37 = vadd.f32 %v1471_v21, %v3007_v22  ;;  %v1508_v38 = vadd.f32 %v1507_v11, %v3009_v30  ;;  %v3015_v41 = vpop.f32.mrb[27].mxu0  ;;  %v3017_v45 = vpop.f32.mrb[25].mxu1 }
 0x123   : > { %4325 = vst [vmem:[#allocation24_spill] sm:$0xff] %v3015_v41  ;;  %4326 = vst [vmem:[#allocation25_spill] sm:$0xff] %v3017_v45  ;;  %v3019_v53 = vpop.f32.mrb[26].mxu1 }
 0x124   : > { %4327 = vst [vmem:[#allocation26_spill] sm:$0xff] %v3019_v53  ;;  %v1473_v54 = vadd.f32 %v1472_v37, %v3011_v34  ;;  %v1509_v62 = vadd.f32 %v1508_v38, %v3015_v41  ;;  %v3023_v3 = vpop.f32.mrb[27].mxu1 }
 0x125   : > { %4328 = vst [vmem:[#allocation27_spill] sm:$0xff] %v3023_v3 }
 0x126   : > { %v1474_v6 = vadd.f32 %v1473_v54, %v3017_v45  ;;  %v1510_v7 = vadd.f32 %v1509_v62, %v3019_v53 }
 0x127   : > { %v3027_v4 = vpop.f32.mrb[28].mxu0 }
 0x128   : > { %4329 = vst [vmem:[#allocation28_spill] sm:$0xff] %v3027_v4  ;;  %v1511_v11 = vadd.f32 %v1510_v7, %v3023_v3  ;;  %v1475_v21 = vadd.f32 %v1474_v6, %v3027_v4  ;;  %v3031_v30 = vpop.f32.mrb[29].mxu0 }
 0x129   : > { %4330 = vst [vmem:[#allocation29_spill] sm:$0xff] %v3031_v30  ;;  %v3033_v61 = vpop.f32.mrb[30].mxu0  ;;  %v3035_v56 = vpop.f32.mrb[28].mxu1 }
 0x12a   : > { %4331 = vst [vmem:[#allocation30_spill] sm:$0xff] %v3033_v61  ;;  %4332 = vst [vmem:[#allocation31_spill] sm:$0xff] %v3035_v56  ;;  %v1476_v37 = vadd.f32 %v1475_v21, %v3031_v30  ;;  %v1512_v38 = vadd.f32 %v1511_v11, %v3033_v61  ;;  %v3039_v41 = vpop.f32.mrb[31].mxu0  ;;  %v3041_v54 = vpop.f32.mrb[29].mxu1 }
 0x12b   : > { %4333 = vst [vmem:[#allocation32_spill] sm:$0xff] %v3039_v41  ;;  %4334 = vst [vmem:[#allocation33_spill] sm:$0xff] %v3041_v54  ;;  %v3043_v62 = vpop.f32.mrb[30].mxu1 }
 0x12c   : > { %4335 = vst [vmem:[#allocation34_spill] sm:$0xff] %v3043_v62  ;;  %v1477_v7 = vadd.f32 %v1476_v37, %v3035_v56  ;;  %v1513_v6 = vadd.f32 %v1512_v38, %v3039_v41  ;;  %v3047_v3 = vpop.f32.mrb[31].mxu1  ;;  %v1601_v56 = vlaneseq }
 0x12d   : > { %4336 = vst [vmem:[#allocation35_spill] sm:$0xff] %v3047_v3 }
 0x12e   : > { %v1478_v53 = vadd.f32 %v1477_v7, %v3041_v54  ;;  %v1514_v50 = vadd.f32 %v1513_v6, %v3043_v62 }
 0x12f   : > { %v3051_v35 = vpop.f32.mrb[32].mxu0 }
 0x130   : > { %4337 = vst [vmem:[#allocation36_spill] sm:$0xff] %v3051_v35  ;;  %v1515_v11 = vadd.f32 %v1514_v50, %v3047_v3  ;;  %v1479_v21 = vadd.f32 %v1478_v53, %v3051_v35  ;;  %v3055_v61 = vpop.f32.mrb[33].mxu0 }
 0x131   : > { %4338 = vst [vmem:[#allocation37_spill] sm:$0xff] %v3055_v61  ;;  %v3057_v30 = vpop.f32.mrb[34].mxu0  ;;  %v3059_v29 = vpop.f32.mrb[32].mxu1 }
 0x132   : > { %4339 = vst [vmem:[#allocation38_spill] sm:$0xff] %v3057_v30  ;;  %4340 = vst [vmem:[#allocation39_spill] sm:$0xff] %v3059_v29  ;;  %v1480_v37 = vadd.f32 %v1479_v21, %v3055_v61  ;;  %v1516_v38 = vadd.f32 %v1515_v11, %v3057_v30  ;;  %v3063_v41 = vpop.f32.mrb[35].mxu0  ;;  %v3065_v7 = vpop.f32.mrb[33].mxu1 }
 0x133   : > { %4341 = vst [vmem:[#allocation40_spill] sm:$0xff] %v3063_v41  ;;  %4342 = vst [vmem:[#allocation41_spill] sm:$0xff] %v3065_v7  ;;  %v3067_v6 = vpop.f32.mrb[34].mxu1 }
 0x134   : > { %4343 = vst [vmem:[#allocation42_spill] sm:$0xff] %v3067_v6  ;;  %v1481_v50 = vadd.f32 %v1480_v37, %v3059_v29  ;;  %v1517_v53 = vadd.f32 %v1516_v38, %v3063_v41  ;;  %v3071_v3 = vpop.f32.mrb[35].mxu1  ;;  %v1443_v38 = vld [vmem:[%s4150_s4] sm:$0xff] }
 0x135   : > { %4344 = vst [vmem:[#allocation43_spill] sm:$0xff] %v3071_v3 }
 0x136   : > { %v1518_v62 = vadd.f32 %v1517_v53, %v3067_v6  ;;  %v1482_v35 = vadd.f32 %v1481_v50, %v3065_v7  ;;  %v1602_v50 = vshrl.u32 %v1601_v56, 7 }
 0x138   : > { %v1519_v21 = vadd.f32 %v1518_v62, %v3071_v3  ;;  %1483 = vadd.xlane.f32.xlu0 %v1482_v35  ;;  %v3094_v37 = vsub.s32 1, %v1602_v50  ;;  %v3111_v54 = vsub.s32 3, %v1602_v50  ;;  %v3113_v3 = vsub.s32 4, %v1602_v50 }
 0x139   : > { %v3136_v45 = vsub.s32 6, %v1602_v50  ;;  %v3147_v34 = vsub.s32 7, %v1602_v50 }
 0x13a   : > { %4345 = vst [vmem:[#allocation44_spill] sm:$0xff] %v3094_v37  ;;  %v3105_v35 = vrot.slane %v1443_v38, %v3094_v37  ;;  %v3134_v23 = vrot.slane %v1443_v38, %v3113_v3  ;;  %v3193_v63 = vrot.slane %v1444_v5, %v3111_v54  ;;  %v3196_v57 = vrot.slane %v1444_v5, %v3113_v3 }
 0x13b   : > { %v3171_v10 = vrot.slane %v1443_v38, %v3147_v34  ;;  %v3209_v59 = vrot.slane %v1444_v5, %v3136_v45  ;;  %v3212_v51 = vrot.slane %v1444_v5, %v3147_v34 }
 0x13c   : > { %1520 = vadd.xlane.f32.xlu0 %v1519_v21  ;;  %4348 = vst [vmem:[#allocation47_spill] sm:$0xff] %v3105_v35  ;;  %4353 = vst [vmem:[#allocation52_spill] sm:$0xff] %v3134_v23 }
 0x13d   : > { %4359 = vst [vmem:[#allocation58_spill] sm:$0xff] %v3171_v10  ;;  %4364 = vst [vmem:[#allocation63_spill] sm:$0xff] %v3193_v63 }
 0x13e   : > { %4365 = vst [vmem:[#allocation64_spill] sm:$0xff] %v3196_v57  ;;  %4368 = vst [vmem:[#allocation67_spill] sm:$0xff] %v3209_v59 }
 0x13f   : > { %4369 = vst [vmem:[#allocation68_spill] sm:$0xff] %v3212_v51 }
 0x1c5   : > { %v1484_v11 = vpop.xlane.xlu0 %1483 }
 0x1c6   : > { %v3076_v30 = vmul.f32 0.00024414063, %v1484_v11  ;;  %v3092_v11 = vsub.s32 0, %v1602_v50 }
 0x1c8   : > { %v3102_v56 = vrot.slane %v1443_v38, %v3092_v11  ;;  %v1524_v62 = vsub.f32 %v2860_v12, %v3076_v30  ;;  %v1525_v21 = vsub.f32 %v2862_v13, %v3076_v30  ;;  %v1526_v41 = vsub.f32 %v2868_v16, %v3076_v30 }
 0x1c9   : > { %v1521_v53 = vpop.xlane.xlu0 %1520  ;;  %v3127_v12 = vrot.slane %v1443_v38, %v3111_v54  ;;  %v3129_v13 = vsub.s32 5, %v1602_v50  ;;  %v1527_v61 = vsub.f32 %v2872_v17, %v3076_v30  ;;  %v1528_v16 = vsub.f32 %v2884_v24, %v3076_v30 }
 0x1ca   : > { %v3084_v4 = vmul.f32 0.00024414063, %v1521_v53  ;;  %v3099_v53 = vsub.s32 2, %v1602_v50  ;;  %4347 = vst [vmem:[#allocation46_spill] sm:$0xff] %v3102_v56  ;;  %v3121_v7 = vmul.f32 %v3102_v56, %v1524_v62  ;;  %v3124_v29 = vmul.f32 %v3105_v35, %v1525_v21 }
 0x1cb   : > { %4352 = vst [vmem:[#allocation51_spill] sm:$0xff] %v3127_v12  ;;  %v3150_v17 = vrot.slane %v1443_v38, %v3129_v13  ;;  %v1529_v24 = vsub.f32 %v2887_v26, %v3076_v30  ;;  %v1530_v50 = vsub.f32 %v2891_v28, %v3076_v30  ;;  %v3174_v26 = vrot.slane %v1444_v5, %v3092_v11 }
 0x1cc   : > { %4346 = vst [vmem:[#allocation45_spill] sm:$0xff] %v3099_v53  ;;  %v3116_v6 = vrot.slane %v1443_v38, %v3099_v53  ;;  %4350 = vst [vmem:[#allocation49_spill] sm:$0xff] %v3121_v7  ;;  %v1853_v21 = vmul.f32 %v3121_v7, %v3121_v7  ;;  %v1854_v18 = vmul.f32 %v3124_v29, %v3124_v29 }
 0x1cd   : > { %4351 = vst [vmem:[#allocation50_spill] sm:$0xff] %v3124_v29  ;;  %4355 = vst [vmem:[#allocation54_spill] sm:$0xff] %v3150_v17  ;;  %v3161_v7 = vrot.slane %v1443_v38, %v3136_v45  ;;  %v3166_v29 = vmul.f32 %v3134_v23, %v1528_v16  ;;  %v1531_v28 = vsub.f32 %v2897_v32, %v3076_v30 }
 0x1ce   : > { %4349 = vst [vmem:[#allocation48_spill] sm:$0xff] %v3116_v6  ;;  %v3141_v62 = vmul.f32 %v3116_v6, %v1526_v41  ;;  %v3158_v41 = vmul.f32 %v3127_v12, %v1527_v61  ;;  %v1925_v2 = vadd.f32 %v1854_v18, %v1853_v21  ;;  %4360 = vst [vmem:[#allocation59_spill] sm:$0xff] %v3174_v26  ;;  %v1445_v61 = vld [vmem:[%s4150_s4 + $0x10] sm:$0xff] }
 0x1cf   : > { %4357 = vst [vmem:[#allocation56_spill] sm:$0xff] %v3161_v7  ;;  %4358 = vst [vmem:[#allocation57_spill] sm:$0xff] %v3166_v29  ;;  %v3182_v16 = vmul.f32 %v3150_v17, %v1529_v24  ;;  %v3187_v38 = vrot.slane %v1444_v5, %v3094_v37  ;;  %v3190_v21 = vrot.slane %v1444_v5, %v3099_v53 }
 0x1d0   : > { %4354 = vst [vmem:[#allocation53_spill] sm:$0xff] %v3141_v62  ;;  %4356 = vst [vmem:[#allocation55_spill] sm:$0xff] %v3158_v41  ;;  %v1855_v22 = vmul.f32 %v3141_v62, %v3141_v62  ;;  %v1856_v62 = vmul.f32 %v3158_v41, %v3158_v41  ;;  %v1532_v32 = vsub.f32 %v2907_v39, %v3076_v30 }
 0x1d1   : > { %4361 = vst [vmem:[#allocation60_spill] sm:$0xff] %v3182_v16  ;;  %4362 = vst [vmem:[#allocation61_spill] sm:$0xff] %v3187_v38  ;;  %v3201_v24 = vmul.f32 %v3161_v7, %v1530_v50  ;;  %v3206_v41 = vrot.slane %v1444_v5, %v3129_v13  ;;  %v3215_v52 = vrot.slane %v1445_v61, %v3092_v11 }
 0x1d2   : > { %v1926_v18 = vadd.f32 %v1925_v2, %v1855_v22  ;;  %4363 = vst [vmem:[#allocation62_spill] sm:$0xff] %v3190_v21  ;;  %v1857_v2 = vmul.f32 %v3166_v29, %v3166_v29  ;;  %v1533_v39 = vsub.f32 %v2911_v42, %v3076_v30  ;;  %v3220_v50 = vmul.f32 %v3171_v10, %v1531_v28  ;;  %v1446_v42 = vld [vmem:[%s4150_s4 + $0x18] sm:$0xff] }
 0x1d3   : > { %4366 = vst [vmem:[#allocation65_spill] sm:$0xff] %v3201_v24  ;;  %4367 = vst [vmem:[#allocation66_spill] sm:$0xff] %v3206_v41  ;;  %v3225_v29 = vrot.slane %v1445_v61, %v3094_v37  ;;  %v3228_v46 = vrot.slane %v1445_v61, %v3099_v53  ;;  %v3231_v5 = vrot.slane %v1445_v61, %v3111_v54 }
 0x1d4   : > { %v1927_v22 = vadd.f32 %v1926_v18, %v1856_v62  ;;  %4370 = vst [vmem:[#allocation69_spill] sm:$0xff] %v3215_v52  ;;  %4371 = vst [vmem:[#allocation70_spill] sm:$0xff] %v3220_v50  ;;  %v1858_v62 = vmul.f32 %v3182_v16, %v3182_v16  ;;  %v3234_v49 = vrot.slane %v1445_v61, %v3113_v3 }
 0x1d5   : > { %4372 = vst [vmem:[#allocation71_spill] sm:$0xff] %v3225_v29  ;;  %4373 = vst [vmem:[#allocation72_spill] sm:$0xff] %v3228_v46  ;;  %v1534_v28 = vsub.f32 %v2915_v44, %v3076_v30  ;;  %v3247_v46 = vrot.slane %v1445_v61, %v3129_v13  ;;  %v1561_v40 = vsub.f32 %v2870_v0, %v3084_v4 }
 0x1d6   : > { %v1928_v18 = vadd.f32 %v1927_v22, %v1857_v2  ;;  %4374 = vst [vmem:[#allocation73_spill] sm:$0xff] %v3231_v5  ;;  %4375 = vst [vmem:[#allocation74_spill] sm:$0xff] %v3234_v49  ;;  %v3242_v2 = vmul.f32 %v3174_v26, %v1532_v32  ;;  %v1859_v22 = vmul.f32 %v3201_v24, %v3201_v24 }
 0x1d7   : > { %4377 = vst [vmem:[#allocation76_spill] sm:$0xff] %v3247_v46  ;;  %v3250_v5 = vrot.slane %v1445_v61, %v3136_v45  ;;  %v1560_v49 = vsub.f32 %v2866_v15, %v3084_v4  ;;  %v1535_v44 = vsub.f32 %v2921_v48, %v3076_v30  ;;  %v3259_v32 = vmul.f32 %v3187_v38, %v1533_v39 }
 0x1d8   : > { %4376 = vst [vmem:[#allocation75_spill] sm:$0xff] %v3242_v2  ;;  %v1929_v16 = vadd.f32 %v1928_v18, %v1858_v62  ;;  %v1860_v62 = vmul.f32 %v3220_v50, %v3220_v50  ;;  %v3264_v24 = vrot.slane %v1445_v61, %v3147_v34  ;;  %v3270_v15 = vrot.slane %v1446_v42, %v3094_v37 }
 0x1d9   : > { %4378 = vst [vmem:[#allocation77_spill] sm:$0xff] %v3250_v5  ;;  %v3267_v5 = vrot.slane %v1446_v42, %v3092_v11  ;;  %v3273_v0 = vrot.slane %v1446_v42, %v3099_v53  ;;  %v1536_v48 = vsub.f32 %v2931_v55, %v3076_v30  ;;  %v3278_v39 = vmul.f32 %v3190_v21, %v1534_v28 }
 0x1da   : > { %v1930_v18 = vadd.f32 %v1929_v16, %v1859_v22  ;;  %4379 = vst [vmem:[#allocation78_spill] sm:$0xff] %v3264_v24  ;;  %4381 = vst [vmem:[#allocation80_spill] sm:$0xff] %v3270_v15  ;;  %v1861_v16 = vmul.f32 %v3242_v2, %v3242_v2  ;;  %v3283_v22 = vrot.slane %v1446_v42, %v3111_v54 }
 0x1db   : > { %4380 = vst [vmem:[#allocation79_spill] sm:$0xff] %v3267_v5  ;;  %4382 = vst [vmem:[#allocation81_spill] sm:$0xff] %v3273_v0  ;;  %v1562_v50 = vsub.f32 %v2877_v19, %v3084_v4  ;;  %v3288_v37 = vmul.f32 %v3102_v56, %v1560_v49  ;;  %v3291_v53 = vmul.f32 %v3105_v35, %v1561_v40 }
 0x1dc   : > { %v1931_v61 = vadd.f32 %v1930_v18, %v1860_v62  ;;  %4383 = vst [vmem:[#allocation82_spill] sm:$0xff] %v3283_v22  ;;  %v1537_v55 = vsub.f32 %v2935_v58, %v3076_v30  ;;  %v3296_v28 = vmul.f32 %v3193_v63, %v1535_v44  ;;  %v1862_v62 = vmul.f32 %v3259_v32, %v3259_v32  ;;  %v3314_v58 = vld [vmem:[%s4150_s4 + $0x20] sm:$0xf] }
 0x1dd   : > { %4384 = vst [vmem:[#allocation83_spill] sm:$0xff] %v3288_v37  ;;  %4385 = vst [vmem:[#allocation84_spill] sm:$0xff] %v3291_v53  ;;  %v3301_v2 = vrot.slane %v1446_v42, %v3113_v3  ;;  %v3304_v19 = vrot.slane %v1446_v42, %v3129_v13  ;;  %v3307_v49 = vrot.slane %v1446_v42, %v3136_v45 }
 0x1de   : > { %v1932_v18 = vadd.f32 %v1931_v61, %v1861_v16  ;;  %v1563_v40 = vsub.f32 %v2879_v20, %v3084_v4  ;;  %v1538_v44 = vsub.f32 %v2939_v60, %v3076_v30  ;;  %v3319_v3 = vmul.f32 %v3196_v57, %v1536_v48 }
 0x1df   : > { %4386 = vst [vmem:[#allocation85_spill] sm:$0xff] %v3301_v2  ;;  %4387 = vst [vmem:[#allocation86_spill] sm:$0xff] %v3304_v19  ;;  %v1863_v13 = vmul.f32 %v3278_v39, %v3278_v39  ;;  %v1564_v45 = vsub.f32 %v2889_v27, %v3084_v4  ;;  %v3326_v20 = vmul.f32 %v3116_v6, %v1562_v50 }
 0x1e0   : > { %4388 = vst [vmem:[#allocation87_spill] sm:$0xff] %v3307_v49  ;;  %v1933_v16 = vadd.f32 %v1932_v18, %v1862_v62  ;;  %v1889_v61 = vmul.f32 %v3288_v37, %v3288_v37  ;;  %v1890_v35 = vmul.f32 %v3291_v53, %v3291_v53  ;;  %v1539_v60 = vsub.f32 %v2945_v1, %v3076_v30 }
 0x1e1   : > { %4389 = vst [vmem:[#allocation88_spill] sm:$0xff] %v3326_v20  ;;  %v3335_v48 = vmul.f32 %v3206_v41, %v1537_v55  ;;  %v1864_v62 = vmul.f32 %v3296_v28, %v3296_v28  ;;  %v3340_v27 = vrot.slane %v1446_v42, %v3147_v34  ;;  %v3344_v50 = vrot.slane %v3314_v58, %v3092_v11 }
 0x1e2   : > { %v1934_v18 = vadd.f32 %v1933_v16, %v1863_v13  ;;  %v1565_v53 = vsub.f32 %v2895_v31, %v3084_v4  ;;  %v3349_v37 = vmul.f32 %v3127_v12, %v1563_v40  ;;  %v1540_v1 = vsub.f32 %v2955_v8, %v3076_v30 }
 0x1e3   : > { %4390 = vst [vmem:[#allocation89_spill] sm:$0xff] %v3340_v27  ;;  %4391 = vst [vmem:[#allocation90_spill] sm:$0xff] %v3344_v50  ;;  %v3354_v55 = vmul.f32 %v3209_v59, %v1538_v44  ;;  %v1865_v34 = vmul.f32 %v3319_v3, %v3319_v3  ;;  %v1566_v11 = vsub.f32 %v2899_v33, %v3084_v4 }
 0x1e4   : > { %4392 = vst [vmem:[#allocation91_spill] sm:$0xff] %v3349_v37  ;;  %v1935_v42 = vadd.f32 %v1934_v18, %v1864_v62  ;;  %v3361_v13 = vmul.f32 %v3134_v23, %v1564_v45  ;;  %v1891_v31 = vmul.f32 %v3326_v20, %v3326_v20  ;;  %v1962_v40 = vadd.f32 %v1890_v35, %v1889_v61  ;;  %v4402_v20 = vld [vmem:[#allocation73_spill] sm:$0xff] }
 0x1e5   : > { %v1541_v8 = vsub.f32 %v2959_v14, %v3076_v30  ;;  %v3368_v44 = vmul.f32 %v3212_v51, %v1539_v60  ;;  %v1866_v16 = vmul.f32 %v3335_v48, %v3335_v48  ;;  %v1567_v33 = vsub.f32 %v2903_v36, %v3084_v4 }
 0x1e6   : > { %4393 = vst [vmem:[#allocation92_spill] sm:$0xff] %v3361_v13  ;;  %v1936_v62 = vadd.f32 %v1935_v42, %v1865_v34  ;;  %v3375_v45 = vmul.f32 %v3150_v17, %v1565_v53  ;;  %v1892_v18 = vmul.f32 %v3349_v37, %v3349_v37  ;;  %v1963_v35 = vadd.f32 %v1962_v40, %v1891_v31 }
 0x1e7   : > { %v1542_v14 = vsub.f32 %v2963_v9, %v3076_v30  ;;  %v3382_v61 = vmul.f32 %v3215_v52, %v1540_v1  ;;  %v1867_v60 = vmul.f32 %v3354_v55, %v3354_v55  ;;  %v1568_v36 = vsub.f32 %v2913_v43, %v3084_v4 }
 0x1e8   : > { %4394 = vst [vmem:[#allocation93_spill] sm:$0xff] %v3375_v45  ;;  %v1937_v34 = vadd.f32 %v1936_v62, %v1866_v16  ;;  %v3389_v53 = vmul.f32 %v3161_v7, %v1566_v11  ;;  %v1893_v42 = vmul.f32 %v3361_v13, %v3361_v13  ;;  %v1964_v31 = vadd.f32 %v1963_v35, %v1892_v18  ;;  %v4397_v35 = vld [vmem:[#allocation12_spill] sm:$0xff] }
 0x1e9   : > { %v1543_v9 = vsub.f32 %v2969_v25, %v3076_v30  ;;  %v3396_v1 = vmul.f32 %v3225_v29, %v1541_v8  ;;  %v1868_v40 = vmul.f32 %v3368_v44, %v3368_v44  ;;  %v1569_v43 = vsub.f32 %v2919_v47, %v3084_v4  ;;  %v4398_v13 = vld [vmem:[#allocation72_spill] sm:$0xff] }
 0x1ea   : > { %4395 = vst [vmem:[#allocation94_spill] sm:$0xff] %v3389_v53  ;;  %v1938_v16 = vadd.f32 %v1937_v34, %v1867_v60  ;;  %v3403_v11 = vmul.f32 %v3171_v10, %v1567_v33  ;;  %v1894_v62 = vmul.f32 %v3375_v45, %v3375_v45  ;;  %v1965_v18 = vadd.f32 %v1964_v31, %v1893_v42  ;;  %v4399_v34 = vld [vmem:[#allocation2_spill] sm:$0xff]  ;;  %v4401_v31 = vld [vmem:[#allocation13_spill] sm:$0xff] }
 0x1eb   : > { %v1544_v25 = vsub.f32 %v4397_v35, %v3076_v30  ;;  %v3410_v8 = vmul.f32 %v4398_v13, %v1542_v14  ;;  %v1869_v37 = vmul.f32 %v3382_v61, %v3382_v61  ;;  %v1570_v47 = vsub.f32 %v4399_v34, %v3084_v4 }
 0x1ec   : > { %4396 = vst [vmem:[#allocation95_spill] sm:$0xff] %v3403_v11  ;;  %v1939_v60 = vadd.f32 %v1938_v16, %v1868_v40  ;;  %v3417_v33 = vmul.f32 %v3174_v26, %v1568_v36  ;;  %v1895_v45 = vmul.f32 %v3389_v53, %v3389_v53  ;;  %v1966_v42 = vadd.f32 %v1965_v18, %v1894_v62  ;;  %v4403_v16 = vld [vmem:[#allocation3_spill] sm:$0xff]  ;;  %v4406_v26 = vld [vmem:[#allocation74_spill] sm:$0xff] }
 0x1ed   : > { %v1545_v35 = vsub.f32 %v4401_v31, %v3076_v30  ;;  %v3424_v14 = vmul.f32 %v4402_v20, %v1543_v9  ;;  %v1870_v10 = vmul.f32 %v3396_v1, %v3396_v1  ;;  %v1571_v34 = vsub.f32 %v4403_v16, %v3084_v4  ;;  %v4405_v18 = vld [vmem:[#allocation15_spill] sm:$0xff] }
 0x1ee   : > { %4400 = vst [vmem:[#allocation12_spill] sm:$0xff] %v3417_v33  ;;  %v1940_v40 = vadd.f32 %v1939_v60, %v1869_v37  ;;  %v3431_v36 = vmul.f32 %v3187_v38, %v1569_v43  ;;  %v1896_v53 = vmul.f32 %v3403_v11, %v3403_v11  ;;  %v1967_v62 = vadd.f32 %v1966_v42, %v1895_v45  ;;  %v4407_v60 = vld [vmem:[#allocation4_spill] sm:$0xff]  ;;  %v4409_v42 = vld [vmem:[#allocation17_spill] sm:$0xff] }
 0x1ef   : > { %v1546_v31 = vsub.f32 %v4405_v18, %v3076_v30  ;;  %v3438_v9 = vmul.f32 %v4406_v26, %v1544_v25  ;;  %v1871_v7 = vmul.f32 %v3410_v8, %v3410_v8  ;;  %v1572_v16 = vsub.f32 %v4407_v60, %v3084_v4 }
 0x1f0   : > { %4404 = vst [vmem:[#allocation2_spill] sm:$0xff] %v3431_v36  ;;  %v1941_v37 = vadd.f32 %v1940_v40, %v1870_v10  ;;  %v3445_v43 = vmul.f32 %v3190_v21, %v1570_v47  ;;  %v1897_v11 = vmul.f32 %v3417_v33, %v3417_v33  ;;  %v1968_v45 = vadd.f32 %v1967_v62, %v1896_v53  ;;  %v4410_v40 = vld [vmem:[#allocation5_spill] sm:$0xff]  ;;  %v4412_v62 = vld [vmem:[#allocation20_spill] sm:$0xff] }
 0x1f1   : > { %v1547_v18 = vsub.f32 %v4409_v42, %v3076_v30  ;;  %v3452_v25 = vmul.f32 %v3247_v46, %v1545_v35  ;;  %v1872_v38 = vmul.f32 %v3424_v14, %v3424_v14  ;;  %v1573_v60 = vsub.f32 %v4410_v40, %v3084_v4  ;;  %v4413_v21 = vld [vmem:[#allocation77_spill] sm:$0xff] }
 0x1f2   : > { %4408 = vst [vmem:[#allocation13_spill] sm:$0xff] %v3445_v43  ;;  %v1942_v10 = vadd.f32 %v1941_v37, %v1871_v7  ;;  %v3459_v47 = vmul.f32 %v3193_v63, %v1571_v34  ;;  %v1898_v33 = vmul.f32 %v3431_v36, %v3431_v36  ;;  %v1969_v53 = vadd.f32 %v1968_v45, %v1897_v11  ;;  %v4414_v37 = vld [vmem:[#allocation6_spill] sm:$0xff]  ;;  %v4416_v45 = vld [vmem:[#allocation21_spill] sm:$0xff] }
 0x1f3   : > { %v1548_v42 = vsub.f32 %v4412_v62, %v3076_v30  ;;  %v3466_v35 = vmul.f32 %v4413_v21, %v1546_v31  ;;  %v1873_v17 = vmul.f32 %v3438_v9, %v3438_v9  ;;  %v1574_v40 = vsub.f32 %v4414_v37, %v3084_v4 }
 0x1f4   : > { %4411 = vst [vmem:[#allocation3_spill] sm:$0xff] %v3459_v47  ;;  %v1943_v7 = vadd.f32 %v1942_v10, %v1872_v38  ;;  %v3473_v34 = vmul.f32 %v3196_v57, %v1572_v16  ;;  %v1899_v36 = vmul.f32 %v3445_v43, %v3445_v43  ;;  %v1970_v11 = vadd.f32 %v1969_v53, %v1898_v33  ;;  %v4417_v10 = vld [vmem:[#allocation7_spill] sm:$0xff] }
 0x1f5   : > { %v1549_v62 = vsub.f32 %v4416_v45, %v3076_v30  ;;  %v3480_v31 = vmul.f32 %v3264_v24, %v1547_v18  ;;  %v1874_v63 = vmul.f32 %v3452_v25, %v3452_v25  ;;  %v1575_v37 = vsub.f32 %v4417_v10, %v3084_v4  ;;  %v4419_v53 = vld [vmem:[#allocation23_spill] sm:$0xff] }
 0x1f6   : > { %4415 = vst [vmem:[#allocation15_spill] sm:$0xff] %v3473_v34  ;;  %v1944_v38 = vadd.f32 %v1943_v7, %v1873_v17  ;;  %v3487_v16 = vmul.f32 %v3206_v41, %v1573_v60  ;;  %v1900_v43 = vmul.f32 %v3459_v47, %v3459_v47  ;;  %v1971_v33 = vadd.f32 %v1970_v11, %v1899_v36  ;;  %v4420_v7 = vld [vmem:[#allocation8_spill] sm:$0xff]  ;;  %v4422_v11 = vld [vmem:[#allocation25_spill] sm:$0xff] }
 0x1f7   : > { %v1550_v45 = vsub.f32 %v4419_v53, %v3076_v30  ;;  %v3494_v18 = vmul.f32 %v3267_v5, %v1548_v42  ;;  %v1875_v57 = vmul.f32 %v3466_v35, %v3466_v35  ;;  %v1576_v10 = vsub.f32 %v4420_v7, %v3084_v4 }
 0x1f8   : > { %4418 = vst [vmem:[#allocation4_spill] sm:$0xff] %v3487_v16  ;;  %v1945_v17 = vadd.f32 %v1944_v38, %v1874_v63  ;;  %v3501_v60 = vmul.f32 %v3209_v59, %v1574_v40  ;;  %v1901_v47 = vmul.f32 %v3473_v34, %v3473_v34  ;;  %v1972_v36 = vadd.f32 %v1971_v33, %v1900_v43  ;;  %v4423_v38 = vld [vmem:[#allocation9_spill] sm:$0xff]  ;;  %v4425_v33 = vld [vmem:[#allocation28_spill] sm:$0xff] }
 0x1f9   : > { %v1551_v53 = vsub.f32 %v4422_v11, %v3076_v30  ;;  %v3508_v42 = vmul.f32 %v3270_v15, %v1549_v62  ;;  %v1876_v41 = vmul.f32 %v3480_v31, %v3480_v31  ;;  %v1577_v7 = vsub.f32 %v4423_v38, %v3084_v4 }
 0x1fa   : > { %4421 = vst [vmem:[#allocation17_spill] sm:$0xff] %v3501_v60  ;;  %v1946_v63 = vadd.f32 %v1945_v17, %v1875_v57  ;;  %v3515_v40 = vmul.f32 %v3212_v51, %v1575_v37  ;;  %v1902_v34 = vmul.f32 %v3487_v16, %v3487_v16  ;;  %v1973_v43 = vadd.f32 %v1972_v36, %v1901_v47  ;;  %v4426_v17 = vld [vmem:[#allocation10_spill] sm:$0xff]  ;;  %v4428_v36 = vld [vmem:[#allocation29_spill] sm:$0xff] }
 0x1fb   : > { %v1552_v11 = vsub.f32 %v4425_v33, %v3076_v30  ;;  %v3522_v62 = vmul.f32 %v3273_v0, %v1550_v45  ;;  %v1877_v59 = vmul.f32 %v3494_v18, %v3494_v18  ;;  %v1578_v38 = vsub.f32 %v4426_v17, %v3084_v4 }
 0x1fc   : > { %4424 = vst [vmem:[#allocation5_spill] sm:$0xff] %v3515_v40  ;;  %v1947_v57 = vadd.f32 %v1946_v63, %v1876_v41  ;;  %v3529_v37 = vmul.f32 %v3215_v52, %v1576_v10  ;;  %v1903_v16 = vmul.f32 %v3501_v60, %v3501_v60  ;;  %v1974_v47 = vadd.f32 %v1973_v43, %v1902_v34  ;;  %v4429_v63 = vld [vmem:[#allocation11_spill] sm:$0xff] }
 0x1fd   : > { %v1553_v33 = vsub.f32 %v4428_v36, %v3076_v30  ;;  %v3536_v45 = vmul.f32 %v3283_v22, %v1551_v53  ;;  %v1878_v51 = vmul.f32 %v3508_v42, %v3508_v42  ;;  %v1579_v17 = vsub.f32 %v4429_v63, %v3084_v4  ;;  %v4431_v43 = vld [vmem:[#allocation31_spill] sm:$0xff] }
 0x1fe   : > { %4427 = vst [vmem:[#allocation20_spill] sm:$0xff] %v3529_v37  ;;  %v1948_v41 = vadd.f32 %v1947_v57, %v1877_v59  ;;  %v3543_v10 = vmul.f32 %v3225_v29, %v1577_v7  ;;  %v1904_v60 = vmul.f32 %v3515_v40, %v3515_v40  ;;  %v1975_v34 = vadd.f32 %v1974_v47, %v1903_v16  ;;  %v4432_v57 = vld [vmem:[#allocation14_spill] sm:$0xff]  ;;  %v4434_v47 = vld [vmem:[#allocation33_spill] sm:$0xff] }
 0x1ff   : > { %v1554_v36 = vsub.f32 %v4431_v43, %v3076_v30  ;;  %v3550_v53 = vmul.f32 %v3301_v2, %v1552_v11  ;;  %v1879_v52 = vmul.f32 %v3522_v62, %v3522_v62  ;;  %v1580_v63 = vsub.f32 %v4432_v57, %v3084_v4 }
 0x200   : > { %4430 = vst [vmem:[#allocation6_spill] sm:$0xff] %v3543_v10  ;;  %v1949_v59 = vadd.f32 %v1948_v41, %v1878_v51  ;;  %v3557_v7 = vmul.f32 %v4398_v13, %v1578_v38  ;;  %v1905_v40 = vmul.f32 %v3529_v37, %v3529_v37  ;;  %v1976_v16 = vadd.f32 %v1975_v34, %v1904_v60  ;;  %v4435_v41 = vld [vmem:[#allocation16_spill] sm:$0xff] }
 0x201   : > { %v1555_v43 = vsub.f32 %v4434_v47, %v3076_v30  ;;  %v3564_v11 = vmul.f32 %v3304_v19, %v1553_v33  ;;  %v1880_v29 = vmul.f32 %v3536_v45, %v3536_v45  ;;  %v1581_v57 = vsub.f32 %v4435_v41, %v3084_v4  ;;  %v4437_v34 = vld [vmem:[#allocation36_spill] sm:$0xff] }
 0x202   : > { %4433 = vst [vmem:[#allocation21_spill] sm:$0xff] %v3557_v7  ;;  %v1950_v51 = vadd.f32 %v1949_v59, %v1879_v52  ;;  %v3571_v38 = vmul.f32 %v4402_v20, %v1579_v17  ;;  %v1906_v37 = vmul.f32 %v3543_v10, %v3543_v10  ;;  %v1977_v60 = vadd.f32 %v1976_v16, %v1905_v40  ;;  %v4438_v59 = vld [vmem:[#allocation18_spill] sm:$0xff]  ;;  %v4440_v16 = vld [vmem:[#allocation44_spill] sm:$0xff] }
 0x203   : > { %v1556_v47 = vsub.f32 %v4437_v34, %v3076_v30  ;;  %v3578_v33 = vmul.f32 %v3307_v49, %v1554_v36  ;;  %v1881_v13 = vmul.f32 %v3550_v53, %v3550_v53  ;;  %v1582_v41 = vsub.f32 %v4438_v59, %v3084_v4  ;;  %v4442_v59 = vld [vmem:[#allocation19_spill] sm:$0xff] }
 0x204   : > { %4436 = vst [vmem:[#allocation7_spill] sm:$0xff] %v3571_v38  ;;  %v1951_v52 = vadd.f32 %v1950_v51, %v1880_v29  ;;  %v3585_v17 = vmul.f32 %v4406_v26, %v1580_v63  ;;  %v1907_v10 = vmul.f32 %v3557_v7, %v3557_v7  ;;  %v1978_v40 = vadd.f32 %v1977_v60, %v1906_v37  ;;  %v4444_v7 = vld [vmem:[#allocation45_spill] sm:$0xff] }
 0x205   : > { %v3591_v34 = vrot.slane %v3314_v58, %v4440_v16  ;;  %v3594_v36 = vmul.f32 %v3340_v27, %v1555_v43  ;;  %v1882_v29 = vmul.f32 %v3564_v11, %v3564_v11  ;;  %v1583_v20 = vsub.f32 %v4442_v59, %v3084_v4  ;;  %v4446_v59 = vld [vmem:[#allocation22_spill] sm:$0xff] }
 0x206   : > { %4439 = vst [vmem:[#allocation23_spill] sm:$0xff] %v3585_v17  ;;  %v1952_v51 = vadd.f32 %v1951_v52, %v1881_v13  ;;  %v3601_v63 = vmul.f32 %v3247_v46, %v1581_v57  ;;  %v1908_v37 = vmul.f32 %v3571_v38, %v3571_v38  ;;  %v1979_v60 = vadd.f32 %v1978_v40, %v1907_v10 }
 0x207   : > { %4441 = vst [vmem:[#allocation8_spill] sm:$0xff] %v3591_v34  ;;  %v3607_v16 = vrot.slane %v3314_v58, %v4444_v7  ;;  %v3610_v43 = vmul.f32 %v3344_v50, %v1556_v47  ;;  %v1883_v13 = vmul.f32 %v3578_v33, %v3578_v33  ;;  %v1584_v26 = vsub.f32 %v4446_v59, %v3084_v4  ;;  %v4449_v47 = vld [vmem:[#allocation37_spill] sm:$0xff] }
 0x208   : > { %4443 = vst [vmem:[#allocation25_spill] sm:$0xff] %v3601_v63  ;;  %v1953_v52 = vadd.f32 %v1952_v51, %v1882_v29  ;;  %v3617_v57 = vmul.f32 %v4413_v21, %v1582_v41  ;;  %v1909_v10 = vmul.f32 %v3585_v17, %v3585_v17  ;;  %v1980_v40 = vadd.f32 %v1979_v60, %v1908_v37  ;;  %v4451_v41 = vld [vmem:[#allocation24_spill] sm:$0xff]  ;;  %v4453_v37 = vld [vmem:[#allocation39_spill] sm:$0xff] }
 0x209   : > { %4445 = vst [vmem:[#allocation9_spill] sm:$0xff] %v3607_v16  ;;  %v3623_v7 = vrot.slane %v3314_v58, %v3111_v54  ;;  %v4450_v38 = vsub.f32 %v4449_v47, %v3076_v30  ;;  %v1884_v29 = vmul.f32 %v3594_v36, %v3594_v36  ;;  %v1585_v59 = vsub.f32 %v4451_v41, %v3084_v4 }
 0x20a   : > { %4447 = vst [vmem:[#allocation28_spill] sm:$0xff] %v3617_v57  ;;  %v1954_v51 = vadd.f32 %v1953_v52, %v1883_v13  ;;  %v3636_v17 = vmul.f32 %v3264_v24, %v1583_v20  ;;  %v1910_v54 = vmul.f32 %v3601_v63, %v3601_v63  ;;  %v1981_v58 = vadd.f32 %v1980_v40, %v1909_v10  ;;  %v4455_v52 = vld [vmem:[#allocation26_spill] sm:$0xff]  ;;  %v4457_v40 = vld [vmem:[#allocation41_spill] sm:$0xff] }
 0x20b   : > { %4448 = vst [vmem:[#allocation10_spill] sm:$0xff] %v3623_v7  ;;  %v3629_v46 = vmul.f32 %v3591_v34, %v4450_v38  ;;  %v4454_v60 = vsub.f32 %v4453_v37, %v3076_v30  ;;  %v1885_v47 = vmul.f32 %v3610_v43, %v3610_v43  ;;  %v1586_v41 = vsub.f32 %v4455_v52, %v3084_v4 }
 0x20c   : > { %4452 = vst [vmem:[#allocation29_spill] sm:$0xff] %v3636_v17  ;;  %v1955_v13 = vadd.f32 %v1954_v51, %v1884_v29  ;;  %v3651_v20 = vmul.f32 %v3267_v5, %v1584_v26  ;;  %v1911_v63 = vmul.f32 %v3617_v57, %v3617_v57  ;;  %v1982_v10 = vadd.f32 %v1981_v58, %v1910_v54  ;;  %v4459_v51 = vld [vmem:[#allocation27_spill] sm:$0xff] }
 0x20d   : > { %v3644_v38 = vmul.f32 %v3607_v16, %v4454_v60  ;;  %v4458_v37 = vsub.f32 %v4457_v40, %v3076_v30  ;;  %v1886_v24 = vmul.f32 %v3629_v46, %v3629_v46  ;;  %v1587_v52 = vsub.f32 %v4459_v51, %v3084_v4  ;;  %v4461_v40 = vld [vmem:[#allocation30_spill] sm:$0xff] }
 0x20e   : > { %4456 = vst [vmem:[#allocation11_spill] sm:$0xff] %v3651_v20  ;;  %v1956_v29 = vadd.f32 %v1955_v13, %v1885_v47  ;;  %v3666_v26 = vmul.f32 %v3270_v15, %v1585_v59  ;;  %v1912_v57 = vmul.f32 %v3636_v17, %v3636_v17  ;;  %v1983_v54 = vadd.f32 %v1982_v10, %v1911_v63  ;;  %v4463_v63 = vld [vmem:[#allocation32_spill] sm:$0xff] }
 0x20f   : > { %v3659_v60 = vmul.f32 %v3623_v7, %v4458_v37  ;;  %v1887_v30 = vmul.f32 %v3644_v38, %v3644_v38  ;;  %v1588_v37 = vsub.f32 %v4461_v40, %v3084_v4  ;;  %v3675_v5 = vmul.f32 %v3273_v0, %v1586_v41  ;;  %v4465_v40 = vld [vmem:[#allocation34_spill] sm:$0xff] }
 0x210   : > { %4460 = vst [vmem:[#allocation31_spill] sm:$0xff] %v3666_v26  ;;  %v1957_v58 = vadd.f32 %v1956_v29, %v1886_v24  ;;  %v1913_v47 = vmul.f32 %v3651_v20, %v3651_v20  ;;  %v1984_v13 = vadd.f32 %v1983_v54, %v1912_v57  ;;  %v1589_v10 = vsub.f32 %v4463_v63, %v3084_v4 }
 0x211   : > { %4462 = vst [vmem:[#allocation14_spill] sm:$0xff] %v3675_v5  ;;  %v1888_v59 = vmul.f32 %v3659_v60, %v3659_v60  ;;  %v3684_v17 = vmul.f32 %v3283_v22, %v1587_v52  ;;  %v1914_v24 = vmul.f32 %v3666_v26, %v3666_v26  ;;  %v1590_v0 = vsub.f32 %v4465_v40, %v3084_v4 }
 0x212   : > { %v1958_v51 = vadd.f32 %v1957_v58, %v1887_v30  ;;  %v1985_v29 = vadd.f32 %v1984_v13, %v1913_v47  ;;  %v3691_v57 = vmul.f32 %v3301_v2, %v1588_v37  ;;  %v1915_v54 = vmul.f32 %v3675_v5, %v3675_v5  ;;  %v4467_v58 = vld [vmem:[#allocation35_spill] sm:$0xff] }
 0x213   : > { %4464 = vst [vmem:[#allocation33_spill] sm:$0xff] %v3684_v17  ;;  %v1591_v52 = vsub.f32 %v4467_v58, %v3084_v4  ;;  %v3698_v63 = vmul.f32 %v3304_v19, %v1589_v10  ;;  %v1916_v47 = vmul.f32 %v3684_v17, %v3684_v17  ;;  %v3705_v37 = vmul.f32 %v3307_v49, %v1590_v0  ;;  %v4473_v0 = vld [vmem:[#allocation40_spill] sm:$0xff]  ;;  %v4490_v17 = vld [vmem:[#allocation75_spill] sm:$0xff] }
 0x214   : > { %v1959_v41 = vadd.f32 %v1958_v51, %v1888_v59  ;;  %4466 = vst [vmem:[#allocation16_spill] sm:$0xff] %v3691_v57  ;;  %v1986_v30 = vadd.f32 %v1985_v29, %v1914_v24  ;;  %v4469_v59 = vld [vmem:[#allocation38_spill] sm:$0xff]  ;;  %v1917_v24 = vmul.f32 %v3691_v57, %v3691_v57 }
 0x215   : > { %4468 = vst [vmem:[#allocation36_spill] sm:$0xff] %v3698_v63  ;;  %v1592_v51 = vsub.f32 %v4469_v59, %v3084_v4  ;;  %4470 = vst [vmem:[#allocation18_spill] sm:$0xff] %v3705_v37  ;;  %v1918_v10 = vmul.f32 %v3698_v63, %v3698_v63  ;;  %v4474_v59 = vsub.f32 %v4473_v0, %v3084_v4 }
 0x216   : > { %1960 = vadd.xlane.f32.xlu1 %v1959_v41  ;;  %v1987_v13 = vadd.f32 %v1986_v30, %v1915_v54  ;;  %v3710_v41 = vmul.f32 %v3340_v27, %v1591_v52  ;;  %v1919_v54 = vmul.f32 %v3705_v37, %v3705_v37 }
 0x217   : > { %v3715_v58 = vmul.f32 %v3344_v50, %v1592_v51  ;;  %v3723_v57 = vmul.f32 %v3591_v34, %v4474_v59  ;;  %v4496_v34 = vld [vmem:[#allocation61_spill] sm:$0xff]  ;;  %v4497_v50 = vld [vmem:[#allocation62_spill] sm:$0xff] }
 0x218   : > { %v1988_v29 = vadd.f32 %v1987_v13, %v1916_v47  ;;  %4471 = vst [vmem:[#allocation44_spill] sm:$0xff] %v3710_v41  ;;  %v1920_v52 = vmul.f32 %v3710_v41, %v3710_v41  ;;  %v4476_v13 = vld [vmem:[#allocation42_spill] sm:$0xff] }
 0x219   : > { %4472 = vst [vmem:[#allocation19_spill] sm:$0xff] %v3715_v58  ;;  %4475 = vst [vmem:[#allocation45_spill] sm:$0xff] %v3723_v57  ;;  %v1922_v41 = vmul.f32 %v3723_v57, %v3723_v57 }
 0x21a   : > { %v1989_v40 = vadd.f32 %v1988_v29, %v1917_v24  ;;  %v4477_v24 = vsub.f32 %v4476_v13, %v3084_v4  ;;  %v1921_v29 = vmul.f32 %v3715_v58, %v3715_v58 }
 0x21c   : > { %v1990_v30 = vadd.f32 %v1989_v40, %v1918_v10  ;;  %v3731_v51 = vmul.f32 %v3607_v16, %v4477_v24  ;;  %v4479_v40 = vld [vmem:[#allocation43_spill] sm:$0xff] }
 0x21d   : > { %v4480_v0 = vsub.f32 %v4479_v40, %v3084_v4  ;;  %v2091_v4 = vld [vmem:[%s4149_s3] sm:$0xff]  ;;  %v4495_v16 = vld [vmem:[#allocation59_spill] sm:$0xff] }
 0x21e   : > { %v1991_v47 = vadd.f32 %v1990_v30, %v1919_v54  ;;  %4478 = vst [vmem:[#allocation22_spill] sm:$0xff] %v3731_v51  ;;  %v1923_v30 = vmul.f32 %v3731_v51, %v3731_v51  ;;  %v4487_v51 = vld [vmem:[#allocation60_spill] sm:$0xff] }
 0x21f   : > { %v3739_v59 = vmul.f32 %v3623_v7, %v4480_v0  ;;  %v4494_v7 = vld [vmem:[#allocation58_spill] sm:$0xff] }
 0x220   : > { %v1992_v10 = vadd.f32 %v1991_v47, %v1920_v52 }
 0x221   : > { %4481 = vst [vmem:[#allocation37_spill] sm:$0xff] %v3739_v59  ;;  %v1924_v24 = vmul.f32 %v3739_v59, %v3739_v59 }
 0x222   : > { %v1993_v54 = vadd.f32 %v1992_v10, %v1921_v29  ;;  %v2005_v29 = vld [vmem:[%s4148_s2] sm:$0xff] }
 0x224   : > { %v1994_v13 = vadd.f32 %v1993_v54, %v1922_v41 }
 0x226   : > { %v1995_v37 = vadd.f32 %v1994_v13, %v1923_v30 }
 0x228   : > { %v1996_v58 = vadd.f32 %v1995_v37, %v1924_v24  ;;  %v2092_v24 = vld [vmem:[%s4149_s3 + $0x8] sm:$0xff] }
 0x22a   : > { %1997 = vadd.xlane.f32.xlu1 %v1996_v58  ;;  %v2006_v58 = vld [vmem:[%s4148_s2 + $0x8] sm:$0xff] }
 0x23b   : > { %2095 = vperm.xlu1 %2558, %v2091_v4  }
 0x2a3   : > { %v1961_v52 = vpop.xlane.xlu1 %1960 }
 0x2a4   : > { %v1999_v47 = vmul.f32 0.00024414063, %v1961_v52  ;;  %v4482_v52 = vld [vmem:[#allocation49_spill] sm:$0xff] }
 0x2a6   : > { %v2001_v40 = vadd.f32 1e-05, %v1999_v47 }
 0x2a8   : > { %2668 = vrsqrt.f32 %v2001_v40  ;;  %v4483_v40 = vld [vmem:[#allocation50_spill] sm:$0xff] }
 0x2b2   : > { %v2669_v41 = vpop.eup %2668 }
 0x2b3   : > { %v2007_v10 = vmul.f32 %v2669_v41, %v2005_v29  ;;  %v4484_v41 = vld [vmem:[#allocation53_spill] sm:$0xff] }
 0x2b5   : > { %2011 = vperm.xlu0 %2557, %v2007_v10  }
 0x2b7   : > { %v1998_v0 = vpop.xlane.xlu1 %1997 }
 0x2b8   : > { %v2000_v54 = vmul.f32 0.00024414063, %v1998_v0  ;;  %v4485_v0 = vld [vmem:[#allocation55_spill] sm:$0xff] }
 0x2ba   : > { %v2002_v37 = vadd.f32 1e-05, %v2000_v54 }
 0x2bb   : > { %v2096_v26 = vpop.permute.xlu1 %2095 }
 0x2bc   : > { %2670 = vrsqrt.f32 %v2002_v37  ;;  %v4486_v37 = vld [vmem:[#allocation57_spill] sm:$0xff] }
 0x2c6   : > { %v2671_v30 = vpop.eup %2670 }
 0x2c7   : > { %v2008_v13 = vmul.f32 %v2671_v30, %v2006_v58  ;;  %v4488_v58 = vld [vmem:[#allocation65_spill] sm:$0xff] }
 0x2c9   : > { %2016 = vperm.xlu1 %2558, %v2008_v13   ;;  %v4489_v13 = vld [vmem:[#allocation70_spill] sm:$0xff] }
 0x2cd   : > { %2100 = vperm.xlu1 %2558, %v2092_v24  }
 0x334   : > { %v2012_v4 = vpop.permute.xlu0 %2011 }
 0x335   : > { %v2019_v47 = vmul.f32 %v2012_v4, %v4482_v52  ;;  %v2020_v29 = vmul.f32 %v2012_v4, %v4483_v40  ;;  %v2021_v10 = vmul.f32 %v2012_v4, %v4484_v41  ;;  %v2022_v54 = vmul.f32 %v2012_v4, %v4485_v0 }
 0x336   : > { %v2023_v59 = vmul.f32 %v2012_v4, %v4486_v37  ;;  %v2024_v57 = vmul.f32 %v2012_v4, %v4487_v51  ;;  %v2025_v30 = vmul.f32 %v2012_v4, %v4488_v58  ;;  %v2026_v63 = vmul.f32 %v2012_v4, %v4489_v13 }
 0x337   : > { %v2027_v5 = vmul.f32 %v2012_v4, %v4490_v17  ;;  %v2028_v24 = vmul.f32 %v2012_v4, %v3259_v32  ;;  %v2029_v52 = vmul.f32 %v2012_v4, %v3278_v39  ;;  %v2030_v40 = vmul.f32 %v2012_v4, %v3296_v28 }
 0x338   : > { %v2031_v41 = vmul.f32 %v2012_v4, %v3319_v3  ;;  %v2032_v0 = vmul.f32 %v2012_v4, %v3335_v48  ;;  %v2033_v37 = vmul.f32 %v2012_v4, %v3354_v55  ;;  %v2034_v51 = vmul.f32 %v2012_v4, %v3368_v44 }
 0x339   : > { %v2035_v58 = vmul.f32 %v2012_v4, %v3382_v61  ;;  %v2036_v13 = vmul.f32 %v2012_v4, %v3396_v1  ;;  %v2037_v17 = vmul.f32 %v2012_v4, %v3410_v8  ;;  %v2038_v32 = vmul.f32 %v2012_v4, %v3424_v14 }
 0x33a   : > { %v2039_v39 = vmul.f32 %v2012_v4, %v3438_v9  ;;  %v2040_v28 = vmul.f32 %v2012_v4, %v3452_v25  ;;  %v2041_v3 = vmul.f32 %v2012_v4, %v3466_v35  ;;  %v2042_v48 = vmul.f32 %v2012_v4, %v3480_v31 }
 0x33b   : > { %v2043_v55 = vmul.f32 %v2012_v4, %v3494_v18  ;;  %v2044_v44 = vmul.f32 %v2012_v4, %v3508_v42  ;;  %v2045_v61 = vmul.f32 %v2012_v4, %v3522_v62  ;;  %v2046_v1 = vmul.f32 %v2012_v4, %v3536_v45 }
 0x33c   : > { %v2047_v8 = vmul.f32 %v2012_v4, %v3550_v53  ;;  %v2048_v14 = vmul.f32 %v2012_v4, %v3564_v11  ;;  %v2049_v9 = vmul.f32 %v2012_v4, %v3578_v33  ;;  %v2050_v25 = vmul.f32 %v2012_v4, %v3594_v36 }
 0x33d   : > { %v2051_v35 = vmul.f32 %v2012_v4, %v3610_v43  ;;  %v2052_v31 = vmul.f32 %v2012_v4, %v3629_v46  ;;  %v2053_v18 = vmul.f32 %v2012_v4, %v3644_v38  ;;  %v2054_v42 = vmul.f32 %v2012_v4, %v3659_v60 }
 0x33e   : > { %v3795_v62 = vadd.f32 %v2096_v26, %v2019_v47  ;;  %v3797_v45 = vadd.f32 %v2096_v26, %v2020_v29  ;;  %v3799_v53 = vadd.f32 %v2096_v26, %v2021_v10  ;;  %v3801_v11 = vadd.f32 %v2096_v26, %v2022_v54 }
 0x33f   : > { %v3803_v33 = vadd.f32 %v2096_v26, %v2023_v59  ;;  %v3805_v36 = vadd.f32 %v2096_v26, %v2024_v57  ;;  %v3807_v20 = vadd.f32 %v2096_v26, %v2025_v30  ;;  %v3809_v43 = vadd.f32 %v2096_v26, %v2026_v63 }
 0x340   : > { %v3811_v46 = vadd.f32 %v2096_v26, %v2027_v5  ;;  %v3813_v38 = vadd.f32 %v2096_v26, %v2028_v24  ;;  %v3815_v60 = vadd.f32 %v2096_v26, %v2029_v52  ;;  %v3817_v4 = vadd.f32 %v2096_v26, %v2030_v40 }
 0x341   : > { %v3819_v47 = vadd.f32 %v2096_v26, %v2031_v41  ;;  %v3821_v29 = vadd.f32 %v2096_v26, %v2032_v0  ;;  %v3823_v59 = vadd.f32 %v2096_v26, %v2033_v37  ;;  %v3825_v57 = vadd.f32 %v2096_v26, %v2034_v51 }
 0x342   : > { %v3827_v10 = vadd.f32 %v2096_v26, %v2035_v58  ;;  %v3829_v63 = vadd.f32 %v2096_v26, %v2036_v13  ;;  %v3831_v5 = vadd.f32 %v2096_v26, %v2037_v17  ;;  %v3833_v54 = vadd.f32 %v2096_v26, %v2038_v32 }
 0x343   : > { %v3835_v30 = vadd.f32 %v2096_v26, %v2039_v39  ;;  %v3837_v24 = vadd.f32 %v2096_v26, %v2040_v28  ;;  %v3839_v52 = vadd.f32 %v2096_v26, %v2041_v3  ;;  %v3841_v40 = vadd.f32 %v2096_v26, %v2042_v48 }
 0x344   : > { %v3843_v41 = vadd.f32 %v2096_v26, %v2043_v55  ;;  %v3845_v0 = vadd.f32 %v2096_v26, %v2044_v44  ;;  %v3847_v37 = vadd.f32 %v2096_v26, %v2045_v61  ;;  %v3849_v51 = vadd.f32 %v2096_v26, %v2046_v1 }
 0x345   : > { %v3851_v58 = vadd.f32 %v2096_v26, %v2047_v8  ;;  %v3853_v13 = vadd.f32 %v2096_v26, %v2048_v14  ;;  %v3855_v17 = vadd.f32 %v2096_v26, %v2049_v9  ;;  %v3857_v32 = vadd.f32 %v2096_v26, %v2050_v25 }
 0x346   : > { %v3859_v39 = vadd.f32 %v2096_v26, %v2051_v35  ;;  %v3861_v28 = vadd.f32 %v2096_v26, %v2052_v31  ;;  %v3863_v3 = vadd.f32 %v2096_v26, %v2053_v18  ;;  %v3865_v48 = vadd.f32 %v2096_v26, %v2054_v42 }
 0x347   : > { %v2175_v55 = vmax.f32 %v3795_v62, 0.0  ;;  %v2176_v44 = vmax.f32 %v3797_v45, 0.0  ;;  %v2177_v61 = vmax.f32 %v3799_v53, 0.0  ;;  %v2178_v1 = vmax.f32 %v3801_v11, 0.0 }
 0x348   : > { %v2179_v8 = vmax.f32 %v3803_v33, 0.0  ;;  %v2180_v14 = vmax.f32 %v3805_v36, 0.0  ;;  %v2181_v9 = vmax.f32 %v3807_v20, 0.0  ;;  %v2182_v25 = vmax.f32 %v3809_v43, 0.0 }
 0x349   : > { %v2183_v35 = vmax.f32 %v3811_v46, 0.0  ;;  %v2184_v26 = vmax.f32 %v3813_v38, 0.0  ;;  %v2185_v31 = vmax.f32 %v3815_v60, 0.0  ;;  %v2186_v18 = vmax.f32 %v3817_v4, 0.0 }
 0x34a   : > { %v2187_v42 = vmax.f32 %v3819_v47, 0.0  ;;  %v2188_v62 = vmax.f32 %v3821_v29, 0.0  ;;  %v2189_v45 = vmax.f32 %v3823_v59, 0.0  ;;  %v2190_v53 = vmax.f32 %v3825_v57, 0.0 }
 0x34b   : > { %v2191_v20 = vmax.f32 %v3827_v10, 0.0  ;;  %v2192_v11 = vmax.f32 %v3829_v63, 0.0  ;;  %v2193_v33 = vmax.f32 %v3831_v5, 0.0  ;;  %v2194_v36 = vmax.f32 %v3833_v54, 0.0 }
 0x34c   : > { %v2195_v43 = vmax.f32 %v3835_v30, 0.0  ;;  %v2196_v46 = vmax.f32 %v3837_v24, 0.0  ;;  %v2197_v38 = vmax.f32 %v3839_v52, 0.0  ;;  %v2198_v60 = vmax.f32 %v3841_v40, 0.0 }
 0x34d   : > { %v2199_v4 = vmax.f32 %v3843_v41, 0.0  ;;  %v2200_v47 = vmax.f32 %v3845_v0, 0.0  ;;  %v2201_v29 = vmax.f32 %v3847_v37, 0.0  ;;  %v2202_v59 = vmax.f32 %v3849_v51, 0.0  ;;  %v4491_v41 = vld [vmem:[#allocation47_spill] sm:$0xff] }
 0x34e   : > { %v2203_v57 = vmax.f32 %v3851_v58, 0.0  ;;  %v2204_v10 = vmax.f32 %v3853_v13, 0.0  ;;  %v2205_v63 = vmax.f32 %v3855_v17, 0.0  ;;  %v2206_v5 = vmax.f32 %v3857_v32, 0.0  ;;  %v4492_v13 = vld [vmem:[#allocation54_spill] sm:$0xff]  ;;  %v4493_v32 = vld [vmem:[#allocation56_spill] sm:$0xff] }
 0x34f   : > { %v2207_v54 = vmax.f32 %v3859_v39, 0.0  ;;  %v2208_v30 = vmax.f32 %v3861_v28, 0.0  ;;  %v2209_v24 = vmax.f32 %v3863_v3, 0.0  ;;  %v2210_v52 = vmax.f32 %v3865_v48, 0.0 }
 0x350   : > { %v2247_v40 = vmul.f32 %v2175_v55, %v3102_v56  ;;  %v2248_v0 = vmul.f32 %v2176_v44, %v4491_v41  ;;  %v2249_v37 = vmul.f32 %v2177_v61, %v3116_v6  ;;  %v2250_v51 = vmul.f32 %v2178_v1, %v3127_v12  ;;  %v4498_v56 = vld [vmem:[#allocation63_spill] sm:$0xff]  ;;  %v4499_v41 = vld [vmem:[#allocation64_spill] sm:$0xff]  ;;  %v4500_v6 = vld [vmem:[#allocation66_spill] sm:$0xff] }
 0x351   : > { %v2251_v58 = vmul.f32 %v2179_v8, %v3134_v23  ;;  %v2252_v17 = vmul.f32 %v2180_v14, %v4492_v13  ;;  %v2253_v39 = vmul.f32 %v2181_v9, %v4493_v32  ;;  %v2254_v28 = vmul.f32 %v2182_v25, %v4494_v7  ;;  %v4501_v12 = vld [vmem:[#allocation67_spill] sm:$0xff]  ;;  %v4502_v23 = vld [vmem:[#allocation68_spill] sm:$0xff]  ;;  %v4503_v13 = vld [vmem:[#allocation69_spill] sm:$0xff] }
 0x352   : > { %v2255_v3 = vmul.f32 %v2183_v35, %v4495_v16  ;;  %v2256_v48 = vmul.f32 %v2184_v26, %v4496_v34  ;;  %v2257_v55 = vmul.f32 %v2185_v31, %v4497_v50  ;;  %v2258_v44 = vmul.f32 %v2186_v18, %v4498_v56  ;;  %v4504_v32 = vld [vmem:[#allocation71_spill] sm:$0xff]  ;;  %v4505_v35 = vld [vmem:[#allocation72_spill] sm:$0xff]  ;;  %v4506_v26 = vld [vmem:[#allocation73_spill] sm:$0xff] }
 0x353   : > { %v2259_v61 = vmul.f32 %v2187_v42, %v4499_v41  ;;  %v2260_v1 = vmul.f32 %v2188_v62, %v4500_v6  ;;  %v2261_v8 = vmul.f32 %v2189_v45, %v4501_v12  ;;  %v2262_v14 = vmul.f32 %v2190_v53, %v4502_v23  ;;  %v4507_v31 = vld [vmem:[#allocation74_spill] sm:$0xff]  ;;  %v4508_v18 = vld [vmem:[#allocation76_spill] sm:$0xff]  ;;  %v4510_v45 = vld [vmem:[#allocation79_spill] sm:$0xff] }
 0x354   : > { %v2263_v9 = vmul.f32 %v2191_v20, %v4503_v13  ;;  %v2264_v25 = vmul.f32 %v2192_v11, %v4504_v32  ;;  %v2265_v16 = vmul.f32 %v2193_v33, %v4505_v35  ;;  %v2266_v34 = vmul.f32 %v2194_v36, %v4506_v26  ;;  %v4509_v62 = vld [vmem:[#allocation78_spill] sm:$0xff]  ;;  %v4511_v20 = vld [vmem:[#allocation81_spill] sm:$0xff] }
 0x355   : > { %v2267_v50 = vmul.f32 %v2195_v43, %v4507_v31  ;;  %v2268_v56 = vmul.f32 %v2196_v46, %v4508_v18  ;;  %v2269_v42 = vmul.f32 %v2197_v38, %v4413_v21  ;;  %v2270_v6 = vmul.f32 %v2198_v60, %v4509_v62  ;;  %v4512_v38 = vld [vmem:[#allocation90_spill] sm:$0xff]  ;;  %v4513_v60 = vld [vmem:[#allocation8_spill] sm:$0xff] }
 0x356   : > { %v2271_v12 = vmul.f32 %v2199_v4, %v4510_v45  ;;  %v2272_v53 = vmul.f32 %v2200_v47, %v3270_v15  ;;  %v2273_v13 = vmul.f32 %v2201_v29, %v4511_v20  ;;  %v2274_v11 = vmul.f32 %v2202_v59, %v3283_v22  ;;  %v4514_v4 = vld [vmem:[#allocation9_spill] sm:$0xff]  ;;  %v4515_v47 = vld [vmem:[#allocation10_spill] sm:$0xff] }
 0x357   : > { %v2275_v33 = vmul.f32 %v2203_v57, %v3301_v2  ;;  %v2276_v36 = vmul.f32 %v2204_v10, %v3304_v19  ;;  %v2277_v43 = vmul.f32 %v2205_v63, %v3307_v49  ;;  %v2278_v46 = vmul.f32 %v2206_v5, %v3340_v27 }
 0x358   : > { %v2279_v21 = vmul.f32 %v2207_v54, %v4512_v38  ;;  %v2280_v62 = vmul.f32 %v2208_v30, %v4513_v60  ;;  %v2281_v45 = vmul.f32 %v2209_v24, %v4514_v4  ;;  %v2282_v15 = vmul.f32 %v2210_v52, %v4515_v47  ;;  %v4558_v47 = vld [vmem:[#allocation56_spill] sm:$0xff]  ;;  %v4559_v4 = vld [vmem:[#allocation59_spill] sm:$0xff]  ;;  %v4560_v60 = vld [vmem:[#allocation61_spill] sm:$0xff] }
 0x359   : > { %v2319_v29 = vmax.f32 %v2247_v40, %v2256_v48  ;;  %v2320_v20 = vmax.f32 %v2248_v0, %v2257_v55  ;;  %v2321_v59 = vmax.f32 %v2249_v37, %v2258_v44  ;;  %v2322_v22 = vmax.f32 %v2250_v51, %v2259_v61  ;;  %v2017_v40 = vpop.permute.xlu1 %2016  ;;  %v4522_v55 = vld [vmem:[#allocation94_spill] sm:$0xff]  ;;  %v4523_v61 = vld [vmem:[#allocation95_spill] sm:$0xff] }
 0x35a   : > { %v2323_v57 = vmax.f32 %v2251_v58, %v2260_v1  ;;  %v2324_v2 = vmax.f32 %v2252_v17, %v2261_v8  ;;  %v2325_v10 = vmax.f32 %v2253_v39, %v2262_v14  ;;  %v2326_v19 = vmax.f32 %v2254_v28, %v2263_v9  ;;  %v4524_v8 = vld [vmem:[#allocation12_spill] sm:$0xff]  ;;  %v4525_v9 = vld [vmem:[#allocation2_spill] sm:$0xff] }
 0x35b   : > { %v2327_v63 = vmax.f32 %v2255_v3, %v2264_v25  ;;  %v2337_v49 = vmax.f32 %v2265_v16, %v2274_v11  ;;  %v2338_v5 = vmax.f32 %v2266_v34, %v2275_v33  ;;  %v2339_v27 = vmax.f32 %v2267_v50, %v2276_v36  ;;  %v4529_v33 = vld [vmem:[#allocation4_spill] sm:$0xff]  ;;  %v4561_v38 = vld [vmem:[#allocation62_spill] sm:$0xff] }
 0x35c   : > { %v2340_v54 = vmax.f32 %v2268_v56, %v2277_v43  ;;  %v2341_v30 = vmax.f32 %v2269_v42, %v2278_v46  ;;  %v2342_v24 = vmax.f32 %v2270_v6, %v2279_v21  ;;  %v2343_v52 = vmax.f32 %v2271_v12, %v2280_v62  ;;  %v4516_v12 = vld [vmem:[#allocation83_spill] sm:$0xff]  ;;  %v4526_v42 = vld [vmem:[#allocation13_spill] sm:$0xff] }
 0x35d   : > { %v2344_v0 = vmax.f32 %v2272_v53, %v2281_v45  ;;  %v2345_v37 = vmax.f32 %v2273_v13, %v2282_v15  ;;  %v2355_v34 = vmax.f32 %v2319_v29, %v2337_v49  ;;  %v2356_v50 = vmax.f32 %v2320_v20, %v2338_v5  ;;  %v4517_v15 = vld [vmem:[#allocation84_spill] sm:$0xff]  ;;  %v4519_v13 = vld [vmem:[#allocation91_spill] sm:$0xff]  ;;  %v4530_v43 = vld [vmem:[#allocation17_spill] sm:$0xff] }
 0x35e   : > { %v2357_v16 = vmax.f32 %v2321_v59, %v2339_v27  ;;  %v2358_v51 = vmax.f32 %v2322_v22, %v2340_v54  ;;  %v2359_v58 = vmax.f32 %v2323_v57, %v2341_v30  ;;  %v2360_v17 = vmax.f32 %v2324_v2, %v2342_v24  ;;  %v4518_v27 = vld [vmem:[#allocation88_spill] sm:$0xff]  ;;  %v4527_v45 = vld [vmem:[#allocation3_spill] sm:$0xff]  ;;  %v4531_v29 = vld [vmem:[#allocation5_spill] sm:$0xff] }
 0x35f   : > { %v2361_v56 = vmax.f32 %v2325_v10, %v2343_v52  ;;  %v2362_v39 = vmax.f32 %v2326_v19, %v2344_v0  ;;  %v2363_v6 = vmax.f32 %v2327_v63, %v2345_v37  ;;  %2373 = vst [vmem:[%s3943_s23] sm:$0xff] %v2355_v34  ;;  %2374 = vst [vmem:[%s3943_s23 + $0x8] sm:$0xff] %v2356_v50  ;;  %v4520_v2 = vld [vmem:[#allocation92_spill] sm:$0xff]  ;;  %v4521_v19 = vld [vmem:[#allocation93_spill] sm:$0xff] }
 0x360   : > { %v2055_v21 = vmul.f32 %v2017_v40, %v4516_v12  ;;  %2375 = vst [vmem:[%s3943_s23 + $0x10] sm:$0xff] %v2357_v16  ;;  %2376 = vst [vmem:[%s3943_s23 + $0x18] sm:$0xff] %v2358_v51  ;;  %v2056_v49 = vmul.f32 %v2017_v40, %v4517_v15  ;;  %v2057_v22 = vmul.f32 %v2017_v40, %v4518_v27  ;;  %v4528_v20 = vld [vmem:[#allocation15_spill] sm:$0xff]  ;;  %v4532_v57 = vld [vmem:[#allocation20_spill] sm:$0xff] }
 0x361   : > { %2377 = vst [vmem:[%s3943_s23 + $0x20] sm:$0xff] %v2359_v58  ;;  %2378 = vst [vmem:[%s3943_s23 + $0x28] sm:$0xff] %v2360_v17  ;;  %v2058_v28 = vmul.f32 %v2017_v40, %v4519_v13  ;;  %v2059_v3 = vmul.f32 %v2017_v40, %v4520_v2  ;;  %v2060_v48 = vmul.f32 %v2017_v40, %v4521_v19  ;;  %v4533_v63 = vld [vmem:[#allocation6_spill] sm:$0xff]  ;;  %v4534_v54 = vld [vmem:[#allocation21_spill] sm:$0xff] }
 0x362   : > { %2379 = vst [vmem:[%s3943_s23 + $0x30] sm:$0xff] %v2361_v56  ;;  %2380 = vst [vmem:[%s3943_s23 + $0x38] sm:$0xff] %v2362_v39  ;;  %v2061_v44 = vmul.f32 %v2017_v40, %v4522_v55  ;;  %v2062_v1 = vmul.f32 %v2017_v40, %v4523_v61  ;;  %v2063_v14 = vmul.f32 %v2017_v40, %v4524_v8  ;;  %v4535_v24 = vld [vmem:[#allocation7_spill] sm:$0xff]  ;;  %v4537_v34 = vld [vmem:[#allocation25_spill] sm:$0xff] }
 0x363   : > { %2381 = vst [vmem:[%s3943_s23 + $0x40] sm:$0xff] %v2363_v6  ;;  %v2064_v25 = vmul.f32 %v2017_v40, %v4525_v9  ;;  %v2065_v62 = vmul.f32 %v2017_v40, %v4526_v42  ;;  %v2066_v53 = vmul.f32 %v2017_v40, %v4527_v45  ;;  %v2067_v11 = vmul.f32 %v2017_v40, %v4528_v20  ;;  %v4536_v0 = vld [vmem:[#allocation23_spill] sm:$0xff]  ;;  %v4538_v16 = vld [vmem:[#allocation28_spill] sm:$0xff]  ;;  %v4539_v58 = vld [vmem:[#allocation29_spill] sm:$0xff]  ;;  %v2101_v6 = vpop.permute.xlu1 %2100 }
 0x364   : > { %v2068_v36 = vmul.f32 %v2017_v40, %v4529_v33  ;;  %v2069_v46 = vmul.f32 %v2017_v40, %v4530_v43  ;;  %v2070_v59 = vmul.f32 %v2017_v40, %v4531_v29  ;;  %v2071_v10 = vmul.f32 %v2017_v40, %v4532_v57  ;;  %v4540_v56 = vld [vmem:[#allocation11_spill] sm:$0xff]  ;;  %v4542_v27 = vld [vmem:[#allocation14_spill] sm:$0xff]  ;;  %v4543_v2 = vld [vmem:[#allocation33_spill] sm:$0xff] }
 0x365   : > { %v2072_v5 = vmul.f32 %v2017_v40, %v4533_v63  ;;  %v2073_v30 = vmul.f32 %v2017_v40, %v4534_v54  ;;  %v2074_v52 = vmul.f32 %v2017_v40, %v4535_v24  ;;  %v2075_v37 = vmul.f32 %v2017_v40, %v4536_v0  ;;  %v4541_v12 = vld [vmem:[#allocation31_spill] sm:$0xff]  ;;  %v4544_v55 = vld [vmem:[#allocation16_spill] sm:$0xff]  ;;  %v4546_v42 = vld [vmem:[#allocation18_spill] sm:$0xff] }
 0x366   : > { %v2076_v50 = vmul.f32 %v2017_v40, %v4537_v34  ;;  %v2077_v51 = vmul.f32 %v2017_v40, %v4538_v16  ;;  %v2078_v17 = vmul.f32 %v2017_v40, %v4539_v58  ;;  %v2079_v39 = vmul.f32 %v2017_v40, %v4540_v56  ;;  %v4545_v8 = vld [vmem:[#allocation36_spill] sm:$0xff]  ;;  %v4548_v43 = vld [vmem:[#allocation19_spill] sm:$0xff]  ;;  %v4549_v57 = vld [vmem:[#allocation45_spill] sm:$0xff] }
 0x367   : > { %v2080_v15 = vmul.f32 %v2017_v40, %v4541_v12  ;;  %v2081_v13 = vmul.f32 %v2017_v40, %v4542_v27  ;;  %v2082_v19 = vmul.f32 %v2017_v40, %v4543_v2  ;;  %v2083_v61 = vmul.f32 %v2017_v40, %v4544_v55  ;;  %v4547_v20 = vld [vmem:[#allocation44_spill] sm:$0xff]  ;;  %v4550_v54 = vld [vmem:[#allocation22_spill] sm:$0xff]  ;;  %v4551_v0 = vld [vmem:[#allocation37_spill] sm:$0xff] }
 0x368   : > { %v2084_v9 = vmul.f32 %v2017_v40, %v4545_v8  ;;  %v2085_v45 = vmul.f32 %v2017_v40, %v4546_v42  ;;  %v2086_v33 = vmul.f32 %v2017_v40, %v4547_v20  ;;  %v2087_v29 = vmul.f32 %v2017_v40, %v4548_v43 }
 0x369   : > { %v2088_v63 = vmul.f32 %v2017_v40, %v4549_v57  ;;  %v2089_v24 = vmul.f32 %v2017_v40, %v4550_v54  ;;  %v2090_v34 = vmul.f32 %v2017_v40, %v4551_v0  ;;  %v3990_v16 = vadd.f32 %v2101_v6, %v2055_v21 }
 0x36a   : > { %v3992_v58 = vadd.f32 %v2101_v6, %v2056_v49  ;;  %v3994_v56 = vadd.f32 %v2101_v6, %v2057_v22  ;;  %v3996_v12 = vadd.f32 %v2101_v6, %v2058_v28  ;;  %v3998_v27 = vadd.f32 %v2101_v6, %v2059_v3 }
 0x36b   : > { %v4000_v2 = vadd.f32 %v2101_v6, %v2060_v48  ;;  %v4002_v55 = vadd.f32 %v2101_v6, %v2061_v44  ;;  %v4004_v8 = vadd.f32 %v2101_v6, %v2062_v1  ;;  %v4006_v42 = vadd.f32 %v2101_v6, %v2063_v14 }
 0x36c   : > { %v4008_v20 = vadd.f32 %v2101_v6, %v2064_v25  ;;  %v4010_v40 = vadd.f32 %v2101_v6, %v2065_v62  ;;  %v4012_v21 = vadd.f32 %v2101_v6, %v2066_v53  ;;  %v4014_v49 = vadd.f32 %v2101_v6, %v2067_v11 }
 0x36d   : > { %v4016_v22 = vadd.f32 %v2101_v6, %v2068_v36  ;;  %v4018_v28 = vadd.f32 %v2101_v6, %v2069_v46  ;;  %v4020_v3 = vadd.f32 %v2101_v6, %v2070_v59  ;;  %v4022_v48 = vadd.f32 %v2101_v6, %v2071_v10 }
 0x36e   : > { %v4024_v44 = vadd.f32 %v2101_v6, %v2072_v5  ;;  %v4026_v1 = vadd.f32 %v2101_v6, %v2073_v30  ;;  %v4028_v14 = vadd.f32 %v2101_v6, %v2074_v52  ;;  %v4030_v25 = vadd.f32 %v2101_v6, %v2075_v37 }
 0x36f   : > { %v4032_v62 = vadd.f32 %v2101_v6, %v2076_v50  ;;  %v4034_v53 = vadd.f32 %v2101_v6, %v2077_v51  ;;  %v4036_v11 = vadd.f32 %v2101_v6, %v2078_v17  ;;  %v4038_v36 = vadd.f32 %v2101_v6, %v2079_v39 }
 0x370   : > { %v4040_v46 = vadd.f32 %v2101_v6, %v2080_v15  ;;  %v4042_v59 = vadd.f32 %v2101_v6, %v2081_v13  ;;  %v4044_v10 = vadd.f32 %v2101_v6, %v2082_v19  ;;  %v4046_v5 = vadd.f32 %v2101_v6, %v2083_v61 }
 0x371   : > { %v4048_v30 = vadd.f32 %v2101_v6, %v2084_v9  ;;  %v4050_v52 = vadd.f32 %v2101_v6, %v2085_v45  ;;  %v4052_v37 = vadd.f32 %v2101_v6, %v2086_v33  ;;  %v4054_v50 = vadd.f32 %v2101_v6, %v2087_v29 }
 0x372   : > { %v4056_v51 = vadd.f32 %v2101_v6, %v2088_v63  ;;  %v4058_v17 = vadd.f32 %v2101_v6, %v2089_v24  ;;  %v4060_v39 = vadd.f32 %v2101_v6, %v2090_v34  ;;  %v2211_v15 = vmax.f32 %v3990_v16, 0.0 }
 0x373   : > { %v2212_v13 = vmax.f32 %v3992_v58, 0.0  ;;  %v2213_v19 = vmax.f32 %v3994_v56, 0.0  ;;  %v2214_v61 = vmax.f32 %v3996_v12, 0.0  ;;  %v2215_v9 = vmax.f32 %v3998_v27, 0.0 }
 0x374   : > { %v2216_v45 = vmax.f32 %v4000_v2, 0.0  ;;  %v2217_v33 = vmax.f32 %v4002_v55, 0.0  ;;  %v2218_v43 = vmax.f32 %v4004_v8, 0.0  ;;  %v2219_v29 = vmax.f32 %v4006_v42, 0.0 }
 0x375   : > { %v2220_v6 = vmax.f32 %v4008_v20, 0.0  ;;  %v2221_v57 = vmax.f32 %v4010_v40, 0.0  ;;  %v2222_v63 = vmax.f32 %v4012_v21, 0.0  ;;  %v2223_v54 = vmax.f32 %v4014_v49, 0.0 }
 0x376   : > { %v2224_v24 = vmax.f32 %v4016_v22, 0.0  ;;  %v2225_v0 = vmax.f32 %v4018_v28, 0.0  ;;  %v2226_v34 = vmax.f32 %v4020_v3, 0.0  ;;  %v2227_v16 = vmax.f32 %v4022_v48, 0.0 }
 0x377   : > { %v2228_v58 = vmax.f32 %v4024_v44, 0.0  ;;  %v2229_v56 = vmax.f32 %v4026_v1, 0.0  ;;  %v2230_v12 = vmax.f32 %v4028_v14, 0.0  ;;  %v2231_v27 = vmax.f32 %v4030_v25, 0.0  ;;  %v4552_v25 = vld [vmem:[#allocation46_spill] sm:$0xff] }
 0x378   : > { %v2232_v2 = vmax.f32 %v4032_v62, 0.0  ;;  %v2233_v55 = vmax.f32 %v4034_v53, 0.0  ;;  %v2234_v8 = vmax.f32 %v4036_v11, 0.0  ;;  %v2235_v42 = vmax.f32 %v4038_v36, 0.0  ;;  %v4553_v53 = vld [vmem:[#allocation47_spill] sm:$0xff]  ;;  %v4554_v36 = vld [vmem:[#allocation48_spill] sm:$0xff] }
 0x379   : > { %v2236_v20 = vmax.f32 %v4040_v46, 0.0  ;;  %v2237_v40 = vmax.f32 %v4042_v59, 0.0  ;;  %v2238_v21 = vmax.f32 %v4044_v10, 0.0  ;;  %v2239_v49 = vmax.f32 %v4046_v5, 0.0  ;;  %v4555_v59 = vld [vmem:[#allocation51_spill] sm:$0xff]  ;;  %v4556_v5 = vld [vmem:[#allocation52_spill] sm:$0xff] }
 0x37a   : > { %v2240_v22 = vmax.f32 %v4048_v30, 0.0  ;;  %v2241_v28 = vmax.f32 %v4050_v52, 0.0  ;;  %v2242_v3 = vmax.f32 %v4052_v37, 0.0  ;;  %v2243_v48 = vmax.f32 %v4054_v50, 0.0  ;;  %v4557_v52 = vld [vmem:[#allocation54_spill] sm:$0xff] }
 0x37b   : > { %v2244_v44 = vmax.f32 %v4056_v51, 0.0  ;;  %v2245_v1 = vmax.f32 %v4058_v17, 0.0  ;;  %v2246_v14 = vmax.f32 %v4060_v39, 0.0  ;;  %v2283_v62 = vmul.f32 %v2211_v15, %v4552_v25  ;;  %v4562_v25 = vld [vmem:[#allocation63_spill] sm:$0xff] }
 0x37c   : > { %v2284_v11 = vmul.f32 %v2212_v13, %v4553_v53  ;;  %v2285_v46 = vmul.f32 %v2213_v19, %v4554_v36  ;;  %v2286_v10 = vmul.f32 %v2214_v61, %v4555_v59  ;;  %v2287_v30 = vmul.f32 %v2215_v9, %v4556_v5  ;;  %v4563_v53 = vld [vmem:[#allocation66_spill] sm:$0xff]  ;;  %v4564_v36 = vld [vmem:[#allocation67_spill] sm:$0xff]  ;;  %v4565_v59 = vld [vmem:[#allocation69_spill] sm:$0xff] }
 0x37d   : > { %v2288_v37 = vmul.f32 %v2216_v45, %v4557_v52  ;;  %v2289_v50 = vmul.f32 %v2217_v33, %v4558_v47  ;;  %v2290_v51 = vmul.f32 %v2218_v43, %v4494_v7  ;;  %v2291_v17 = vmul.f32 %v2219_v29, %v4559_v4  ;;  %v4566_v43 = vld [vmem:[#allocation77_spill] sm:$0xff]  ;;  %v4567_v29 = vld [vmem:[#allocation78_spill] sm:$0xff] }
 0x37e   : > { %v2292_v39 = vmul.f32 %v2220_v6, %v4560_v60  ;;  %v2293_v15 = vmul.f32 %v2221_v57, %v4561_v38  ;;  %v2294_v13 = vmul.f32 %v2222_v63, %v4562_v25  ;;  %v2295_v19 = vmul.f32 %v2223_v54, %v4499_v41  ;;  %v4568_v57 = vld [vmem:[#allocation79_spill] sm:$0xff]  ;;  %v4569_v54 = vld [vmem:[#allocation80_spill] sm:$0xff]  ;;  %v4578_v5 = vld [vmem:[#allocation9_spill] sm:$0xff] }
 0x37f   : > { %v2296_v61 = vmul.f32 %v2224_v24, %v4563_v53  ;;  %v2297_v9 = vmul.f32 %v2225_v0, %v4564_v36  ;;  %v2298_v45 = vmul.f32 %v2226_v34, %v4502_v23  ;;  %v2299_v47 = vmul.f32 %v2227_v16, %v4565_v59  ;;  %v4570_v24 = vld [vmem:[#allocation81_spill] sm:$0xff]  ;;  %v4571_v34 = vld [vmem:[#allocation82_spill] sm:$0xff] }
 0x380   : > { %v2300_v7 = vmul.f32 %v2228_v58, %v4504_v32  ;;  %v2301_v4 = vmul.f32 %v2229_v56, %v4505_v35  ;;  %v2302_v60 = vmul.f32 %v2230_v12, %v4506_v26  ;;  %v2303_v38 = vmul.f32 %v2231_v27, %v4507_v31  ;;  %v4572_v16 = vld [vmem:[#allocation85_spill] sm:$0xff]  ;;  %v4573_v58 = vld [vmem:[#allocation86_spill] sm:$0xff]  ;;  %v4574_v56 = vld [vmem:[#allocation87_spill] sm:$0xff] }
 0x381   : > { %v2304_v33 = vmul.f32 %v2232_v2, %v4508_v18  ;;  %v2305_v41 = vmul.f32 %v2233_v55, %v4566_v43  ;;  %v2306_v6 = vmul.f32 %v2234_v8, %v4567_v29  ;;  %v2307_v63 = vmul.f32 %v2235_v42, %v4568_v57  ;;  %v4575_v12 = vld [vmem:[#allocation89_spill] sm:$0xff]  ;;  %v4576_v27 = vld [vmem:[#allocation90_spill] sm:$0xff]  ;;  %v4577_v55 = vld [vmem:[#allocation8_spill] sm:$0xff] }
 0x382   : > { %v2308_v23 = vmul.f32 %v2236_v20, %v4569_v54  ;;  %v2309_v0 = vmul.f32 %v2237_v40, %v4570_v24  ;;  %v2310_v32 = vmul.f32 %v2238_v21, %v4571_v34  ;;  %v2311_v35 = vmul.f32 %v2239_v49, %v4572_v16  ;;  %v4579_v52 = vld [vmem:[#allocation10_spill] sm:$0xff] }
 0x383   : > { %v2312_v26 = vmul.f32 %v2240_v22, %v4573_v58  ;;  %v2313_v31 = vmul.f32 %v2241_v28, %v4574_v56  ;;  %v2314_v18 = vmul.f32 %v2242_v3, %v4575_v12  ;;  %v2315_v2 = vmul.f32 %v2243_v48, %v4576_v27 }
 0x384   : > { %v2316_v8 = vmul.f32 %v2244_v44, %v4577_v55  ;;  %v2317_v42 = vmul.f32 %v2245_v1, %v4578_v5  ;;  %v2318_v20 = vmul.f32 %v2246_v14, %v4579_v52  ;;  %v2328_v25 = vmax.f32 %v2283_v62, %v2292_v39 }
 0x385   : > { %v2329_v40 = vmax.f32 %v2284_v11, %v2293_v15  ;;  %v2330_v53 = vmax.f32 %v2285_v46, %v2294_v13  ;;  %v2331_v21 = vmax.f32 %v2286_v10, %v2295_v19  ;;  %v2332_v36 = vmax.f32 %v2287_v30, %v2296_v61 }
 0x386   : > { %v2333_v49 = vmax.f32 %v2288_v37, %v2297_v9  ;;  %v2334_v59 = vmax.f32 %v2289_v50, %v2298_v45  ;;  %v2335_v22 = vmax.f32 %v2290_v51, %v2299_v47  ;;  %v2336_v43 = vmax.f32 %v2291_v17, %v2300_v7 }
 0x387   : > { %v2346_v28 = vmax.f32 %v2301_v4, %v2310_v32  ;;  %v2347_v29 = vmax.f32 %v2302_v60, %v2311_v35  ;;  %v2348_v3 = vmax.f32 %v2303_v38, %v2312_v26  ;;  %v2349_v48 = vmax.f32 %v2304_v33, %v2313_v31 }
 0x388   : > { %v2350_v44 = vmax.f32 %v2305_v41, %v2314_v18  ;;  %v2351_v1 = vmax.f32 %v2306_v6, %v2315_v2  ;;  %v2352_v14 = vmax.f32 %v2307_v63, %v2316_v8  ;;  %v2353_v62 = vmax.f32 %v2308_v23, %v2317_v42 }
 0x389   : > { %v2354_v11 = vmax.f32 %v2309_v0, %v2318_v20  ;;  %v2364_v46 = vmax.f32 %v2328_v25, %v2346_v28  ;;  %v2365_v10 = vmax.f32 %v2329_v40, %v2347_v29  ;;  %v2366_v30 = vmax.f32 %v2330_v53, %v2348_v3 }
 0x38a   : > { %v2367_v37 = vmax.f32 %v2331_v21, %v2349_v48  ;;  %v2368_v50 = vmax.f32 %v2332_v36, %v2350_v44  ;;  %v2369_v51 = vmax.f32 %v2333_v49, %v2351_v1  ;;  %v2370_v17 = vmax.f32 %v2334_v59, %v2352_v14 }
 0x38b   : > { %v2371_v39 = vmax.f32 %v2335_v22, %v2353_v62  ;;  %v2372_v15 = vmax.f32 %v2336_v43, %v2354_v11  ;;  %2382 = vst [vmem:[%s3943_s23 + $0x48] sm:$0xff] %v2364_v46  ;;  %2383 = vst [vmem:[%s3943_s23 + $0x50] sm:$0xff] %v2365_v10 }
 0x38c   : > { %2384 = vst [vmem:[%s3943_s23 + $0x58] sm:$0xff] %v2366_v30  ;;  %2385 = vst [vmem:[%s3943_s23 + $0x60] sm:$0xff] %v2367_v37 }
 0x38d   : > { %2386 = vst [vmem:[%s3943_s23 + $0x68] sm:$0xff] %v2368_v50  ;;  %2387 = vst [vmem:[%s3943_s23 + $0x70] sm:$0xff] %v2369_v51 }
 0x38e   : > { %2388 = vst [vmem:[%s3943_s23 + $0x78] sm:$0xff] %v2370_v17  ;;  %2389 = vst [vmem:[%s3943_s23 + $0x80] sm:$0xff] %v2371_v39 }
 0x38f   : > { %2390 = vst [vmem:[%s3943_s23 + $0x88] sm:$0xff] %v2372_v15 }
 0x390 PF: > { %s15_s18 = sadd.s32 1, %s2678_s18  }
 0x391   : > { %p12_p4 = scmp.ge.s32.totalorder %s15_s18, 4  }
 0x393   :  { %14 = sbr.rel (!%p12_p4) target bundleno = 1 (0x1), region = 70 }

// kernel: _lambda_.5
= control target key start
LH: loop header
LB: loop body
LE: loop exit
PB: predicated region body
PF: predicated region fallthrough
CT: control target
= control target key end

     0   :  { %s2055_s18 = smov 0   ;;  %s2584_s0 = inlined_call_operand.vmem [shape: bf16[2,144,1536], index: 0, kind: input, shape index: {}]   ;;  %s2585_s1 = inlined_call_operand.vmem [shape: bf16[16,144], index: 1, kind: input, shape index: {}]   ;;  %s2586_s2 = inlined_call_operand.vmem [shape: f32[16,1], index: 2, kind: input, shape index: {}]   ;;  %s2587_s3 = inlined_call_operand.vmem [shape: f32[16,1], index: 3, kind: input, shape index: {}]   ;;  %s2588_s4 = inlined_call_operand.vmem [shape: f32[1,1536], index: 4, kind: input, shape index: {}]   ;;  %s2589_s5 = inlined_call_operand.vmem [shape: f32[2,16,384], index: 5, kind: output, shape index: {}]  }
   0x1 LB: > { %s1709_s19 = sadd.s32 4294967295, %s2022_s18   ;;  %p1713_p0 = scmp.ge.s32.totalorder %s2022_s18, 1  ;;  %s2022_s18 = sphi %s2055_s18, %s15_s18  }
   0x2   : > { %p187_p1 = scmp.lt.s32.totalorder %s2022_s18, 3 }
   0x4   : > { %p188_p2 = pnand %p1713_p0, %p187_p1 }
   0x6   : > { %191 = sbr.rel (%p188_p2) target bundleno = 1005 (0x3ed), region = 40 }
   0xd   : > { %p215_p3 = scmp.lt.s32.totalorder %s1709_s19, 1  ;;  %v2066_v0 = vld [vmem:[%s2585_s1 + $0x4] ss:$8 sps:$4 sm:$0xff]   ;;  %vm885_vm0 = vcmask 130048   ;;  %v2120_v38 = vld [vmem:[%s2585_s1] ss:$8 sps:$4 sm:$0xff]  }
   0xe   : > { %1826 = vmatprep.mubr.msk.bf16.mxu0 %vm885_vm0, %v2066_v0  ;;  %1827 = vmatprep.mubr.msk.bf16.mxu1 %vm885_vm0, %v2066_v0  ;;  %vm1175_vm1 = vcmask 1041408   ;;  %vm1247_vm2 = vcmask 1043456   ;;  %vm1249_vm3 = vcmask 1045504  }
   0xf   : > { %s2599_s19 = smov (!%p215_p3, %s1709_s19), 1 }
  0x10   : > { %s1834_s22 = smul.u32 864, %s2599_s19 }
  0x11   : > { %s1835_s15 = smul.u32 48, %s2599_s19 }
  0x12   : > { %s2078_s25 = scalar_lea.vmem %s2584_s0, %s1834_s22 }
  0x13   : > { %v1847_v1 = vld [vmem:[%s2078_s25 + $0x4] ss:$48 sps:$4 sm:$0xff]   ;;  %v1849_v2 = vld [vmem:[%s2078_s25] ss:$48 sps:$4 sm:$0xff]   ;;  %v1850_v3 = vld [vmem:[%s2078_s25 + $0xc] ss:$48 sps:$4 sm:$0xff]   ;;  %s2561_s19 = scalar_lea.vmem %s2589_s5, %s1835_s15 }
  0x14   : > { %889 = vmatprep.subr.bf16.mxu0 %v1847_v1  ;;  %v1852_v4 = vld [vmem:[%s2078_s25 + $0x8] ss:$48 sps:$4 sm:$0xff]   ;;  %v1853_v5 = vld [vmem:[%s2078_s25 + $0x64] ss:$48 sps:$4 sm:$0xff]   ;;  %v1855_v6 = vld [vmem:[%s2078_s25 + $0x60] ss:$48 sps:$4 sm:$0xff]   ;;  %932 = vmatprep.subr.bf16.mxu1 %v1850_v3 }
  0x15   : > { %890 = vmatpush1.bf16.msra.mxu0 %v1849_v2  ;;  %v1856_v7 = vld [vmem:[%s2078_s25 + $0x6c] ss:$48 sps:$4 sm:$0xff]   ;;  %933 = vmatpush1.bf16.msra.mxu1 %v1852_v4  ;;  %v1858_v8 = vld [vmem:[%s2078_s25 + $0x68] ss:$48 sps:$4 sm:$0xff]   ;;  %v1859_v9 = vld [vmem:[%s2078_s25 + $0xc4] ss:$48 sps:$4 sm:$0xff]  }
  0x16   : > { %891 = vmatprep.subr.bf16.mxu0 %v1853_v5  ;;  %934 = vmatprep.subr.bf16.mxu1 %v1856_v7  ;;  %v1861_v10 = vld [vmem:[%s2078_s25 + $0xc0] ss:$48 sps:$4 sm:$0xff]   ;;  %v1862_v11 = vld [vmem:[%s2078_s25 + $0xcc] ss:$48 sps:$4 sm:$0xff]   ;;  %v1865_v12 = vld [vmem:[%s2078_s25 + $0x124] ss:$48 sps:$4 sm:$0xff]  }
  0x17   : > { %v1864_v13 = vld [vmem:[%s2078_s25 + $0xc8] ss:$48 sps:$4 sm:$0xff]   ;;  %v1868_v14 = vld [vmem:[%s2078_s25 + $0x12c] ss:$48 sps:$4 sm:$0xff]   ;;  %v1867_v15 = vld [vmem:[%s2078_s25 + $0x120] ss:$48 sps:$4 sm:$0xff]  }
  0x18   : > { %v1871_v16 = vld [vmem:[%s2078_s25 + $0x184] ss:$48 sps:$4 sm:$0xff]   ;;  %v1870_v17 = vld [vmem:[%s2078_s25 + $0x128] ss:$48 sps:$4 sm:$0xff]   ;;  %v1874_v18 = vld [vmem:[%s2078_s25 + $0x18c] ss:$48 sps:$4 sm:$0xff]  }
  0x19   : > { %892 = vmatpush1.bf16.msra.mxu0 %v1855_v6  ;;  %935 = vmatpush1.bf16.msra.mxu1 %v1858_v8  ;;  %v1873_v19 = vld [vmem:[%s2078_s25 + $0x180] ss:$48 sps:$4 sm:$0xff]   ;;  %v1877_v20 = vld [vmem:[%s2078_s25 + $0x1e4] ss:$48 sps:$4 sm:$0xff]   ;;  %v1876_v21 = vld [vmem:[%s2078_s25 + $0x188] ss:$48 sps:$4 sm:$0xff]  }
  0x1a   : > { %893 = vmatprep.subr.bf16.mxu0 %v1859_v9  ;;  %936 = vmatprep.subr.bf16.mxu1 %v1862_v11  ;;  %v1880_v22 = vld [vmem:[%s2078_s25 + $0x1ec] ss:$48 sps:$4 sm:$0xff]   ;;  %v1879_v23 = vld [vmem:[%s2078_s25 + $0x1e0] ss:$48 sps:$4 sm:$0xff]   ;;  %v1883_v24 = vld [vmem:[%s2078_s25 + $0x244] ss:$48 sps:$4 sm:$0xff]  }
  0x1b   : > { %v1882_v25 = vld [vmem:[%s2078_s25 + $0x1e8] ss:$48 sps:$4 sm:$0xff]   ;;  %v1886_v26 = vld [vmem:[%s2078_s25 + $0x24c] ss:$48 sps:$4 sm:$0xff]   ;;  %v1885_v27 = vld [vmem:[%s2078_s25 + $0x240] ss:$48 sps:$4 sm:$0xff]  }
  0x1c   : > { %v1889_v28 = vld [vmem:[%s2078_s25 + $0x2a4] ss:$48 sps:$4 sm:$0xff]   ;;  %v1888_v29 = vld [vmem:[%s2078_s25 + $0x248] ss:$48 sps:$4 sm:$0xff]   ;;  %v1892_v30 = vld [vmem:[%s2078_s25 + $0x2ac] ss:$48 sps:$4 sm:$0xff]  }
  0x1d   : > { %894 = vmatpush1.bf16.msra.mxu0 %v1861_v10  ;;  %937 = vmatpush1.bf16.msra.mxu1 %v1864_v13  ;;  %v1891_v31 = vld [vmem:[%s2078_s25 + $0x2a0] ss:$48 sps:$4 sm:$0xff]   ;;  %v1895_v32 = vld [vmem:[%s2078_s25 + $0x304] ss:$48 sps:$4 sm:$0xff]   ;;  %v1894_v33 = vld [vmem:[%s2078_s25 + $0x2a8] ss:$48 sps:$4 sm:$0xff]  }
  0x1e   : > { %895 = vmatprep.subr.bf16.mxu0 %v1865_v12  ;;  %938 = vmatprep.subr.bf16.mxu1 %v1868_v14  ;;  %v1898_v34 = vld [vmem:[%s2078_s25 + $0x30c] ss:$48 sps:$4 sm:$0xff]   ;;  %v1897_v35 = vld [vmem:[%s2078_s25 + $0x300] ss:$48 sps:$4 sm:$0xff]   ;;  %v1906_v36 = vld [vmem:[%s2078_s25 + $0x14] ss:$48 sps:$4 sm:$0xff]  }
  0x1f   : > { %v1900_v37 = vld [vmem:[%s2078_s25 + $0x308] ss:$48 sps:$4 sm:$0xff]   ;;  %v1909_v39 = vld [vmem:[%s2078_s25 + $0x1c] ss:$48 sps:$4 sm:$0xff]   ;;  %v1904_v40 = vld [vmem:[%s2078_s25 + $0x10] ss:$48 sps:$4 sm:$0xff]  }
  0x20   : > { %v1912_v41 = vld [vmem:[%s2078_s25 + $0x74] ss:$48 sps:$4 sm:$0xff]   ;;  %v1907_v42 = vld [vmem:[%s2078_s25 + $0x18] ss:$48 sps:$4 sm:$0xff]   ;;  %v1915_v43 = vld [vmem:[%s2078_s25 + $0x7c] ss:$48 sps:$4 sm:$0xff]  }
  0x21   : > { %896 = vmatpush1.bf16.msra.mxu0 %v1867_v15  ;;  %939 = vmatpush1.bf16.msra.mxu1 %v1870_v17  ;;  %v1910_v44 = vld [vmem:[%s2078_s25 + $0x70] ss:$48 sps:$4 sm:$0xff]   ;;  %v1918_v45 = vld [vmem:[%s2078_s25 + $0xd4] ss:$48 sps:$4 sm:$0xff]   ;;  %v1913_v46 = vld [vmem:[%s2078_s25 + $0x78] ss:$48 sps:$4 sm:$0xff]  }
  0x22   : > { %897 = vmatprep.subr.bf16.mxu0 %v1871_v16  ;;  %940 = vmatprep.subr.bf16.mxu1 %v1874_v18  ;;  %v1921_v47 = vld [vmem:[%s2078_s25 + $0xdc] ss:$48 sps:$4 sm:$0xff]   ;;  %v1916_v48 = vld [vmem:[%s2078_s25 + $0xd0] ss:$48 sps:$4 sm:$0xff]   ;;  %v1924_v49 = vld [vmem:[%s2078_s25 + $0x134] ss:$48 sps:$4 sm:$0xff]  }
  0x23   : > { %v1919_v50 = vld [vmem:[%s2078_s25 + $0xd8] ss:$48 sps:$4 sm:$0xff]   ;;  %v1927_v51 = vld [vmem:[%s2078_s25 + $0x13c] ss:$48 sps:$4 sm:$0xff]   ;;  %v1922_v52 = vld [vmem:[%s2078_s25 + $0x130] ss:$48 sps:$4 sm:$0xff]  }
  0x24   : > { %v1930_v53 = vld [vmem:[%s2078_s25 + $0x194] ss:$48 sps:$4 sm:$0xff]   ;;  %v1925_v54 = vld [vmem:[%s2078_s25 + $0x138] ss:$48 sps:$4 sm:$0xff]   ;;  %v1933_v55 = vld [vmem:[%s2078_s25 + $0x19c] ss:$48 sps:$4 sm:$0xff]  }
  0x25   : > { %898 = vmatpush1.bf16.msra.mxu0 %v1873_v19  ;;  %941 = vmatpush1.bf16.msra.mxu1 %v1876_v21  ;;  %v1928_v56 = vld [vmem:[%s2078_s25 + $0x190] ss:$48 sps:$4 sm:$0xff]   ;;  %v1936_v57 = vld [vmem:[%s2078_s25 + $0x1f4] ss:$48 sps:$4 sm:$0xff]   ;;  %v1931_v58 = vld [vmem:[%s2078_s25 + $0x198] ss:$48 sps:$4 sm:$0xff]  }
  0x26   : > { %899 = vmatprep.subr.bf16.mxu0 %v1877_v20  ;;  %942 = vmatprep.subr.bf16.mxu1 %v1880_v22  ;;  %v1939_v59 = vld [vmem:[%s2078_s25 + $0x1fc] ss:$48 sps:$4 sm:$0xff]   ;;  %v1934_v60 = vld [vmem:[%s2078_s25 + $0x1f0] ss:$48 sps:$4 sm:$0xff]   ;;  %v1942_v61 = vld [vmem:[%s2078_s25 + $0x254] ss:$48 sps:$4 sm:$0xff]  }
  0x27   : > { %v1937_v62 = vld [vmem:[%s2078_s25 + $0x1f8] ss:$48 sps:$4 sm:$0xff]   ;;  %v1945_v63 = vld [vmem:[%s2078_s25 + $0x25c] ss:$48 sps:$4 sm:$0xff]   ;;  %v1940_v1 = vld [vmem:[%s2078_s25 + $0x250] ss:$48 sps:$4 sm:$0xff]  }
  0x28   : > { %v1948_v2 = vld [vmem:[%s2078_s25 + $0x2b4] ss:$48 sps:$4 sm:$0xff]   ;;  %v1943_v3 = vld [vmem:[%s2078_s25 + $0x258] ss:$48 sps:$4 sm:$0xff]   ;;  %v1951_v4 = vld [vmem:[%s2078_s25 + $0x2bc] ss:$48 sps:$4 sm:$0xff]  }
  0x29   : > { %900 = vmatpush1.bf16.msra.mxu0 %v1879_v23  ;;  %943 = vmatpush1.bf16.msra.mxu1 %v1882_v25  ;;  %v1946_v5 = vld [vmem:[%s2078_s25 + $0x2b0] ss:$48 sps:$4 sm:$0xff]   ;;  %v1954_v6 = vld [vmem:[%s2078_s25 + $0x314] ss:$48 sps:$4 sm:$0xff]   ;;  %v1949_v7 = vld [vmem:[%s2078_s25 + $0x2b8] ss:$48 sps:$4 sm:$0xff]  }
  0x2a   : > { %901 = vmatprep.subr.bf16.mxu0 %v1883_v24  ;;  %944 = vmatprep.subr.bf16.mxu1 %v1886_v26  ;;  %v1957_v8 = vld [vmem:[%s2078_s25 + $0x31c] ss:$48 sps:$4 sm:$0xff]   ;;  %v1952_v9 = vld [vmem:[%s2078_s25 + $0x310] ss:$48 sps:$4 sm:$0xff]   ;;  %v1960_v10 = vld [vmem:[%s2078_s25 + $0x24] ss:$48 sps:$4 sm:$0xff]  }
  0x2b   : > { %v1955_v11 = vld [vmem:[%s2078_s25 + $0x318] ss:$48 sps:$4 sm:$0xff]   ;;  %v1963_v12 = vld [vmem:[%s2078_s25 + $0x2c] ss:$48 sps:$4 sm:$0xff]   ;;  %v1958_v13 = vld [vmem:[%s2078_s25 + $0x20] ss:$48 sps:$4 sm:$0xff]  }
  0x2c   : > { %v1966_v14 = vld [vmem:[%s2078_s25 + $0x84] ss:$48 sps:$4 sm:$0xff]   ;;  %v1961_v15 = vld [vmem:[%s2078_s25 + $0x28] ss:$48 sps:$4 sm:$0xff]   ;;  %v1969_v16 = vld [vmem:[%s2078_s25 + $0x8c] ss:$48 sps:$4 sm:$0xff]  }
  0x2d   : > { %902 = vmatpush1.bf16.msra.mxu0 %v1885_v27  ;;  %945 = vmatpush1.bf16.msra.mxu1 %v1888_v29  ;;  %v1964_v17 = vld [vmem:[%s2078_s25 + $0x80] ss:$48 sps:$4 sm:$0xff]   ;;  %v1972_v18 = vld [vmem:[%s2078_s25 + $0xe4] ss:$48 sps:$4 sm:$0xff]   ;;  %v1967_v19 = vld [vmem:[%s2078_s25 + $0x88] ss:$48 sps:$4 sm:$0xff]  }
  0x2e   : > { %903 = vmatprep.subr.bf16.mxu0 %v1889_v28  ;;  %946 = vmatprep.subr.bf16.mxu1 %v1892_v30  ;;  %v1975_v20 = vld [vmem:[%s2078_s25 + $0xec] ss:$48 sps:$4 sm:$0xff]   ;;  %v1970_v21 = vld [vmem:[%s2078_s25 + $0xe0] ss:$48 sps:$4 sm:$0xff]   ;;  %v1978_v22 = vld [vmem:[%s2078_s25 + $0x144] ss:$48 sps:$4 sm:$0xff]  }
  0x2f   : > { %v1973_v23 = vld [vmem:[%s2078_s25 + $0xe8] ss:$48 sps:$4 sm:$0xff]   ;;  %v1981_v24 = vld [vmem:[%s2078_s25 + $0x14c] ss:$48 sps:$4 sm:$0xff]   ;;  %v1976_v25 = vld [vmem:[%s2078_s25 + $0x140] ss:$48 sps:$4 sm:$0xff]  }
  0x30   : > { %v1979_v26 = vld [vmem:[%s2078_s25 + $0x148] ss:$48 sps:$4 sm:$0xff]   ;;  %v1987_v27 = vld [vmem:[%s2078_s25 + $0x1ac] ss:$48 sps:$4 sm:$0xff]   ;;  %v1982_v28 = vld [vmem:[%s2078_s25 + $0x1a0] ss:$48 sps:$4 sm:$0xff]  }
  0x31   : > { %904 = vmatpush1.bf16.msra.mxu0 %v1891_v31  ;;  %947 = vmatpush1.bf16.msra.mxu1 %v1894_v33  ;;  %v1990_v29 = vld [vmem:[%s2078_s25 + $0x204] ss:$48 sps:$4 sm:$0xff]   ;;  %v1985_v30 = vld [vmem:[%s2078_s25 + $0x1a8] ss:$48 sps:$4 sm:$0xff]   ;;  %v1993_v31 = vld [vmem:[%s2078_s25 + $0x20c] ss:$48 sps:$4 sm:$0xff]  }
  0x32   : > { %905 = vmatprep.subr.bf16.mxu0 %v1895_v32  ;;  %948 = vmatprep.subr.bf16.mxu1 %v1898_v34  ;;  %v1988_v32 = vld [vmem:[%s2078_s25 + $0x200] ss:$48 sps:$4 sm:$0xff]   ;;  %v1996_v33 = vld [vmem:[%s2078_s25 + $0x264] ss:$48 sps:$4 sm:$0xff]   ;;  %v1991_v34 = vld [vmem:[%s2078_s25 + $0x208] ss:$48 sps:$4 sm:$0xff]  }
  0x35   : > { %906 = vmatpush1.bf16.msra.mxu0 %v1897_v35  ;;  %949 = vmatpush1.bf16.msra.mxu1 %v1900_v37  ;;  %v1999_v35 = vld [vmem:[%s2078_s25 + $0x26c] ss:$48 sps:$4 sm:$0xff]   ;;  %v2002_v37 = vld [vmem:[%s2078_s25 + $0x2c4] ss:$48 sps:$4 sm:$0xff]  }
  0x36   : > { %975 = vmatprep.subr.bf16.mxu0 %v1906_v36  ;;  %1018 = vmatprep.subr.bf16.mxu1 %v1909_v39  ;;  %v1994_v36 = vld [vmem:[%s2078_s25 + $0x260] ss:$48 sps:$4 sm:$0xff]   ;;  %v1997_v39 = vld [vmem:[%s2078_s25 + $0x268] ss:$48 sps:$4 sm:$0xff]  }
  0x38   : > { %922 = vmatmul.mubr.bf16.vlgmr.msra.gmra.mrb[0].mxu0 %v2120_v38  ;;  %965 = vmatmul.mubr.bf16.vlgmr.msra.gmra.mrb[0].mxu1 %v2120_v38 }
  0x39   : > { %976 = vmatpush1.bf16.msra.mxu0 %v1904_v40  ;;  %1828 = vmatprep.mubr.msk.bf16.mxu0 %vm885_vm0, %v2066_v0  ;;  %v2005_v40 = vld [vmem:[%s2078_s25 + $0x2cc] ss:$48 sps:$4 sm:$0xff]  }
  0x3a   : > { %977 = vmatprep.subr.bf16.mxu0 %v1912_v41  ;;  %1019 = vmatpush1.bf16.msra.mxu1 %v1907_v42  ;;  %v2000_v41 = vld [vmem:[%s2078_s25 + $0x2c0] ss:$48 sps:$4 sm:$0xff]   ;;  %v2008_v42 = vld [vmem:[%s2078_s25 + $0x324] ss:$48 sps:$4 sm:$0xff]  }
  0x3b   : > { %1829 = vmatprep.mubr.msk.bf16.mxu1 %vm885_vm0, %v2066_v0  ;;  %1020 = vmatprep.subr.bf16.mxu1 %v1915_v43  ;;  %v2003_v43 = vld [vmem:[%s2078_s25 + $0x2c8] ss:$48 sps:$4 sm:$0xff]  }
  0x3d   : > { %978 = vmatpush1.bf16.msra.mxu0 %v1910_v44  ;;  %v2011_v44 = vld [vmem:[%s2078_s25 + $0x32c] ss:$48 sps:$4 sm:$0xff]  }
  0x3e   : > { %979 = vmatprep.subr.bf16.mxu0 %v1918_v45  ;;  %1021 = vmatpush1.bf16.msra.mxu1 %v1913_v46  ;;  %v2006_v45 = vld [vmem:[%s2078_s25 + $0x320] ss:$48 sps:$4 sm:$0xff]   ;;  %v2009_v46 = vld [vmem:[%s2078_s25 + $0x328] ss:$48 sps:$4 sm:$0xff]  }
  0x3f   : > { %1022 = vmatprep.subr.bf16.mxu1 %v1921_v47 }
  0x41   : > { %980 = vmatpush1.bf16.msra.mxu0 %v1916_v48 }
  0x42   : > { %981 = vmatprep.subr.bf16.mxu0 %v1924_v49  ;;  %1023 = vmatpush1.bf16.msra.mxu1 %v1919_v50 }
  0x43   : > { %1024 = vmatprep.subr.bf16.mxu1 %v1927_v51 }
  0x45   : > { %982 = vmatpush1.bf16.msra.mxu0 %v1922_v52 }
  0x46   : > { %983 = vmatprep.subr.bf16.mxu0 %v1930_v53  ;;  %1025 = vmatpush1.bf16.msra.mxu1 %v1925_v54 }
  0x47   : > { %1026 = vmatprep.subr.bf16.mxu1 %v1933_v55 }
  0x49   : > { %984 = vmatpush1.bf16.msra.mxu0 %v1928_v56 }
  0x4a   : > { %985 = vmatprep.subr.bf16.mxu0 %v1936_v57  ;;  %1027 = vmatpush1.bf16.msra.mxu1 %v1931_v58 }
  0x4b   : > { %1028 = vmatprep.subr.bf16.mxu1 %v1939_v59 }
  0x4d   : > { %986 = vmatpush1.bf16.msra.mxu0 %v1934_v60 }
  0x4e   : > { %987 = vmatprep.subr.bf16.mxu0 %v1942_v61  ;;  %1029 = vmatpush1.bf16.msra.mxu1 %v1937_v62 }
  0x4f   : > { %1030 = vmatprep.subr.bf16.mxu1 %v1945_v63 }
  0x51   : > { %988 = vmatpush1.bf16.msra.mxu0 %v1940_v1 }
  0x52   : > { %989 = vmatprep.subr.bf16.mxu0 %v1948_v2  ;;  %1031 = vmatpush1.bf16.msra.mxu1 %v1943_v3 }
  0x53   : > { %1032 = vmatprep.subr.bf16.mxu1 %v1951_v4 }
  0x55   : > { %990 = vmatpush1.bf16.msra.mxu0 %v1946_v5 }
  0x56   : > { %991 = vmatprep.subr.bf16.mxu0 %v1954_v6  ;;  %1033 = vmatpush1.bf16.msra.mxu1 %v1949_v7 }
  0x57   : > { %1034 = vmatprep.subr.bf16.mxu1 %v1957_v8 }
  0x59   : > { %992 = vmatpush1.bf16.msra.mxu0 %v1952_v9 }
  0x5a   : > { %1061 = vmatprep.subr.bf16.mxu0 %v1960_v10  ;;  %1035 = vmatpush1.bf16.msra.mxu1 %v1955_v11 }
  0x5b   : > { %1104 = vmatprep.subr.bf16.mxu1 %v1963_v12 }
  0x5c   : > { %1008 = vmatmul.mubr.bf16.vlgmr.msra.gmra.mrb[4].mxu0 %v2120_v38 }
  0x5d   : > { %1062 = vmatpush1.bf16.msra.mxu0 %v1958_v13  ;;  %1830 = vmatprep.mubr.msk.bf16.mxu0 %vm885_vm0, %v2066_v0 }
  0x5e   : > { %1051 = vmatmul.mubr.bf16.vlgmr.msra.gmra.mrb[4].mxu1 %v2120_v38  ;;  %1063 = vmatprep.subr.bf16.mxu0 %v1966_v14 }
  0x5f   : > { %1105 = vmatpush1.bf16.msra.mxu1 %v1961_v15  ;;  %1831 = vmatprep.mubr.msk.bf16.mxu1 %vm885_vm0, %v2066_v0  ;;  %v1984_v0 = vld [vmem:[%s2078_s25 + $0x1a4] ss:$48 sps:$4 sm:$0xff]  }
  0x60   : > { %1106 = vmatprep.subr.bf16.mxu1 %v1969_v16 }
  0x61   : > { %1064 = vmatpush1.bf16.msra.mxu0 %v1964_v17 }
  0x62   : > { %1065 = vmatprep.subr.bf16.mxu0 %v1972_v18 }
  0x63   : > { %1107 = vmatpush1.bf16.msra.mxu1 %v1967_v19 }
  0x64   : > { %1108 = vmatprep.subr.bf16.mxu1 %v1975_v20 }
  0x65   : > { %1066 = vmatpush1.bf16.msra.mxu0 %v1970_v21 }
  0x66   : > { %1067 = vmatprep.subr.bf16.mxu0 %v1978_v22 }
  0x67   : > { %1109 = vmatpush1.bf16.msra.mxu1 %v1973_v23 }
  0x68   : > { %1110 = vmatprep.subr.bf16.mxu1 %v1981_v24 }
  0x69   : > { %1068 = vmatpush1.bf16.msra.mxu0 %v1976_v25 }
  0x6a   : > { %1069 = vmatprep.subr.bf16.mxu0 %v1984_v0 }
  0x6b   : > { %1111 = vmatpush1.bf16.msra.mxu1 %v1979_v26 }
  0x6c   : > { %1112 = vmatprep.subr.bf16.mxu1 %v1987_v27 }
  0x6d   : > { %1070 = vmatpush1.bf16.msra.mxu0 %v1982_v28  ;;  %v2024_v28 = vmov 0  }
  0x6e   : > { %1071 = vmatprep.subr.bf16.mxu0 %v1990_v29  ;;  %1845 = vset.pattern.permute.xlu1 %v2024_v28 }
  0x6f   : > { %1113 = vmatpush1.bf16.msra.mxu1 %v1985_v30  ;;  %1846 = vset.pattern.permute.xlu0 %v2024_v28 }
  0x70   : > { %1114 = vmatprep.subr.bf16.mxu1 %v1993_v31 }
  0x71   : > { %1072 = vmatpush1.bf16.msra.mxu0 %v1988_v32 }
  0x72   : > { %1073 = vmatprep.subr.bf16.mxu0 %v1996_v33 }
  0x73   : > { %1115 = vmatpush1.bf16.msra.mxu1 %v1991_v34 }
  0x74   : > { %1116 = vmatprep.subr.bf16.mxu1 %v1999_v35 }
  0x75   : > { %1074 = vmatpush1.bf16.msra.mxu0 %v1994_v36 }
  0x76   : > { %1075 = vmatprep.subr.bf16.mxu0 %v2002_v37 }
  0x77   : > { %1117 = vmatpush1.bf16.msra.mxu1 %v1997_v39 }
  0x78   : > { %1118 = vmatprep.subr.bf16.mxu1 %v2005_v40 }
  0x79   : > { %1076 = vmatpush1.bf16.msra.mxu0 %v2000_v41 }
  0x7a   : > { %1077 = vmatprep.subr.bf16.mxu0 %v2008_v42 }
  0x7b   : > { %1119 = vmatpush1.bf16.msra.mxu1 %v2003_v43 }
  0x7c   : > { %1120 = vmatprep.subr.bf16.mxu1 %v2011_v44 }
  0x7d   : > { %1078 = vmatpush1.bf16.msra.mxu0 %v2006_v45 }
  0x7f   : > { %1121 = vmatpush1.bf16.msra.mxu1 %v2009_v46 }
  0x80   : > { %1094 = vmatmul.mubr.bf16.vlgmr.msra.gmra.mrb[8].mxu0 %v2120_v38 }
  0x82   : > { %1137 = vmatmul.mubr.bf16.vlgmr.msra.gmra.mrb[8].mxu1 %v2120_v38 }
 0x10b   : > { %v2207_v47 = vpop.f32.mrb[0].mxu0  ;;  %v2215_v51 = vpop.f32.mrb[0].mxu1 }
 0x10c   : > { %v2209_v48 = vpop.f32.mrb[1].mxu0  ;;  %v2219_v53 = vpop.f32.mrb[1].mxu1 }
 0x10d   : > { %v1149_v49 = vadd.f32 %v2209_v48, %v2207_v47  ;;  %v2213_v50 = vpop.f32.mrb[2].mxu0  ;;  %v2224_v55 = vpop.f32.mrb[2].mxu1 }
 0x10e   : > { %v2217_v52 = vpop.f32.mrb[3].mxu0  ;;  %v2226_v56 = vpop.f32.mrb[3].mxu1 }
 0x10f   : > { %v1150_v54 = vadd.f32 %v1149_v49, %v2215_v51  ;;  %v1162_v38 = vadd.f32 %v2217_v52, %v2213_v50 }
 0x111   : > { %v1151_v57 = vadd.f32 %v1150_v54, %v2219_v53  ;;  %v1163_v58 = vadd.f32 %v1162_v38, %v2224_v55 }
 0x113   : > { %v1164_v59 = vadd.f32 %v1163_v58, %v2226_v56 }
 0x12f   : > { %v2231_v60 = vpop.f32.mrb[4].mxu0 }
 0x130   : > { %v1152_v61 = vadd.f32 %v1151_v57, %v2231_v60  ;;  %v2234_v62 = vpop.f32.mrb[5].mxu0 }
 0x131   : > { %v2236_v63 = vpop.f32.mrb[6].mxu0  ;;  %v2238_v1 = vpop.f32.mrb[4].mxu1 }
 0x132   : > { %v1153_v2 = vadd.f32 %v1152_v61, %v2234_v62  ;;  %v1165_v3 = vadd.f32 %v1164_v59, %v2236_v63  ;;  %v2242_v4 = vpop.f32.mrb[7].mxu0  ;;  %v2244_v5 = vpop.f32.mrb[5].mxu1 }
 0x133   : > { %v2246_v6 = vpop.f32.mrb[6].mxu1 }
 0x134   : > { %v1154_v7 = vadd.f32 %v1153_v2, %v2238_v1  ;;  %v1166_v8 = vadd.f32 %v1165_v3, %v2242_v4  ;;  %v2250_v9 = vpop.f32.mrb[7].mxu1 }
 0x136   : > { %v1155_v10 = vadd.f32 %v1154_v7, %v2244_v5  ;;  %v1167_v11 = vadd.f32 %v1166_v8, %v2246_v6 }
 0x138   : > { %v1168_v12 = vadd.f32 %v1167_v11, %v2250_v9 }
 0x153   : > { %v2255_v13 = vpop.f32.mrb[8].mxu0 }
 0x154   : > { %v1156_v14 = vadd.f32 %v1155_v10, %v2255_v13  ;;  %v2258_v15 = vpop.f32.mrb[9].mxu0 }
 0x155   : > { %v2260_v16 = vpop.f32.mrb[8].mxu1  ;;  %v2262_v17 = vpop.f32.mrb[10].mxu0 }
 0x156   : > { %v1157_v18 = vadd.f32 %v1156_v14, %v2258_v15  ;;  %v1169_v19 = vadd.f32 %v1168_v12, %v2262_v17  ;;  %v2266_v20 = vpop.f32.mrb[9].mxu1  ;;  %v2268_v21 = vpop.f32.mrb[11].mxu0 }
 0x157   : > { %v2270_v22 = vpop.f32.mrb[10].mxu1 }
 0x158   : > { %v1158_v23 = vadd.f32 %v1157_v18, %v2260_v16  ;;  %v1170_v24 = vadd.f32 %v1169_v19, %v2268_v21  ;;  %v2274_v25 = vpop.f32.mrb[11].mxu1 }
 0x15a   : > { %v1171_v0 = vadd.f32 %v1170_v24, %v2270_v22  ;;  %v1159_v26 = vadd.f32 %v1158_v23, %v2266_v20 }
 0x15c   : > { %v1172_v27 = vadd.f32 %v1171_v0, %v2274_v25  ;;  %1160 = vadd.xlane.f32.xlu0 %v1159_v26 }
 0x160   : > { %1173 = vadd.xlane.f32.xlu0 %v1172_v27 }
 0x1e9   : > { %v1161_v29 = vpop.xlane.xlu0 %1160 }
 0x1ea   : > { %v1176_v30 = vsel %vm1175_vm1, %v1161_v29, 0.0  ;;  %v1184_v31 = vrot.slane %v1161_v29, 2  ;;  %v1193_v32 = vrot.slane %v1161_v29, 4  ;;  %v1202_v33 = vrot.slane %v1161_v29, 6 }
 0x1eb   : > { %v1177_v34 = vrot.slane %v1176_v30, 4 }
 0x1ec   : > { %v1186_v35 = vsel %vm1175_vm1, %v1184_v31, 0.0  ;;  %v1195_v36 = vsel %vm1175_vm1, %v1193_v32, 0.0  ;;  %v1204_v37 = vsel %vm1175_vm1, %v1202_v33, 0.0 }
 0x1ed   : > { %v1178_v39 = vadd.f32 %v1177_v34, %v1176_v30  ;;  %v1187_v40 = vrot.slane %v1186_v35, 4  ;;  %v1196_v41 = vrot.slane %v1195_v36, 4  ;;  %v1205_v42 = vrot.slane %v1204_v37, 4  ;;  %v1174_v43 = vpop.xlane.xlu0 %1173 }
 0x1ee   : > { %v1211_v44 = vsel %vm1175_vm1, %v1174_v43, 0.0  ;;  %v1219_v45 = vrot.slane %v1174_v43, 2  ;;  %v1228_v46 = vrot.slane %v1174_v43, 4  ;;  %v1237_v49 = vrot.slane %v1174_v43, 6 }
 0x1ef   : > { %v1179_v54 = vrot.slane %v1178_v39, 2  ;;  %v1188_v38 = vadd.f32 %v1187_v40, %v1186_v35  ;;  %v1197_v57 = vadd.f32 %v1196_v41, %v1195_v36  ;;  %v1206_v58 = vadd.f32 %v1205_v42, %v1204_v37 }
 0x1f0   : > { %v1212_v59 = vrot.slane %v1211_v44, 4  ;;  %v1221_v61 = vsel %vm1175_vm1, %v1219_v45, 0.0  ;;  %v1230_v2 = vsel %vm1175_vm1, %v1228_v46, 0.0  ;;  %v1239_v3 = vsel %vm1175_vm1, %v1237_v49, 0.0 }
 0x1f1   : > { %v1180_v7 = vadd.f32 %v1179_v54, %v1178_v39  ;;  %v1189_v8 = vrot.slane %v1188_v38, 2  ;;  %v1198_v10 = vrot.slane %v1197_v57, 2  ;;  %v1222_v11 = vrot.slane %v1221_v61, 4 }
 0x1f2   : > { %v1213_v12 = vadd.f32 %v1212_v59, %v1211_v44  ;;  %v1231_v14 = vrot.slane %v1230_v2, 4  ;;  %v1240_v18 = vrot.slane %v1239_v3, 4  ;;  %v1207_v19 = vrot.slane %v1206_v58, 2 }
 0x1f3   : > { %v1181_v23 = vrot.slane %v1180_v7, 1  ;;  %v1190_v24 = vadd.f32 %v1189_v8, %v1188_v38  ;;  %v1223_v0 = vadd.f32 %v1222_v11, %v1221_v61  ;;  %v1199_v26 = vadd.f32 %v1198_v10, %v1197_v57 }
 0x1f4   : > { %v1214_v27 = vrot.slane %v1213_v12, 2  ;;  %v1232_v28 = vadd.f32 %v1231_v14, %v1230_v2  ;;  %v1241_v29 = vadd.f32 %v1240_v18, %v1239_v3  ;;  %v1208_v30 = vadd.f32 %v1207_v19, %v1206_v58 }
 0x1f5   : > { %v1224_v31 = vrot.slane %v1223_v0, 2  ;;  %v1191_v32 = vrot.slane %v1190_v24, 1  ;;  %v1200_v33 = vrot.slane %v1199_v26, 1  ;;  %v1182_v40 = vadd.f32 %v1181_v23, %v1180_v7 }
 0x1f6   : > { %v1215_v34 = vadd.f32 %v1214_v27, %v1213_v12  ;;  %v1233_v35 = vrot.slane %v1232_v28, 2  ;;  %v1242_v36 = vrot.slane %v1241_v29, 2  ;;  %v1209_v37 = vrot.slane %v1208_v30, 1 }
 0x1f7   : > { %v1225_v39 = vadd.f32 %v1224_v31, %v1223_v0  ;;  %v1192_v41 = vadd.f32 %v1191_v32, %v1190_v24  ;;  %v1201_v42 = vadd.f32 %v1200_v33, %v1199_v26  ;;  %v1292_v18 = vlaneseq  ;;  %v1147_v0 = vld [vmem:[%s2588_s4] sm:$0xff] }
 0x1f8   : > { %v1216_v43 = vrot.slane %v1215_v34, 1  ;;  %v1234_v44 = vadd.f32 %v1233_v35, %v1232_v28  ;;  %v1243_v45 = vadd.f32 %v1242_v36, %v1241_v29  ;;  %v1210_v49 = vadd.f32 %v1209_v37, %v1208_v30 }
 0x1f9   : > { %v1226_v46 = vrot.slane %v1225_v39, 1  ;;  %v1246_v54 = vsel %vm1175_vm1, %v1182_v40, %v1192_v41  ;;  %v1293_v19 = vshrl.u32 %v1292_v18, 7 }
 0x1fa   : > { %v1235_v38 = vrot.slane %v1234_v44, 1  ;;  %v1248_v57 = vsel %vm1247_vm2, %v1246_v54, %v1201_v42  ;;  %v1244_v58 = vrot.slane %v1243_v45, 1  ;;  %v1217_v59 = vadd.f32 %v1216_v43, %v1215_v34 }
 0x1fb   : > { %v1227_v61 = vadd.f32 %v1226_v46, %v1225_v39  ;;  %v1250_v2 = vsel %vm1249_vm3, %v1248_v57, %v1210_v49  ;;  %v1294_v23 = vsub.s32 0, %v1293_v19  ;;  %v1298_v24 = vsub.s32 1, %v1293_v19  ;;  %v1148_v46 = vld [vmem:[%s2588_s4 + $0x8] sm:$0xf] }
 0x1fc   : > { %v1254_v3 = vmul.f32 0.00045913682, %v1250_v2  ;;  %v1236_v7 = vadd.f32 %v1235_v38, %v1234_v44  ;;  %v1245_v8 = vadd.f32 %v1244_v58, %v1243_v45  ;;  %v1302_v26 = vsub.s32 2, %v1293_v19 }
 0x1fd   : > { %v1251_v10 = vsel %vm1175_vm1, %v1217_v59, %v1227_v61  ;;  %v2298_v28 = vrot.slane %v1147_v0, %v1294_v23  ;;  %v2300_v29 = vrot.slane %v1147_v0, %v1298_v24  ;;  %v1306_v30 = vsub.s32 3, %v1293_v19 }
 0x1fe   : > { %1258 = vperm.xlu1 %1845, %v1254_v3   ;;  %v1252_v11 = vsel %vm1247_vm2, %v1251_v10, %v1236_v7  ;;  %v1310_v33 = vsub.s32 4, %v1293_v19  ;;  %v2308_v35 = vrot.slane %v1147_v0, %v1302_v26  ;;  %v1314_v36 = vsub.s32 5, %v1293_v19 }
 0x1ff   : > { %v1253_v12 = vsel %vm1249_vm3, %v1252_v11, %v1245_v8  ;;  %v2312_v39 = vrot.slane %v1147_v0, %v1306_v30 }
 0x200   : > { %v1255_v14 = vmul.f32 0.00045913682, %v1253_v12  ;;  %v2322_v41 = vrot.slane %v1147_v0, %v1310_v33  ;;  %v2338_v49 = vrot.slane %v1147_v0, %v1314_v36  ;;  %v2371_v12 = vrot.slane %v1148_v46, %v1298_v24 }
 0x201   : > { %v2388_v24 = vrot.slane %v1148_v46, %v1302_v26 }
 0x202   : > { %1263 = vperm.xlu1 %1845, %v1255_v14  }
 0x203   : > { %2594 = vst [vmem:[#allocation2_spill] sm:$0xff] %v2388_v24 }
 0x27d   : > { %v2296_v27 = vpop.permute.xlu1 %1258 }
 0x27e   : > { %v1266_v31 = vsub.f32 %v2207_v47, %v2296_v27  ;;  %v1267_v32 = vsub.f32 %v2209_v48, %v2296_v27  ;;  %v1268_v34 = vsub.f32 %v2215_v51, %v2296_v27  ;;  %v1269_v37 = vsub.f32 %v2219_v53, %v2296_v27 }
 0x27f   : > { %v1270_v48 = vsub.f32 %v2231_v60, %v2296_v27  ;;  %v1318_v51 = vsub.s32 6, %v1293_v19  ;;  %v1322_v53 = vsub.s32 7, %v1293_v19  ;;  %v1271_v60 = vsub.f32 %v2234_v62, %v2296_v27 }
 0x280   : > { %v2315_v40 = vmul.f32 %v2298_v28, %v1266_v31  ;;  %v2318_v47 = vmul.f32 %v2300_v29, %v1267_v32  ;;  %v2325_v42 = vmul.f32 %v2308_v35, %v1268_v34  ;;  %v2341_v54 = vmul.f32 %v2312_v39, %v1269_v37 }
 0x281   : > { %v2327_v43 = vpop.permute.xlu1 %1263  ;;  %v1272_v38 = vsub.f32 %v2238_v1, %v2296_v27  ;;  %v2345_v57 = vrot.slane %v1147_v0, %v1318_v51  ;;  %v2348_v58 = vmul.f32 %v2322_v41, %v1270_v48  ;;  %v1273_v3 = vsub.f32 %v2244_v5, %v2296_v27 }
 0x282   : > { %v1376_v44 = vmul.f32 %v2315_v40, %v2315_v40  ;;  %v1377_v45 = vmul.f32 %v2318_v47, %v2318_v47  ;;  %v1378_v59 = vmul.f32 %v2325_v42, %v2325_v42  ;;  %v1278_v62 = vsub.f32 %v2213_v50, %v2327_v43 }
 0x283   : > { %v1279_v2 = vsub.f32 %v2217_v52, %v2327_v43  ;;  %v2358_v7 = vrot.slane %v1147_v0, %v1322_v53  ;;  %v2360_v1 = vrot.slane %v1148_v46, %v1294_v23  ;;  %v2363_v8 = vmul.f32 %v2338_v49, %v1271_v60 }
 0x284   : > { %v1400_v61 = vadd.f32 %v1377_v45, %v1376_v44  ;;  %v1379_v10 = vmul.f32 %v2341_v54, %v2341_v54  ;;  %v1280_v50 = vsub.f32 %v2224_v55, %v2327_v43  ;;  %v1274_v52 = vsub.f32 %v2255_v13, %v2296_v27 }
 0x285   : > { %v2374_v5 = vmul.f32 %v2298_v28, %v1278_v62  ;;  %v2377_v14 = vmul.f32 %v2300_v29, %v1279_v2  ;;  %v2380_v18 = vmul.f32 %v2345_v57, %v1272_v38  ;;  %v1380_v19 = vmul.f32 %v2348_v58, %v2348_v58 }
 0x286   : > { %v1401_v11 = vadd.f32 %v1400_v61, %v1378_v59  ;;  %v1281_v55 = vsub.f32 %v2226_v56, %v2327_v43  ;;  %v1275_v13 = vsub.f32 %v2258_v15, %v2296_v27  ;;  %v2390_v0 = vrot.slane %v1148_v46, %v1306_v30 }
 0x287   : > { %v2393_v31 = vmul.f32 %v2358_v7, %v1273_v3  ;;  %v1381_v32 = vmul.f32 %v2363_v8, %v2363_v8  ;;  %v1282_v34 = vsub.f32 %v2236_v63, %v2327_v43  ;;  %v2400_v36 = vmul.f32 %v2308_v35, %v1280_v50 }
 0x288   : > { %v1402_v23 = vadd.f32 %v1401_v11, %v1379_v10  ;;  %2595 = vst [vmem:[#allocation3_spill] sm:$0xff] %v2390_v0  ;;  %v1276_v56 = vsub.f32 %v2260_v16, %v2296_v27  ;;  %v2405_v15 = vmul.f32 %v2360_v1, %v1274_v52  ;;  %v1388_v26 = vmul.f32 %v2374_v5, %v2374_v5 }
 0x289   : > { %v1389_v30 = vmul.f32 %v2377_v14, %v2377_v14  ;;  %v1382_v37 = vmul.f32 %v2380_v18, %v2380_v18  ;;  %v1283_v63 = vsub.f32 %v2242_v4, %v2327_v43  ;;  %v2416_v51 = vmul.f32 %v2312_v39, %v1281_v55 }
 0x28a   : > { %v1403_v33 = vadd.f32 %v1402_v23, %v1380_v19  ;;  %v1277_v16 = vsub.f32 %v2266_v20, %v2296_v27  ;;  %v2421_v53 = vmul.f32 %v2371_v12, %v1275_v13  ;;  %v1383_v44 = vmul.f32 %v2393_v31, %v2393_v31 }
 0x28b   : > { %v1284_v45 = vsub.f32 %v2246_v6, %v2327_v43  ;;  %v2428_v60 = vmul.f32 %v2322_v41, %v1282_v34  ;;  %v1390_v4 = vmul.f32 %v2400_v36, %v2400_v36  ;;  %v1413_v38 = vadd.f32 %v1389_v30, %v1388_v26 }
 0x28c   : > { %v1404_v48 = vadd.f32 %v1403_v33, %v1381_v32  ;;  %v2433_v59 = vmul.f32 %v2388_v24, %v1276_v56  ;;  %v1384_v20 = vmul.f32 %v2405_v15, %v2405_v15  ;;  %v1285_v27 = vsub.f32 %v2250_v9, %v2327_v43 }
 0x28d   : > { %v2440_v6 = vmul.f32 %v2338_v49, %v1283_v63  ;;  %v1391_v62 = vmul.f32 %v2416_v51, %v2416_v51  ;;  %v1414_v2 = vadd.f32 %v1413_v38, %v1390_v4  ;;  %v2445_v3 = vmul.f32 %v2390_v0, %v1277_v16 }
 0x28e   : > { %v1405_v46 = vadd.f32 %v1404_v48, %v1382_v37  ;;  %v1385_v10 = vmul.f32 %v2421_v53, %v2421_v53  ;;  %v1286_v11 = vsub.f32 %v2262_v17, %v2327_v43  ;;  %v2452_v9 = vmul.f32 %v2345_v57, %v1284_v45 }
 0x28f   : > { %v1392_v52 = vmul.f32 %v2428_v60, %v2428_v60  ;;  %v1415_v19 = vadd.f32 %v1414_v2, %v1391_v62  ;;  %v1386_v23 = vmul.f32 %v2433_v59, %v2433_v59  ;;  %v1287_v55 = vsub.f32 %v2268_v21, %v2327_v43 }
 0x290   : > { %v1406_v61 = vadd.f32 %v1405_v46, %v1383_v44  ;;  %v2461_v32 = vmul.f32 %v2358_v7, %v1285_v27  ;;  %v1393_v17 = vmul.f32 %v2440_v6, %v2440_v6  ;;  %v1387_v34 = vmul.f32 %v2445_v3, %v2445_v3 }
 0x291   : > { %v1416_v33 = vadd.f32 %v1415_v19, %v1392_v52  ;;  %v1288_v56 = vsub.f32 %v2270_v22, %v2327_v43  ;;  %v2470_v30 = vmul.f32 %v2360_v1, %v1286_v11  ;;  %v1394_v21 = vmul.f32 %v2452_v9, %v2452_v9 }
 0x292   : > { %v1407_v50 = vadd.f32 %v1406_v61, %v1384_v20  ;;  %v1289_v48 = vsub.f32 %v2274_v25, %v2327_v43  ;;  %v2477_v16 = vmul.f32 %v2371_v12, %v1287_v55  ;;  %v1395_v44 = vmul.f32 %v2461_v32, %v2461_v32 }
 0x293   : > { %v1417_v37 = vadd.f32 %v1416_v33, %v1393_v17  ;;  %v2482_v22 = vmul.f32 %v2388_v24, %v1288_v56  ;;  %v1396_v46 = vmul.f32 %v2470_v30, %v2470_v30 }
 0x294   : > { %v1408_v13 = vadd.f32 %v1407_v50, %v1385_v10  ;;  %v2487_v38 = vmul.f32 %v2390_v0, %v1289_v48  ;;  %v1397_v25 = vmul.f32 %v2477_v16, %v2477_v16 }
 0x295   : > { %v1418_v45 = vadd.f32 %v1417_v37, %v1394_v21  ;;  %v1398_v20 = vmul.f32 %v2482_v22, %v2482_v22 }
 0x296   : > { %v1409_v26 = vadd.f32 %v1408_v13, %v1386_v23  ;;  %v1399_v61 = vmul.f32 %v2487_v38, %v2487_v38 }
 0x297   : > { %v1419_v4 = vadd.f32 %v1418_v45, %v1395_v44 }
 0x298   : > { %v1410_v63 = vadd.f32 %v1409_v26, %v1387_v34 }
 0x299   : > { %v1420_v43 = vadd.f32 %v1419_v4, %v1396_v46 }
 0x29a   : > { %1411 = vadd.xlane.f32.xlu0 %v1410_v63 }
 0x29b   : > { %v1421_v27 = vadd.f32 %v1420_v43, %v1397_v25 }
 0x29d   : > { %v1422_v62 = vadd.f32 %v1421_v27, %v1398_v20 }
 0x29f   : > { %v1423_v2 = vadd.f32 %v1422_v62, %v1399_v61 }
 0x2a1   : > { %1424 = vadd.xlane.f32.xlu1 %v1423_v2 }
 0x327   : > { %v1412_v10 = vpop.xlane.xlu0 %1411 }
 0x328   : > { %v1426_v11 = vsel %vm1175_vm1, %v1412_v10, 0.0  ;;  %v1434_v50 = vrot.slane %v1412_v10, 2  ;;  %v1443_v52 = vrot.slane %v1412_v10, 4  ;;  %v1452_v19 = vrot.slane %v1412_v10, 6 }
 0x329   : > { %v1427_v23 = vrot.slane %v1426_v11, 4 }
 0x32a   : > { %v1436_v55 = vsel %vm1175_vm1, %v1434_v50, 0.0  ;;  %v1445_v13 = vsel %vm1175_vm1, %v1443_v52, 0.0  ;;  %v1454_v17 = vsel %vm1175_vm1, %v1452_v19, 0.0 }
 0x32b   : > { %v1428_v33 = vadd.f32 %v1427_v23, %v1426_v11  ;;  %v1437_v34 = vrot.slane %v1436_v55, 4  ;;  %v1446_v56 = vrot.slane %v1445_v13, 4  ;;  %v1455_v26 = vrot.slane %v1454_v17, 4 }
 0x32d   : > { %v1429_v21 = vrot.slane %v1428_v33, 2  ;;  %v1438_v37 = vadd.f32 %v1437_v34, %v1436_v55  ;;  %v1447_v48 = vadd.f32 %v1446_v56, %v1445_v13  ;;  %v1456_v63 = vadd.f32 %v1455_v26, %v1454_v17 }
 0x32e   : > { %v1425_v61 = vpop.xlane.xlu1 %1424 }
 0x32f   : > { %v1430_v44 = vadd.f32 %v1429_v21, %v1428_v33  ;;  %v1439_v45 = vrot.slane %v1438_v37, 2  ;;  %v1448_v46 = vrot.slane %v1447_v48, 2  ;;  %v1457_v4 = vrot.slane %v1456_v63, 2 }
 0x330   : > { %v1461_v62 = vsel %vm1175_vm1, %v1425_v61, 0.0  ;;  %v1469_v2 = vrot.slane %v1425_v61, 2  ;;  %v1478_v10 = vrot.slane %v1425_v61, 4  ;;  %v1487_v11 = vrot.slane %v1425_v61, 6 }
 0x331   : > { %v1431_v25 = vrot.slane %v1430_v44, 1  ;;  %v1440_v43 = vadd.f32 %v1439_v45, %v1438_v37  ;;  %v1449_v20 = vadd.f32 %v1448_v46, %v1447_v48  ;;  %v1458_v27 = vadd.f32 %v1457_v4, %v1456_v63 }
 0x332   : > { %v1462_v23 = vrot.slane %v1461_v62, 4  ;;  %v1471_v55 = vsel %vm1175_vm1, %v1469_v2, 0.0  ;;  %v1480_v13 = vsel %vm1175_vm1, %v1478_v10, 0.0  ;;  %v1489_v17 = vsel %vm1175_vm1, %v1487_v11, 0.0 }
 0x333   : > { %v1441_v50 = vrot.slane %v1440_v43, 1  ;;  %v1450_v52 = vrot.slane %v1449_v20, 1  ;;  %v1459_v19 = vrot.slane %v1458_v27, 1  ;;  %v1432_v33 = vadd.f32 %v1431_v25, %v1430_v44 }
 0x334   : > { %v1472_v26 = vrot.slane %v1471_v55, 4  ;;  %v1463_v21 = vadd.f32 %v1462_v23, %v1461_v62  ;;  %v1481_v37 = vrot.slane %v1480_v13, 4  ;;  %v1490_v48 = vrot.slane %v1489_v17, 4 }
 0x335   : > { %v1442_v34 = vadd.f32 %v1441_v50, %v1440_v43  ;;  %v1451_v56 = vadd.f32 %v1450_v52, %v1449_v20  ;;  %v1460_v63 = vadd.f32 %v1459_v19, %v1458_v27 }
 0x336   : > { %v1473_v46 = vadd.f32 %v1472_v26, %v1471_v55  ;;  %v1464_v61 = vrot.slane %v1463_v21, 2  ;;  %v1482_v0 = vadd.f32 %v1481_v37, %v1480_v13  ;;  %v1491_v2 = vadd.f32 %v1490_v48, %v1489_v17 }
 0x337   : > { %v1496_v45 = vsel %vm1175_vm1, %v1432_v33, %v1442_v34 }
 0x338   : > { %v1497_v4 = vsel %vm1247_vm2, %v1496_v45, %v1451_v56  ;;  %v1474_v24 = vrot.slane %v1473_v46, 2  ;;  %v1465_v11 = vadd.f32 %v1464_v61, %v1463_v21  ;;  %v1483_v44 = vrot.slane %v1482_v0, 2  ;;  %v1546_v45 = vld [vmem:[%s2587_s3] sm:$0xff] }
 0x339   : > { %v1498_v10 = vsel %vm1249_vm3, %v1497_v4, %v1460_v63  ;;  %v1492_v25 = vrot.slane %v1491_v2, 2  ;;  %v1547_v4 = vld [vmem:[%s2587_s3 + $0x8] sm:$0xff] }
 0x33a   : > { %v1502_v43 = vmul.f32 0.00045913682, %v1498_v10  ;;  %v1475_v20 = vadd.f32 %v1474_v24, %v1473_v46  ;;  %v1466_v62 = vrot.slane %v1465_v11, 1  ;;  %v1484_v50 = vadd.f32 %v1483_v44, %v1482_v0  ;;  %v1508_v24 = vld [vmem:[%s2586_s2] sm:$0xff]  ;;  %v1509_v46 = vld [vmem:[%s2586_s2 + $0x8] sm:$0xff] }
 0x33b   : > { %v1493_v52 = vadd.f32 %v1492_v25, %v1491_v2 }
 0x33c   : > { %v1504_v27 = vadd.f32 1e-05, %v1502_v43  ;;  %v1476_v19 = vrot.slane %v1475_v20, 1  ;;  %v1485_v23 = vrot.slane %v1484_v50, 1  ;;  %v1467_v33 = vadd.f32 %v1466_v62, %v1465_v11 }
 0x33d   : > { %v1494_v55 = vrot.slane %v1493_v52, 1 }
 0x33e   : > { %2012 = vrsqrt.f32 %v1504_v27  ;;  %v1477_v34 = vadd.f32 %v1476_v19, %v1475_v20  ;;  %v1486_v13 = vadd.f32 %v1485_v23, %v1484_v50 }
 0x33f   : > { %v1495_v17 = vadd.f32 %v1494_v55, %v1493_v52 }
 0x340   : > { %v1499_v56 = vsel %vm1175_vm1, %v1467_v33, %v1477_v34 }
 0x341   : > { %v1500_v26 = vsel %vm1247_vm2, %v1499_v56, %v1486_v13 }
 0x342   : > { %v1501_v21 = vsel %vm1249_vm3, %v1500_v26, %v1495_v17 }
 0x343   : > { %v1503_v37 = vmul.f32 0.00045913682, %v1501_v21 }
 0x345   : > { %v1505_v0 = vadd.f32 1e-05, %v1503_v37 }
 0x347   : > { %2014 = vrsqrt.f32 %v1505_v0 }
 0x348   : > { %v2013_v48 = vpop.eup %2012 }
 0x349   : > { %v1510_v63 = vmul.f32 %v2013_v48, %v1508_v24 }
 0x34b   : > { %1514 = vperm.xlu0 %1846, %v1510_v63  }
 0x34f   : > { %1550 = vperm.xlu0 %1846, %v1546_v45  }
 0x351   : > { %v2015_v61 = vpop.eup %2014 }
 0x352   : > { %v1511_v2 = vmul.f32 %v2015_v61, %v1509_v46 }
 0x353   : > { %1555 = vperm.xlu0 %1846, %v1547_v4  }
 0x354   : > { %1519 = vperm.xlu1 %1845, %v1511_v2  }
 0x3ca   : > { %v1515_v10 = vpop.permute.xlu0 %1514 }
 0x3cb   : > { %v1522_v11 = vmul.f32 %v1515_v10, %v2315_v40  ;;  %v1523_v44 = vmul.f32 %v1515_v10, %v2318_v47  ;;  %v1524_v25 = vmul.f32 %v1515_v10, %v2325_v42  ;;  %v1525_v43 = vmul.f32 %v1515_v10, %v2341_v54 }
 0x3cc   : > { %v1526_v20 = vmul.f32 %v1515_v10, %v2348_v58  ;;  %v1527_v62 = vmul.f32 %v1515_v10, %v2363_v8  ;;  %v1528_v50 = vmul.f32 %v1515_v10, %v2380_v18  ;;  %v1529_v52 = vmul.f32 %v1515_v10, %v2393_v31 }
 0x3cd   : > { %v1530_v27 = vmul.f32 %v1515_v10, %v2405_v15  ;;  %v1531_v19 = vmul.f32 %v1515_v10, %v2421_v53  ;;  %v1532_v40 = vmul.f32 %v1515_v10, %v2433_v59  ;;  %v1533_v47 = vmul.f32 %v1515_v10, %v2445_v3 }
 0x3ce   : > { %v1551_v23 = vpop.permute.xlu0 %1550 }
 0x3cf   : > { %v1558_v42 = vadd.f32 %v1551_v23, %v1522_v11  ;;  %v1559_v55 = vadd.f32 %v1551_v23, %v1523_v44  ;;  %v1560_v54 = vadd.f32 %v1551_v23, %v1524_v25  ;;  %v1561_v33 = vadd.f32 %v1551_v23, %v1525_v43 }
 0x3d0   : > { %v1562_v58 = vadd.f32 %v1551_v23, %v1526_v20  ;;  %v1563_v34 = vadd.f32 %v1551_v23, %v1527_v62  ;;  %v1564_v8 = vadd.f32 %v1551_v23, %v1528_v50  ;;  %v1565_v13 = vadd.f32 %v1551_v23, %v1529_v52  ;;  %v2596_v52 = vld [vmem:[#allocation2_spill] sm:$0xff] }
 0x3d1   : > { %v1566_v18 = vadd.f32 %v1551_v23, %v1530_v27  ;;  %v1567_v17 = vadd.f32 %v1551_v23, %v1531_v19  ;;  %v1568_v31 = vadd.f32 %v1551_v23, %v1532_v40  ;;  %v1569_v56 = vadd.f32 %v1551_v23, %v1533_v47  ;;  %v2597_v19 = vld [vmem:[#allocation3_spill] sm:$0xff] }
 0x3d2   : > { %v1582_v15 = vmax.f32 %v1558_v42, 0.0  ;;  %v1583_v26 = vmax.f32 %v1559_v55, 0.0  ;;  %v1584_v53 = vmax.f32 %v1560_v54, 0.0  ;;  %v1585_v21 = vmax.f32 %v1561_v33, 0.0  ;;  %v1556_v50 = vpop.permute.xlu0 %1555 }
 0x3d3   : > { %v1586_v59 = vmax.f32 %v1562_v58, 0.0  ;;  %v1587_v37 = vmax.f32 %v1563_v34, 0.0  ;;  %v1588_v3 = vmax.f32 %v1564_v8, 0.0  ;;  %v1589_v24 = vmax.f32 %v1565_v13, 0.0  ;;  %v1520_v0 = vpop.permute.xlu1 %1519 }
 0x3d4   : > { %v1590_v48 = vmax.f32 %v1566_v18, 0.0  ;;  %v1591_v63 = vmax.f32 %v1567_v17, 0.0  ;;  %v1592_v45 = vmax.f32 %v1568_v31, 0.0  ;;  %v1593_v46 = vmax.f32 %v1569_v56, 0.0 }
 0x3d5   : > { %v1534_v4 = vmul.f32 %v1520_v0, %v2374_v5  ;;  %v1535_v61 = vmul.f32 %v1520_v0, %v2377_v14  ;;  %v1536_v2 = vmul.f32 %v1520_v0, %v2400_v36  ;;  %v1537_v10 = vmul.f32 %v1520_v0, %v2416_v51 }
 0x3d6   : > { %v1538_v11 = vmul.f32 %v1520_v0, %v2428_v60  ;;  %v1539_v44 = vmul.f32 %v1520_v0, %v2440_v6  ;;  %v1540_v25 = vmul.f32 %v1520_v0, %v2452_v9  ;;  %v1541_v43 = vmul.f32 %v1520_v0, %v2461_v32 }
 0x3d7   : > { %v1542_v20 = vmul.f32 %v1520_v0, %v2470_v30  ;;  %v1543_v62 = vmul.f32 %v1520_v0, %v2477_v16  ;;  %v1544_v5 = vmul.f32 %v1520_v0, %v2482_v22  ;;  %v1545_v14 = vmul.f32 %v1520_v0, %v2487_v38 }
 0x3d8   : > { %v1606_v36 = vmul.f32 %v1582_v15, %v2298_v28  ;;  %v1607_v51 = vmul.f32 %v1583_v26, %v2300_v29  ;;  %v1608_v60 = vmul.f32 %v1584_v53, %v2308_v35  ;;  %v1609_v6 = vmul.f32 %v1585_v21, %v2312_v39 }
 0x3d9   : > { %v1610_v9 = vmul.f32 %v1586_v59, %v2322_v41  ;;  %v1611_v32 = vmul.f32 %v1587_v37, %v2338_v49  ;;  %v1612_v30 = vmul.f32 %v1588_v3, %v2345_v57  ;;  %v1613_v16 = vmul.f32 %v1589_v24, %v2358_v7 }
 0x3da   : > { %v1614_v22 = vmul.f32 %v1590_v48, %v2360_v1  ;;  %v1615_v38 = vmul.f32 %v1591_v63, %v2371_v12  ;;  %v1616_v27 = vmul.f32 %v1592_v45, %v2596_v52  ;;  %v1617_v40 = vmul.f32 %v1593_v46, %v2597_v19 }
 0x3db   : > { %v1630_v47 = vmax.f32 %v1606_v36, %v1609_v6  ;;  %v1631_v23 = vmax.f32 %v1607_v51, %v1610_v9  ;;  %v1632_v42 = vmax.f32 %v1608_v60, %v1611_v32  ;;  %v1570_v55 = vadd.f32 %v1556_v50, %v1534_v4 }
 0x3dc   : > { %v1636_v54 = vmax.f32 %v1612_v30, %v1615_v38  ;;  %v1637_v33 = vmax.f32 %v1613_v16, %v1616_v27  ;;  %v1638_v58 = vmax.f32 %v1614_v22, %v1617_v40  ;;  %v1571_v34 = vadd.f32 %v1556_v50, %v1535_v61 }
 0x3dd   : > { %v1572_v8 = vadd.f32 %v1556_v50, %v1536_v2  ;;  %v1573_v13 = vadd.f32 %v1556_v50, %v1537_v10  ;;  %v1574_v18 = vadd.f32 %v1556_v50, %v1538_v11  ;;  %v1575_v17 = vadd.f32 %v1556_v50, %v1539_v44 }
 0x3de   : > { %v1642_v31 = vmax.f32 %v1630_v47, %v1636_v54  ;;  %v1643_v56 = vmax.f32 %v1631_v23, %v1637_v33  ;;  %v1644_v15 = vmax.f32 %v1632_v42, %v1638_v58  ;;  %v1576_v26 = vadd.f32 %v1556_v50, %v1540_v25 }
 0x3df   : > { %v1577_v53 = vadd.f32 %v1556_v50, %v1541_v43  ;;  %v1578_v21 = vadd.f32 %v1556_v50, %v1542_v20  ;;  %v1579_v59 = vadd.f32 %v1556_v50, %v1543_v62  ;;  %v1580_v37 = vadd.f32 %v1556_v50, %v1544_v5 }
 0x3e0   : > { %1648 = vst [vmem:[%s2561_s19] sm:$0xff] %v1642_v31  ;;  %1649 = vst [vmem:[%s2561_s19 + $0x8] sm:$0xff] %v1643_v56  ;;  %v1581_v3 = vadd.f32 %v1556_v50, %v1545_v14  ;;  %v1594_v24 = vmax.f32 %v1570_v55, 0.0  ;;  %v1595_v0 = vmax.f32 %v1571_v34, 0.0  ;;  %v1596_v48 = vmax.f32 %v1572_v8, 0.0 }
 0x3e1   : > { %1650 = vst [vmem:[%s2561_s19 + $0x10] sm:$0xff] %v1644_v15  ;;  %v1597_v63 = vmax.f32 %v1573_v13, 0.0  ;;  %v1598_v45 = vmax.f32 %v1574_v18, 0.0  ;;  %v1599_v46 = vmax.f32 %v1575_v17, 0.0  ;;  %v1600_v4 = vmax.f32 %v1576_v26, 0.0 }
 0x3e2   : > { %v1601_v61 = vmax.f32 %v1577_v53, 0.0  ;;  %v1602_v2 = vmax.f32 %v1578_v21, 0.0  ;;  %v1603_v10 = vmax.f32 %v1579_v59, 0.0  ;;  %v1604_v11 = vmax.f32 %v1580_v37, 0.0 }
 0x3e3   : > { %v1605_v44 = vmax.f32 %v1581_v3, 0.0  ;;  %v1618_v25 = vmul.f32 %v1594_v24, %v2298_v28  ;;  %v1619_v43 = vmul.f32 %v1595_v0, %v2300_v29  ;;  %v1620_v20 = vmul.f32 %v1596_v48, %v2308_v35 }
 0x3e4   : > { %v1621_v62 = vmul.f32 %v1597_v63, %v2312_v39  ;;  %v1622_v5 = vmul.f32 %v1598_v45, %v2322_v41  ;;  %v1623_v14 = vmul.f32 %v1599_v46, %v2338_v49  ;;  %v1624_v36 = vmul.f32 %v1600_v4, %v2345_v57 }
 0x3e5   : > { %v1625_v51 = vmul.f32 %v1601_v61, %v2358_v7  ;;  %v1626_v60 = vmul.f32 %v1602_v2, %v2360_v1  ;;  %v1627_v28 = vmul.f32 %v1603_v10, %v2371_v12  ;;  %v1628_v29 = vmul.f32 %v1604_v11, %v2596_v52 }
 0x3e6   : > { %v1629_v35 = vmul.f32 %v1605_v44, %v2597_v19  ;;  %v1633_v39 = vmax.f32 %v1618_v25, %v1621_v62  ;;  %v1634_v6 = vmax.f32 %v1619_v43, %v1622_v5  ;;  %v1635_v41 = vmax.f32 %v1620_v20, %v1623_v14 }
 0x3e7   : > { %v1639_v50 = vmax.f32 %v1624_v36, %v1627_v28  ;;  %v1640_v49 = vmax.f32 %v1625_v51, %v1628_v29 }
 0x3e8   : > { %v1641_v9 = vmax.f32 %v1626_v60, %v1629_v35 }
 0x3e9   : > { %v1645_v32 = vmax.f32 %v1633_v39, %v1639_v50  ;;  %v1646_v57 = vmax.f32 %v1634_v6, %v1640_v49 }
 0x3ea   : > { %v1647_v30 = vmax.f32 %v1635_v41, %v1641_v9 }
 0x3eb   : > { %1651 = vst [vmem:[%s2561_s19 + $0x18] sm:$0xff] %v1645_v32  ;;  %1652 = vst [vmem:[%s2561_s19 + $0x20] sm:$0xff] %v1646_v57 }
 0x3ec   : > { %1653 = vst [vmem:[%s2561_s19 + $0x28] sm:$0xff] %v1647_v30 }
 0x3ed PF: > { %s15_s18 = sadd.s32 1, %s2022_s18  }
 0x3ee   : > { %p12_p4 = scmp.ge.s32.totalorder %s15_s18, 4  }
 0x3f0   :  { %14 = sbr.rel (!%p12_p4) target bundleno = 1 (0x1), region = 70 }

// kernel: _lambda_.6
= control target key start
LH: loop header
LB: loop body
LE: loop exit
PB: predicated region body
PF: predicated region fallthrough
CT: control target
= control target key end

     0   :  { %s984_s18 = smov 0   ;;  %s1172_s0 = inlined_call_operand.vmem [shape: bf16[2,144,512], index: 0, kind: input, shape index: {}]   ;;  %s1173_s1 = inlined_call_operand.vmem [shape: bf16[16,144], index: 1, kind: input, shape index: {}]   ;;  %s1174_s2 = inlined_call_operand.vmem [shape: f32[16,1], index: 2, kind: input, shape index: {}]   ;;  %s1175_s3 = inlined_call_operand.vmem [shape: f32[16,1], index: 3, kind: input, shape index: {}]   ;;  %s1176_s4 = inlined_call_operand.vmem [shape: f32[1,512], index: 4, kind: input, shape index: {}]   ;;  %s1177_s5 = inlined_call_operand.vmem [shape: f32[2,16,128], index: 5, kind: output, shape index: {}]  }
   0x1 LB: > { %s821_s19 = sadd.s32 4294967295, %s951_s18   ;;  %p825_p0 = scmp.ge.s32.totalorder %s951_s18, 1  ;;  %s951_s18 = sphi %s984_s18, %s15_s18  }
   0x2   : > { %p187_p1 = scmp.lt.s32.totalorder %s951_s18, 3 }
   0x4   : > { %p188_p2 = pnand %p825_p0, %p187_p1 }
   0x5   : > { %p215_p3 = scmp.lt.s32.totalorder (!%p188_p2), %s821_s19, 1  ;;  %vm453_vm0 = vcmask (!%p188_p2), 130048   ;;  %v940_v0 = vld [vmem:[%s1173_s1 + $0x4] ss:$8 sps:$4 sm:$0xff] (!%p188_p2)   ;;  %v938_v37 = vld [vmem:[%s1173_s1] ss:$8 sps:$4 sm:$0xff] (!%p188_p2)  }
   0x6   : > { %191 = sbr.rel (%p188_p2) target bundleno = 897 (0x381), region = 40  ;;  %867 = vmatprep.mubr.msk.bf16.mxu0 (!%p188_p2), %vm453_vm0, %v940_v0  ;;  %868 = vmatprep.mubr.msk.bf16.mxu1 (!%p188_p2), %vm453_vm0, %v940_v0  ;;  %v953_v52 = vmov (!%p188_p2), 0   ;;  %vm554_vm1 = vcmask (!%p188_p2), 1043456  }
   0x7   : > { %882 = vset.pattern.permute.xlu1 (!%p188_p2), %v953_v52  ;;  %883 = vset.pattern.permute.xlu0 (!%p188_p2), %v953_v52 }
   0xd   : > { %s1179_s19 = smov (!%p215_p3, %s821_s19), 1 }
   0xe   : > { %s872_s22 = smul.u32 288, %s1179_s19  ;;  %s871_s13 = sshll.u32 %s1179_s19, 4 }
   0xf   : > { %s224_s16 = scalar_lea.vmem %s1177_s5, %s871_s13 }
  0x10   : > { %s1001_s25 = scalar_lea.vmem %s1172_s0, %s872_s22 }
  0x11   : > { %v884_v1 = vld [vmem:[%s1001_s25 + $0x4] ss:$16 sps:$4 sm:$0xff]   ;;  %v886_v2 = vld [vmem:[%s1001_s25 + $0xc] ss:$16 sps:$4 sm:$0xff]   ;;  %v888_v3 = vld [vmem:[%s1001_s25] ss:$16 sps:$4 sm:$0xff]  }
  0x12   : > { %457 = vmatprep.subr.bf16.mxu0 %v884_v1  ;;  %v889_v4 = vld [vmem:[%s1001_s25 + $0x8] ss:$16 sps:$4 sm:$0xff]   ;;  %500 = vmatprep.subr.bf16.mxu1 %v886_v2  ;;  %v890_v5 = vld [vmem:[%s1001_s25 + $0x24] ss:$16 sps:$4 sm:$0xff]   ;;  %v892_v6 = vld [vmem:[%s1001_s25 + $0x2c] ss:$16 sps:$4 sm:$0xff]  }
  0x13   : > { %458 = vmatpush1.bf16.msra.mxu0 %v888_v3  ;;  %501 = vmatpush1.bf16.msra.mxu1 %v889_v4  ;;  %v894_v7 = vld [vmem:[%s1001_s25 + $0x20] ss:$16 sps:$4 sm:$0xff]   ;;  %v895_v8 = vld [vmem:[%s1001_s25 + $0x28] ss:$16 sps:$4 sm:$0xff]   ;;  %v896_v9 = vld [vmem:[%s1001_s25 + $0x44] ss:$16 sps:$4 sm:$0xff]  }
  0x14   : > { %459 = vmatprep.subr.bf16.mxu0 %v890_v5  ;;  %502 = vmatprep.subr.bf16.mxu1 %v892_v6  ;;  %v898_v10 = vld [vmem:[%s1001_s25 + $0x4c] ss:$16 sps:$4 sm:$0xff]   ;;  %v900_v11 = vld [vmem:[%s1001_s25 + $0x40] ss:$16 sps:$4 sm:$0xff]   ;;  %v901_v12 = vld [vmem:[%s1001_s25 + $0x48] ss:$16 sps:$4 sm:$0xff]  }
  0x15   : > { %v902_v13 = vld [vmem:[%s1001_s25 + $0x64] ss:$16 sps:$4 sm:$0xff]   ;;  %v904_v14 = vld [vmem:[%s1001_s25 + $0x6c] ss:$16 sps:$4 sm:$0xff]   ;;  %v906_v15 = vld [vmem:[%s1001_s25 + $0x60] ss:$16 sps:$4 sm:$0xff]  }
  0x16   : > { %v907_v16 = vld [vmem:[%s1001_s25 + $0x68] ss:$16 sps:$4 sm:$0xff]   ;;  %v908_v17 = vld [vmem:[%s1001_s25 + $0x84] ss:$16 sps:$4 sm:$0xff]   ;;  %v910_v18 = vld [vmem:[%s1001_s25 + $0x8c] ss:$16 sps:$4 sm:$0xff]  }
  0x17   : > { %460 = vmatpush1.bf16.msra.mxu0 %v894_v7  ;;  %503 = vmatpush1.bf16.msra.mxu1 %v895_v8  ;;  %v912_v19 = vld [vmem:[%s1001_s25 + $0x80] ss:$16 sps:$4 sm:$0xff]   ;;  %v913_v20 = vld [vmem:[%s1001_s25 + $0x88] ss:$16 sps:$4 sm:$0xff]   ;;  %v914_v21 = vld [vmem:[%s1001_s25 + $0xa4] ss:$16 sps:$4 sm:$0xff]  }
  0x18   : > { %461 = vmatprep.subr.bf16.mxu0 %v896_v9  ;;  %504 = vmatprep.subr.bf16.mxu1 %v898_v10  ;;  %v916_v22 = vld [vmem:[%s1001_s25 + $0xac] ss:$16 sps:$4 sm:$0xff]   ;;  %v918_v23 = vld [vmem:[%s1001_s25 + $0xa0] ss:$16 sps:$4 sm:$0xff]   ;;  %v919_v24 = vld [vmem:[%s1001_s25 + $0xa8] ss:$16 sps:$4 sm:$0xff]  }
  0x19   : > { %v920_v25 = vld [vmem:[%s1001_s25 + $0xc4] ss:$16 sps:$4 sm:$0xff]   ;;  %v922_v26 = vld [vmem:[%s1001_s25 + $0xcc] ss:$16 sps:$4 sm:$0xff]   ;;  %v924_v27 = vld [vmem:[%s1001_s25 + $0xc0] ss:$16 sps:$4 sm:$0xff]  }
  0x1a   : > { %v925_v28 = vld [vmem:[%s1001_s25 + $0xc8] ss:$16 sps:$4 sm:$0xff]   ;;  %v926_v29 = vld [vmem:[%s1001_s25 + $0xe4] ss:$16 sps:$4 sm:$0xff]   ;;  %v928_v30 = vld [vmem:[%s1001_s25 + $0xec] ss:$16 sps:$4 sm:$0xff]  }
  0x1b   : > { %462 = vmatpush1.bf16.msra.mxu0 %v900_v11  ;;  %505 = vmatpush1.bf16.msra.mxu1 %v901_v12  ;;  %v930_v31 = vld [vmem:[%s1001_s25 + $0xe0] ss:$16 sps:$4 sm:$0xff]   ;;  %v931_v32 = vld [vmem:[%s1001_s25 + $0xe8] ss:$16 sps:$4 sm:$0xff]   ;;  %v932_v33 = vld [vmem:[%s1001_s25 + $0x104] ss:$16 sps:$4 sm:$0xff]  }
  0x1c   : > { %463 = vmatprep.subr.bf16.mxu0 %v902_v13  ;;  %506 = vmatprep.subr.bf16.mxu1 %v904_v14  ;;  %v934_v34 = vld [vmem:[%s1001_s25 + $0x10c] ss:$16 sps:$4 sm:$0xff]   ;;  %v936_v35 = vld [vmem:[%s1001_s25 + $0x100] ss:$16 sps:$4 sm:$0xff]   ;;  %v937_v36 = vld [vmem:[%s1001_s25 + $0x108] ss:$16 sps:$4 sm:$0xff]  }
  0x1f   : > { %464 = vmatpush1.bf16.msra.mxu0 %v906_v15  ;;  %507 = vmatpush1.bf16.msra.mxu1 %v907_v16 }
  0x20   : > { %465 = vmatprep.subr.bf16.mxu0 %v908_v17  ;;  %508 = vmatprep.subr.bf16.mxu1 %v910_v18 }
  0x23   : > { %466 = vmatpush1.bf16.msra.mxu0 %v912_v19  ;;  %509 = vmatpush1.bf16.msra.mxu1 %v913_v20 }
  0x24   : > { %467 = vmatprep.subr.bf16.mxu0 %v914_v21  ;;  %510 = vmatprep.subr.bf16.mxu1 %v916_v22 }
  0x27   : > { %468 = vmatpush1.bf16.msra.mxu0 %v918_v23  ;;  %511 = vmatpush1.bf16.msra.mxu1 %v919_v24 }
  0x28   : > { %469 = vmatprep.subr.bf16.mxu0 %v920_v25  ;;  %512 = vmatprep.subr.bf16.mxu1 %v922_v26  ;;  %v612_v25 = vlaneseq }
  0x2a   : > { %v613_v26 = vshrl.u32 %v612_v25, 7 }
  0x2b   : > { %470 = vmatpush1.bf16.msra.mxu0 %v924_v27  ;;  %513 = vmatpush1.bf16.msra.mxu1 %v925_v28 }
  0x2c   : > { %471 = vmatprep.subr.bf16.mxu0 %v926_v29  ;;  %514 = vmatprep.subr.bf16.mxu1 %v928_v30  ;;  %v614_v27 = vsub.s32 0, %v613_v26  ;;  %v618_v28 = vsub.s32 1, %v613_v26  ;;  %v543_v29 = vld [vmem:[%s1176_s4] sm:$0xf]  ;;  %v622_v30 = vsub.s32 2, %v613_v26 }
  0x2f   : > { %472 = vmatpush1.bf16.msra.mxu0 %v930_v31  ;;  %515 = vmatpush1.bf16.msra.mxu1 %v931_v32  ;;  %v626_v31 = vsub.s32 3, %v613_v26  ;;  %v1075_v32 = vrot.slane %v543_v29, %v614_v27 }
  0x30   : > { %473 = vmatprep.subr.bf16.mxu0 %v932_v33  ;;  %516 = vmatprep.subr.bf16.mxu1 %v934_v34  ;;  %v1077_v33 = vrot.slane %v543_v29, %v618_v28 }
  0x33   : > { %474 = vmatpush1.bf16.msra.mxu0 %v936_v35  ;;  %517 = vmatpush1.bf16.msra.mxu1 %v937_v36  ;;  %v1079_v35 = vrot.slane %v543_v29, %v622_v30 }
  0x36   : > { %490 = vmatmul.mubr.bf16.vlgmr.msra.gmra.mrb[0].mxu0 %v938_v37  ;;  %533 = vmatmul.mubr.bf16.vlgmr.msra.gmra.mrb[0].mxu1 %v938_v37 }
 0x109   : > { %v1042_v38 = vpop.f32.mrb[0].mxu0  ;;  %v1044_v39 = vpop.f32.mrb[0].mxu1 }
 0x10a   : > { %v1046_v40 = vpop.f32.mrb[1].mxu0  ;;  %v1048_v41 = vpop.f32.mrb[1].mxu1 }
 0x10b   : > { %v544_v42 = vadd.f32 %v1046_v40, %v1042_v38  ;;  %v1052_v43 = vpop.f32.mrb[2].mxu0  ;;  %v1054_v44 = vpop.f32.mrb[2].mxu1 }
 0x10c   : > { %v1056_v45 = vpop.f32.mrb[3].mxu0  ;;  %v1058_v46 = vpop.f32.mrb[3].mxu1 }
 0x10d   : > { %v549_v47 = vadd.f32 %v1056_v45, %v1052_v43  ;;  %v545_v48 = vadd.f32 %v544_v42, %v1044_v39 }
 0x10f   : > { %v550_v49 = vadd.f32 %v549_v47, %v1054_v44  ;;  %v546_v50 = vadd.f32 %v545_v48, %v1048_v41  ;;  %v1085_v48 = vrot.slane %v543_v29, %v626_v31 }
 0x111   : > { %v551_v51 = vadd.f32 %v550_v49, %v1058_v46  ;;  %547 = vadd.xlane.f32.xlu0 %v546_v50 }
 0x115   : > { %552 = vadd.xlane.f32.xlu0 %v551_v51 }
 0x19e   : > { %v548_v53 = vpop.xlane.xlu0 %547 }
 0x19f   : > { %v555_v54 = vsel %vm554_vm1, %v548_v53, 0.0  ;;  %v563_v55 = vrot.slane %v548_v53, 4 }
 0x1a0   : > { %v556_v56 = vrot.slane %v555_v54, 4 }
 0x1a1   : > { %v565_v57 = vsel %vm554_vm1, %v563_v55, 0.0 }
 0x1a2   : > { %v557_v58 = vadd.f32 %v556_v56, %v555_v54  ;;  %v566_v59 = vrot.slane %v565_v57, 4  ;;  %v553_v60 = vpop.xlane.xlu0 %552 }
 0x1a3   : > { %v572_v61 = vsel %vm554_vm1, %v553_v60, 0.0  ;;  %v580_v62 = vrot.slane %v553_v60, 4 }
 0x1a4   : > { %v558_v63 = vrot.slane %v557_v58, 2  ;;  %v567_v0 = vadd.f32 %v566_v59, %v565_v57  ;;  %v573_v1 = vrot.slane %v572_v61, 4 }
 0x1a5   : > { %v582_v2 = vsel %vm554_vm1, %v580_v62, 0.0 }
 0x1a6   : > { %v559_v3 = vadd.f32 %v558_v63, %v557_v58  ;;  %v568_v4 = vrot.slane %v567_v0, 2  ;;  %v574_v5 = vadd.f32 %v573_v1, %v572_v61  ;;  %v583_v6 = vrot.slane %v582_v2, 4 }
 0x1a8   : > { %v560_v7 = vrot.slane %v559_v3, 1  ;;  %v569_v8 = vadd.f32 %v568_v4, %v567_v0  ;;  %v575_v9 = vrot.slane %v574_v5, 2  ;;  %v584_v10 = vadd.f32 %v583_v6, %v582_v2 }
 0x1aa   : > { %v576_v11 = vadd.f32 %v575_v9, %v574_v5  ;;  %v585_v12 = vrot.slane %v584_v10, 2  ;;  %v570_v13 = vrot.slane %v569_v8, 1  ;;  %v561_v16 = vadd.f32 %v560_v7, %v559_v3 }
 0x1ac   : > { %v577_v14 = vrot.slane %v576_v11, 1  ;;  %v586_v15 = vadd.f32 %v585_v12, %v584_v10  ;;  %v571_v17 = vadd.f32 %v570_v13, %v569_v8 }
 0x1ae   : > { %v587_v18 = vrot.slane %v586_v15, 1  ;;  %v589_v19 = vsel %vm554_vm1, %v561_v16, %v571_v17  ;;  %v578_v21 = vadd.f32 %v577_v14, %v576_v11 }
 0x1af   : > { %v591_v20 = vmul.f32 0.00086505193, %v589_v19 }
 0x1b0   : > { %v588_v22 = vadd.f32 %v587_v18, %v586_v15 }
 0x1b1   : > { %595 = vperm.xlu1 %882, %v591_v20  }
 0x1b2   : > { %v590_v23 = vsel %vm554_vm1, %v578_v21, %v588_v22 }
 0x1b3   : > { %v592_v24 = vmul.f32 0.00086505193, %v590_v23 }
 0x1b5   : > { %600 = vperm.xlu1 %882, %v592_v24  }
 0x230   : > { %v596_v34 = vpop.permute.xlu1 %595 }
 0x231   : > { %v603_v36 = vsub.f32 %v1042_v38, %v596_v34  ;;  %v604_v37 = vsub.f32 %v1046_v40, %v596_v34  ;;  %v605_v42 = vsub.f32 %v1044_v39, %v596_v34  ;;  %v606_v47 = vsub.f32 %v1048_v41, %v596_v34 }
 0x233   : > { %v1088_v49 = vmul.f32 %v1075_v32, %v603_v36  ;;  %v1091_v50 = vmul.f32 %v1077_v33, %v604_v37  ;;  %v1094_v52 = vmul.f32 %v1079_v35, %v605_v42  ;;  %v1101_v53 = vmul.f32 %v1085_v48, %v606_v47 }
 0x234   : > { %v601_v51 = vpop.permute.xlu1 %600 }
 0x235   : > { %v607_v38 = vsub.f32 %v1052_v43, %v601_v51  ;;  %v608_v40 = vsub.f32 %v1056_v45, %v601_v51  ;;  %v609_v39 = vsub.f32 %v1054_v44, %v601_v51  ;;  %v610_v41 = vsub.f32 %v1058_v46, %v601_v51 }
 0x236   : > { %v640_v54 = vmul.f32 %v1088_v49, %v1088_v49  ;;  %v641_v55 = vmul.f32 %v1091_v50, %v1091_v50  ;;  %v642_v44 = vmul.f32 %v1094_v52, %v1094_v52  ;;  %v643_v60 = vmul.f32 %v1101_v53, %v1101_v53 }
 0x237   : > { %v1108_v56 = vmul.f32 %v1075_v32, %v607_v38  ;;  %v1111_v43 = vmul.f32 %v1077_v33, %v608_v40  ;;  %v1114_v45 = vmul.f32 %v1079_v35, %v609_v39  ;;  %v1119_v57 = vmul.f32 %v1085_v48, %v610_v41 }
 0x238   : > { %v648_v46 = vadd.f32 %v641_v55, %v640_v54  ;;  %v700_v54 = vld [vmem:[%s1174_s2] sm:$0xff] }
 0x239   : > { %v644_v58 = vmul.f32 %v1108_v56, %v1108_v56  ;;  %v645_v59 = vmul.f32 %v1111_v43, %v1111_v43  ;;  %v646_v62 = vmul.f32 %v1114_v45, %v1114_v45  ;;  %v647_v1 = vmul.f32 %v1119_v57, %v1119_v57 }
 0x23a   : > { %v649_v61 = vadd.f32 %v648_v46, %v642_v44  ;;  %v701_v46 = vld [vmem:[%s1174_s2 + $0x8] sm:$0xff] }
 0x23b   : > { %v653_v63 = vadd.f32 %v645_v59, %v644_v58 }
 0x23c   : > { %v650_v0 = vadd.f32 %v649_v61, %v643_v60  ;;  %v722_v60 = vld [vmem:[%s1175_s3] sm:$0xff]  ;;  %v723_v61 = vld [vmem:[%s1175_s3 + $0x8] sm:$0xff] }
 0x23d   : > { %v654_v2 = vadd.f32 %v653_v63, %v646_v62 }
 0x23e   : > { %651 = vadd.xlane.f32.xlu0 %v650_v0 }
 0x23f   : > { %v655_v3 = vadd.f32 %v654_v2, %v647_v1 }
 0x241   : > { %656 = vadd.xlane.f32.xlu1 %v655_v3 }
 0x2cb   : > { %v652_v4 = vpop.xlane.xlu0 %651 }
 0x2cc   : > { %v658_v5 = vsel %vm554_vm1, %v652_v4, 0.0  ;;  %v666_v6 = vrot.slane %v652_v4, 4 }
 0x2cd   : > { %v659_v7 = vrot.slane %v658_v5, 4 }
 0x2ce   : > { %v668_v8 = vsel %vm554_vm1, %v666_v6, 0.0  ;;  %v657_v9 = vpop.xlane.xlu1 %656 }
 0x2cf   : > { %v660_v10 = vadd.f32 %v659_v7, %v658_v5  ;;  %v669_v11 = vrot.slane %v668_v8, 4  ;;  %v675_v12 = vsel %vm554_vm1, %v657_v9, 0.0  ;;  %v683_v13 = vrot.slane %v657_v9, 4 }
 0x2d0   : > { %v676_v14 = vrot.slane %v675_v12, 4 }
 0x2d1   : > { %v661_v15 = vrot.slane %v660_v10, 2  ;;  %v670_v16 = vadd.f32 %v669_v11, %v668_v8  ;;  %v685_v17 = vsel %vm554_vm1, %v683_v13, 0.0 }
 0x2d2   : > { %v677_v18 = vadd.f32 %v676_v14, %v675_v12  ;;  %v686_v19 = vrot.slane %v685_v17, 4 }
 0x2d3   : > { %v662_v20 = vadd.f32 %v661_v15, %v660_v10  ;;  %v671_v21 = vrot.slane %v670_v16, 2 }
 0x2d4   : > { %v678_v22 = vrot.slane %v677_v18, 2  ;;  %v687_v23 = vadd.f32 %v686_v19, %v685_v17 }
 0x2d5   : > { %v663_v24 = vrot.slane %v662_v20, 1  ;;  %v672_v25 = vadd.f32 %v671_v21, %v670_v16 }
 0x2d6   : > { %v679_v26 = vadd.f32 %v678_v22, %v677_v18  ;;  %v688_v27 = vrot.slane %v687_v23, 2 }
 0x2d7   : > { %v673_v28 = vrot.slane %v672_v25, 1  ;;  %v664_v31 = vadd.f32 %v663_v24, %v662_v20 }
 0x2d8   : > { %v680_v29 = vrot.slane %v679_v26, 1  ;;  %v689_v30 = vadd.f32 %v688_v27, %v687_v23 }
 0x2d9   : > { %v674_v34 = vadd.f32 %v673_v28, %v672_v25 }
 0x2da   : > { %v690_v36 = vrot.slane %v689_v30, 1  ;;  %v681_v47 = vadd.f32 %v680_v29, %v679_v26 }
 0x2db   : > { %v692_v37 = vsel %vm554_vm1, %v664_v31, %v674_v34 }
 0x2dc   : > { %v694_v42 = vmul.f32 0.00086505193, %v692_v37  ;;  %v691_v51 = vadd.f32 %v690_v36, %v689_v30 }
 0x2de   : > { %v696_v38 = vadd.f32 1e-05, %v694_v42  ;;  %v693_v40 = vsel %vm554_vm1, %v681_v47, %v691_v51 }
 0x2df   : > { %v695_v39 = vmul.f32 0.00086505193, %v693_v40 }
 0x2e0   : > { %941 = vrsqrt.f32 %v696_v38 }
 0x2e1   : > { %v697_v41 = vadd.f32 1e-05, %v695_v39 }
 0x2e3   : > { %943 = vrsqrt.f32 %v697_v41 }
 0x2ea   : > { %v942_v55 = vpop.eup %941 }
 0x2eb   : > { %v702_v44 = vmul.f32 %v942_v55, %v700_v54 }
 0x2ed   : > { %v944_v58 = vpop.eup %943  ;;  %706 = vperm.xlu0 %883, %v702_v44  }
 0x2ee   : > { %v703_v59 = vmul.f32 %v944_v58, %v701_v46 }
 0x2f0   : > { %711 = vperm.xlu1 %882, %v703_v59  }
 0x2f1   : > { %726 = vperm.xlu0 %883, %v722_v60  }
 0x2f5   : > { %731 = vperm.xlu0 %883, %v723_v61  }
 0x36c   : > { %v707_v62 = vpop.permute.xlu0 %706 }
 0x36d   : > { %v714_v63 = vmul.f32 %v707_v62, %v1088_v49  ;;  %v715_v0 = vmul.f32 %v707_v62, %v1091_v50  ;;  %v716_v1 = vmul.f32 %v707_v62, %v1094_v52  ;;  %v717_v2 = vmul.f32 %v707_v62, %v1101_v53 }
 0x36f   : > { %v712_v4 = vpop.permute.xlu1 %711 }
 0x370   : > { %v727_v3 = vpop.permute.xlu0 %726  ;;  %v718_v13 = vmul.f32 %v712_v4, %v1108_v56  ;;  %v719_v49 = vmul.f32 %v712_v4, %v1111_v43  ;;  %v720_v50 = vmul.f32 %v712_v4, %v1114_v45  ;;  %v721_v52 = vmul.f32 %v712_v4, %v1119_v57 }
 0x371   : > { %v734_v5 = vadd.f32 %v727_v3, %v714_v63  ;;  %v735_v6 = vadd.f32 %v727_v3, %v715_v0  ;;  %v736_v7 = vadd.f32 %v727_v3, %v716_v1  ;;  %v737_v8 = vadd.f32 %v727_v3, %v717_v2 }
 0x373   : > { %v742_v9 = vmax.f32 %v734_v5, 0.0  ;;  %v743_v10 = vmax.f32 %v735_v6, 0.0  ;;  %v744_v11 = vmax.f32 %v736_v7, 0.0  ;;  %v745_v12 = vmax.f32 %v737_v8, 0.0 }
 0x374   : > { %v732_v53 = vpop.permute.xlu0 %731 }
 0x375   : > { %v750_v14 = vmul.f32 %v742_v9, %v1075_v32  ;;  %v751_v15 = vmul.f32 %v743_v10, %v1077_v33  ;;  %v752_v16 = vmul.f32 %v744_v11, %v1079_v35  ;;  %v753_v17 = vmul.f32 %v745_v12, %v1085_v48 }
 0x376   : > { %v738_v18 = vadd.f32 %v732_v53, %v718_v13  ;;  %v739_v19 = vadd.f32 %v732_v53, %v719_v49  ;;  %v740_v20 = vadd.f32 %v732_v53, %v720_v50  ;;  %v741_v56 = vadd.f32 %v732_v53, %v721_v52 }
 0x377   : > { %v758_v21 = vmax.f32 %v750_v14, %v751_v15  ;;  %v760_v43 = vmax.f32 %v752_v16, %v753_v17 }
 0x378   : > { %v746_v45 = vmax.f32 %v738_v18, 0.0  ;;  %v747_v57 = vmax.f32 %v739_v19, 0.0  ;;  %v748_v22 = vmax.f32 %v740_v20, 0.0  ;;  %v749_v23 = vmax.f32 %v741_v56, 0.0 }
 0x379   : > { %v762_v24 = vmax.f32 %v758_v21, %v760_v43 }
 0x37a   : > { %v754_v25 = vmul.f32 %v746_v45, %v1075_v32  ;;  %v755_v26 = vmul.f32 %v747_v57, %v1077_v33  ;;  %v756_v27 = vmul.f32 %v748_v22, %v1079_v35  ;;  %v757_v28 = vmul.f32 %v749_v23, %v1085_v48 }
 0x37b   : > { %764 = vst [vmem:[%s224_s16] sm:$0xff] %v762_v24 }
 0x37c   : > { %v759_v29 = vmax.f32 %v754_v25, %v755_v26  ;;  %v761_v30 = vmax.f32 %v756_v27, %v757_v28 }
 0x37e   : > { %v763_v31 = vmax.f32 %v759_v29, %v761_v30 }
 0x380   : > { %765 = vst [vmem:[%s224_s16 + $0x8] sm:$0xff] %v763_v31 }
 0x381 PF: > { %s15_s18 = sadd.s32 1, %s951_s18  }
 0x382   : > { %p12_p4 = scmp.ge.s32.totalorder %s15_s18, 4  }
 0x384   :  { %14 = sbr.rel (!%p12_p4) target bundleno = 1 (0x1), region = 70 }

// kernel: _lambda_.7
= control target key start
LH: loop header
LB: loop body
LE: loop exit
PB: predicated region body
PF: predicated region fallthrough
CT: control target
= control target key end

     0   :  { %s935_s18 = smov 0   ;;  %s1059_s0 = inlined_call_operand.vmem [shape: bf16[2,144,512], index: 0, kind: input, shape index: {}]   ;;  %s1060_s1 = inlined_call_operand.vmem [shape: bf16[16,144], index: 1, kind: input, shape index: {}]   ;;  %s1061_s2 = inlined_call_operand.vmem [shape: f32[16,1], index: 2, kind: input, shape index: {}]   ;;  %s1062_s3 = inlined_call_operand.vmem [shape: f32[16,1], index: 3, kind: input, shape index: {}]   ;;  %s1063_s4 = inlined_call_operand.vmem [shape: f32[1,512], index: 4, kind: input, shape index: {}]   ;;  %s1064_s5 = inlined_call_operand.vmem [shape: f32[2,16,128], index: 5, kind: output, shape index: {}]  }
   0x1 LB: > { %s772_s19 = sadd.s32 4294967295, %s902_s18   ;;  %p776_p0 = scmp.ge.s32.totalorder %s902_s18, 1  ;;  %s902_s18 = sphi %s935_s18, %s15_s18  }
   0x2   : > { %p187_p1 = scmp.lt.s32.totalorder %s902_s18, 3 }
   0x4   : > { %p188_p2 = pnand %p776_p0, %p187_p1 }
   0x5   : > { %p215_p3 = scmp.lt.s32.totalorder (!%p188_p2), %s772_s19, 1  ;;  %vm453_vm0 = vcmask (!%p188_p2), 130048   ;;  %v891_v0 = vld [vmem:[%s1060_s1 + $0x4] ss:$8 sps:$4 sm:$0xff] (!%p188_p2)   ;;  %v889_v37 = vld [vmem:[%s1060_s1] ss:$8 sps:$4 sm:$0xff] (!%p188_p2)  }
   0x6   : > { %191 = sbr.rel (%p188_p2) target bundleno = 889 (0x379), region = 40  ;;  %818 = vmatprep.mubr.msk.bf16.mxu0 (!%p188_p2), %vm453_vm0, %v891_v0  ;;  %819 = vmatprep.mubr.msk.bf16.mxu1 (!%p188_p2), %vm453_vm0, %v891_v0  ;;  %v904_v52 = vmov (!%p188_p2), 0  }
   0x7   : > { %833 = vset.pattern.permute.xlu1 (!%p188_p2), %v904_v52  ;;  %834 = vset.pattern.permute.xlu0 (!%p188_p2), %v904_v52 }
   0xd   : > { %s1066_s19 = smov (!%p215_p3, %s772_s19), 1 }
   0xe   : > { %s823_s22 = smul.u32 288, %s1066_s19  ;;  %s822_s13 = sshll.u32 %s1066_s19, 4 }
   0xf   : > { %s224_s16 = scalar_lea.vmem %s1064_s5, %s822_s13 }
  0x10   : > { %s952_s25 = scalar_lea.vmem %s1059_s0, %s823_s22 }
  0x11   : > { %v835_v1 = vld [vmem:[%s952_s25 + $0x4] ss:$16 sps:$4 sm:$0xff]   ;;  %v837_v2 = vld [vmem:[%s952_s25 + $0xc] ss:$16 sps:$4 sm:$0xff]   ;;  %v839_v3 = vld [vmem:[%s952_s25] ss:$16 sps:$4 sm:$0xff]  }
  0x12   : > { %457 = vmatprep.subr.bf16.mxu0 %v835_v1  ;;  %v840_v4 = vld [vmem:[%s952_s25 + $0x8] ss:$16 sps:$4 sm:$0xff]   ;;  %500 = vmatprep.subr.bf16.mxu1 %v837_v2  ;;  %v841_v5 = vld [vmem:[%s952_s25 + $0x24] ss:$16 sps:$4 sm:$0xff]   ;;  %v843_v6 = vld [vmem:[%s952_s25 + $0x2c] ss:$16 sps:$4 sm:$0xff]  }
  0x13   : > { %458 = vmatpush1.bf16.msra.mxu0 %v839_v3  ;;  %501 = vmatpush1.bf16.msra.mxu1 %v840_v4  ;;  %v845_v7 = vld [vmem:[%s952_s25 + $0x20] ss:$16 sps:$4 sm:$0xff]   ;;  %v846_v8 = vld [vmem:[%s952_s25 + $0x28] ss:$16 sps:$4 sm:$0xff]   ;;  %v847_v9 = vld [vmem:[%s952_s25 + $0x44] ss:$16 sps:$4 sm:$0xff]  }
  0x14   : > { %459 = vmatprep.subr.bf16.mxu0 %v841_v5  ;;  %502 = vmatprep.subr.bf16.mxu1 %v843_v6  ;;  %v849_v10 = vld [vmem:[%s952_s25 + $0x4c] ss:$16 sps:$4 sm:$0xff]   ;;  %v851_v11 = vld [vmem:[%s952_s25 + $0x40] ss:$16 sps:$4 sm:$0xff]   ;;  %v852_v12 = vld [vmem:[%s952_s25 + $0x48] ss:$16 sps:$4 sm:$0xff]   ;;  %v587_v5 = vlaneseq }
  0x15   : > { %v853_v13 = vld [vmem:[%s952_s25 + $0x64] ss:$16 sps:$4 sm:$0xff]   ;;  %v855_v14 = vld [vmem:[%s952_s25 + $0x6c] ss:$16 sps:$4 sm:$0xff]   ;;  %v857_v15 = vld [vmem:[%s952_s25 + $0x60] ss:$16 sps:$4 sm:$0xff]  }
  0x16   : > { %v858_v16 = vld [vmem:[%s952_s25 + $0x68] ss:$16 sps:$4 sm:$0xff]   ;;  %v859_v17 = vld [vmem:[%s952_s25 + $0x84] ss:$16 sps:$4 sm:$0xff]   ;;  %v861_v18 = vld [vmem:[%s952_s25 + $0x8c] ss:$16 sps:$4 sm:$0xff]  }
  0x17   : > { %460 = vmatpush1.bf16.msra.mxu0 %v845_v7  ;;  %503 = vmatpush1.bf16.msra.mxu1 %v846_v8  ;;  %v863_v19 = vld [vmem:[%s952_s25 + $0x80] ss:$16 sps:$4 sm:$0xff]   ;;  %v864_v20 = vld [vmem:[%s952_s25 + $0x88] ss:$16 sps:$4 sm:$0xff]   ;;  %v865_v21 = vld [vmem:[%s952_s25 + $0xa4] ss:$16 sps:$4 sm:$0xff]  }
  0x18   : > { %461 = vmatprep.subr.bf16.mxu0 %v847_v9  ;;  %504 = vmatprep.subr.bf16.mxu1 %v849_v10  ;;  %v867_v22 = vld [vmem:[%s952_s25 + $0xac] ss:$16 sps:$4 sm:$0xff]   ;;  %v869_v23 = vld [vmem:[%s952_s25 + $0xa0] ss:$16 sps:$4 sm:$0xff]   ;;  %v870_v24 = vld [vmem:[%s952_s25 + $0xa8] ss:$16 sps:$4 sm:$0xff]  }
  0x19   : > { %v871_v25 = vld [vmem:[%s952_s25 + $0xc4] ss:$16 sps:$4 sm:$0xff]   ;;  %v873_v26 = vld [vmem:[%s952_s25 + $0xcc] ss:$16 sps:$4 sm:$0xff]   ;;  %v875_v27 = vld [vmem:[%s952_s25 + $0xc0] ss:$16 sps:$4 sm:$0xff]  }
  0x1a   : > { %v876_v28 = vld [vmem:[%s952_s25 + $0xc8] ss:$16 sps:$4 sm:$0xff]   ;;  %v877_v29 = vld [vmem:[%s952_s25 + $0xe4] ss:$16 sps:$4 sm:$0xff]   ;;  %v879_v30 = vld [vmem:[%s952_s25 + $0xec] ss:$16 sps:$4 sm:$0xff]  }
  0x1b   : > { %462 = vmatpush1.bf16.msra.mxu0 %v851_v11  ;;  %505 = vmatpush1.bf16.msra.mxu1 %v852_v12  ;;  %v881_v31 = vld [vmem:[%s952_s25 + $0xe0] ss:$16 sps:$4 sm:$0xff]   ;;  %v882_v32 = vld [vmem:[%s952_s25 + $0xe8] ss:$16 sps:$4 sm:$0xff]   ;;  %v883_v33 = vld [vmem:[%s952_s25 + $0x104] ss:$16 sps:$4 sm:$0xff]  }
  0x1c   : > { %463 = vmatprep.subr.bf16.mxu0 %v853_v13  ;;  %506 = vmatprep.subr.bf16.mxu1 %v855_v14  ;;  %v885_v34 = vld [vmem:[%s952_s25 + $0x10c] ss:$16 sps:$4 sm:$0xff]   ;;  %v887_v35 = vld [vmem:[%s952_s25 + $0x100] ss:$16 sps:$4 sm:$0xff]   ;;  %v888_v36 = vld [vmem:[%s952_s25 + $0x108] ss:$16 sps:$4 sm:$0xff]  }
  0x1d   : > { %v588_v6 = vshrl.u32 %v587_v5, 7  ;;  %v543_v9 = vld [vmem:[%s1063_s4] sm:$0xf]  ;;  %v652_v5 = vld [vmem:[%s1061_s2 + $0x8] sm:$0xff] }
  0x1f   : > { %464 = vmatpush1.bf16.msra.mxu0 %v857_v15  ;;  %507 = vmatpush1.bf16.msra.mxu1 %v858_v16  ;;  %v589_v7 = vsub.s32 0, %v588_v6  ;;  %v593_v8 = vsub.s32 1, %v588_v6  ;;  %v597_v10 = vsub.s32 2, %v588_v6  ;;  %v601_v11 = vsub.s32 3, %v588_v6 }
  0x20   : > { %465 = vmatprep.subr.bf16.mxu0 %v859_v17  ;;  %508 = vmatprep.subr.bf16.mxu1 %v861_v18 }
  0x21   : > { %v996_v12 = vrot.slane %v543_v9, %v589_v7  ;;  %v998_v13 = vrot.slane %v543_v9, %v593_v8  ;;  %v1000_v15 = vrot.slane %v543_v9, %v597_v10  ;;  %v673_v8 = vld [vmem:[%s1062_s3] sm:$0xff] }
  0x23   : > { %466 = vmatpush1.bf16.msra.mxu0 %v863_v19  ;;  %509 = vmatpush1.bf16.msra.mxu1 %v864_v20  ;;  %v1002_v20 = vrot.slane %v543_v9, %v601_v11  ;;  %v674_v9 = vld [vmem:[%s1062_s3 + $0x8] sm:$0xff] }
  0x24   : > { %467 = vmatprep.subr.bf16.mxu0 %v865_v21  ;;  %510 = vmatprep.subr.bf16.mxu1 %v867_v22 }
  0x27   : > { %468 = vmatpush1.bf16.msra.mxu0 %v869_v23  ;;  %511 = vmatpush1.bf16.msra.mxu1 %v870_v24 }
  0x28   : > { %469 = vmatprep.subr.bf16.mxu0 %v871_v25  ;;  %512 = vmatprep.subr.bf16.mxu1 %v873_v26 }
  0x2b   : > { %470 = vmatpush1.bf16.msra.mxu0 %v875_v27  ;;  %513 = vmatpush1.bf16.msra.mxu1 %v876_v28 }
  0x2c   : > { %471 = vmatprep.subr.bf16.mxu0 %v877_v29  ;;  %514 = vmatprep.subr.bf16.mxu1 %v879_v30 }
  0x2f   : > { %472 = vmatpush1.bf16.msra.mxu0 %v881_v31  ;;  %515 = vmatpush1.bf16.msra.mxu1 %v882_v32 }
  0x30   : > { %473 = vmatprep.subr.bf16.mxu0 %v883_v33  ;;  %516 = vmatprep.subr.bf16.mxu1 %v885_v34 }
  0x33   : > { %474 = vmatpush1.bf16.msra.mxu0 %v887_v35  ;;  %517 = vmatpush1.bf16.msra.mxu1 %v888_v36 }
  0x36   : > { %490 = vmatmul.mubr.bf16.vlgmr.msra.gmra.mrb[0].mxu0 %v889_v37  ;;  %533 = vmatmul.mubr.bf16.vlgmr.msra.gmra.mrb[0].mxu1 %v889_v37 }
 0x109   : > { %v491_v38 = vpop.f32.mrb[0].mxu0  ;;  %v534_v39 = vpop.f32.mrb[0].mxu1 }
 0x10a   : > { %v493_v40 = vpop.f32.mrb[1].mxu0  ;;  %v536_v41 = vpop.f32.mrb[1].mxu1 }
 0x10b   : > { %v544_v42 = vadd.f32 %v493_v40, %v491_v38  ;;  %v495_v43 = vpop.f32.mrb[2].mxu0  ;;  %v538_v44 = vpop.f32.mrb[2].mxu1 }
 0x10c   : > { %v497_v45 = vpop.f32.mrb[3].mxu0  ;;  %v540_v46 = vpop.f32.mrb[3].mxu1 }
 0x10d   : > { %v549_v47 = vadd.f32 %v497_v45, %v495_v43  ;;  %v545_v48 = vadd.f32 %v544_v42, %v534_v39 }
 0x10f   : > { %v550_v49 = vadd.f32 %v549_v47, %v538_v44  ;;  %v546_v50 = vadd.f32 %v545_v48, %v536_v41 }
 0x111   : > { %v551_v51 = vadd.f32 %v550_v49, %v540_v46  ;;  %547 = vadd.xlane.f32.xlu0 %v546_v50 }
 0x115   : > { %552 = vadd.xlane.f32.xlu0 %v551_v51 }
 0x19e   : > { %v548_v53 = vpop.xlane.xlu0 %547 }
 0x19f   : > { %v554_v54 = vrot.slane %v548_v53, 4 }
 0x1a1   : > { %v555_v55 = vadd.f32 %v554_v54, %v548_v53 }
 0x1a2   : > { %v553_v56 = vpop.xlane.xlu0 %552 }
 0x1a3   : > { %v556_v57 = vrot.slane %v555_v55, 2  ;;  %v560_v58 = vrot.slane %v553_v56, 4 }
 0x1a5   : > { %v557_v59 = vadd.f32 %v556_v57, %v555_v55  ;;  %v561_v60 = vadd.f32 %v560_v58, %v553_v56 }
 0x1a7   : > { %v562_v61 = vrot.slane %v561_v60, 2  ;;  %v558_v62 = vrot.slane %v557_v59, 1 }
 0x1a9   : > { %v563_v63 = vadd.f32 %v562_v61, %v561_v60  ;;  %v559_v0 = vadd.f32 %v558_v62, %v557_v59 }
 0x1ab   : > { %v564_v1 = vrot.slane %v563_v63, 1  ;;  %v566_v2 = vmul.f32 0.0015432099, %v559_v0 }
 0x1ad   : > { %570 = vperm.xlu1 %833, %v566_v2   ;;  %v565_v3 = vadd.f32 %v564_v1, %v563_v63  ;;  %v651_v2 = vld [vmem:[%s1061_s2] sm:$0xff] }
 0x1af   : > { %v567_v4 = vmul.f32 0.0015432099, %v565_v3 }
 0x1b1   : > { %575 = vperm.xlu1 %833, %v567_v4  }
 0x22c   : > { %v571_v14 = vpop.permute.xlu1 %570 }
 0x22d   : > { %v578_v16 = vsub.f32 %v491_v38, %v571_v14  ;;  %v579_v17 = vsub.f32 %v493_v40, %v571_v14  ;;  %v580_v18 = vsub.f32 %v534_v39, %v571_v14  ;;  %v581_v19 = vsub.f32 %v536_v41, %v571_v14 }
 0x22f   : > { %v607_v21 = vmul.f32 %v996_v12, %v578_v16  ;;  %v608_v22 = vmul.f32 %v998_v13, %v579_v17  ;;  %v609_v24 = vmul.f32 %v1000_v15, %v580_v18  ;;  %v610_v29 = vmul.f32 %v1002_v20, %v581_v19 }
 0x230   : > { %v576_v23 = vpop.permute.xlu1 %575 }
 0x231   : > { %v582_v25 = vsub.f32 %v495_v43, %v576_v23  ;;  %v583_v26 = vsub.f32 %v497_v45, %v576_v23  ;;  %v584_v27 = vsub.f32 %v538_v44, %v576_v23  ;;  %v585_v28 = vsub.f32 %v540_v46, %v576_v23 }
 0x232   : > { %v615_v30 = vmul.f32 %v607_v21, %v607_v21  ;;  %v616_v31 = vmul.f32 %v608_v22, %v608_v22  ;;  %v617_v35 = vmul.f32 %v609_v24, %v609_v24  ;;  %v618_v40 = vmul.f32 %v610_v29, %v610_v29 }
 0x233   : > { %v1009_v32 = vmul.f32 %v996_v12, %v582_v25  ;;  %v1012_v33 = vmul.f32 %v998_v13, %v583_v26  ;;  %v1015_v34 = vmul.f32 %v1000_v15, %v584_v27  ;;  %v1018_v37 = vmul.f32 %v1002_v20, %v585_v28 }
 0x234   : > { %v623_v36 = vadd.f32 %v616_v31, %v615_v30 }
 0x235   : > { %v619_v38 = vmul.f32 %v1009_v32, %v1009_v32  ;;  %v620_v39 = vmul.f32 %v1012_v33, %v1012_v33  ;;  %v621_v42 = vmul.f32 %v1015_v34, %v1015_v34  ;;  %v622_v45 = vmul.f32 %v1018_v37, %v1018_v37 }
 0x236   : > { %v624_v41 = vadd.f32 %v623_v36, %v617_v35 }
 0x237   : > { %v628_v43 = vadd.f32 %v620_v39, %v619_v38 }
 0x238   : > { %v625_v44 = vadd.f32 %v624_v41, %v618_v40 }
 0x239   : > { %v629_v46 = vadd.f32 %v628_v43, %v621_v42 }
 0x23a   : > { %626 = vadd.xlane.f32.xlu0 %v625_v44 }
 0x23b   : > { %v630_v47 = vadd.f32 %v629_v46, %v622_v45 }
 0x23d   : > { %631 = vadd.xlane.f32.xlu1 %v630_v47 }
 0x2c7   : > { %v627_v48 = vpop.xlane.xlu0 %626 }
 0x2c8   : > { %v633_v49 = vrot.slane %v627_v48, 4 }
 0x2ca   : > { %v634_v50 = vadd.f32 %v633_v49, %v627_v48  ;;  %v632_v51 = vpop.xlane.xlu1 %631 }
 0x2cb   : > { %v639_v52 = vrot.slane %v632_v51, 4 }
 0x2cc   : > { %v635_v53 = vrot.slane %v634_v50, 2 }
 0x2cd   : > { %v640_v54 = vadd.f32 %v639_v52, %v632_v51 }
 0x2ce   : > { %v636_v55 = vadd.f32 %v635_v53, %v634_v50 }
 0x2cf   : > { %v641_v56 = vrot.slane %v640_v54, 2 }
 0x2d0   : > { %v637_v57 = vrot.slane %v636_v55, 1 }
 0x2d1   : > { %v642_v58 = vadd.f32 %v641_v56, %v640_v54 }
 0x2d2   : > { %v638_v59 = vadd.f32 %v637_v57, %v636_v55 }
 0x2d3   : > { %v643_v60 = vrot.slane %v642_v58, 1 }
 0x2d4   : > { %v645_v61 = vmul.f32 0.0015432099, %v638_v59 }
 0x2d5   : > { %v644_v62 = vadd.f32 %v643_v60, %v642_v58 }
 0x2d6   : > { %v647_v63 = vadd.f32 1e-05, %v645_v61 }
 0x2d7   : > { %v646_v0 = vmul.f32 0.0015432099, %v644_v62 }
 0x2d8   : > { %892 = vrsqrt.f32 %v647_v63 }
 0x2d9   : > { %v648_v1 = vadd.f32 1e-05, %v646_v0 }
 0x2db   : > { %894 = vrsqrt.f32 %v648_v1 }
 0x2e2   : > { %v893_v3 = vpop.eup %892 }
 0x2e3   : > { %v653_v4 = vmul.f32 %v893_v3, %v651_v2 }
 0x2e5   : > { %v895_v6 = vpop.eup %894  ;;  %657 = vperm.xlu0 %834, %v653_v4  }
 0x2e6   : > { %v654_v7 = vmul.f32 %v895_v6, %v652_v5 }
 0x2e8   : > { %662 = vperm.xlu1 %833, %v654_v7  }
 0x2e9   : > { %677 = vperm.xlu0 %834, %v673_v8  }
 0x2ed   : > { %682 = vperm.xlu0 %834, %v674_v9  }
 0x364   : > { %v658_v10 = vpop.permute.xlu0 %657 }
 0x365   : > { %v665_v11 = vmul.f32 %v658_v10, %v607_v21  ;;  %v666_v14 = vmul.f32 %v658_v10, %v608_v22  ;;  %v667_v16 = vmul.f32 %v658_v10, %v609_v24  ;;  %v668_v17 = vmul.f32 %v658_v10, %v610_v29 }
 0x367   : > { %v663_v19 = vpop.permute.xlu1 %662 }
 0x368   : > { %v678_v18 = vpop.permute.xlu0 %677  ;;  %v669_v36 = vmul.f32 %v663_v19, %v1009_v32  ;;  %v670_v38 = vmul.f32 %v663_v19, %v1012_v33  ;;  %v671_v21 = vmul.f32 %v663_v19, %v1015_v34  ;;  %v672_v22 = vmul.f32 %v663_v19, %v1018_v37 }
 0x369   : > { %v685_v23 = vadd.f32 %v678_v18, %v665_v11  ;;  %v686_v25 = vadd.f32 %v678_v18, %v666_v14  ;;  %v687_v26 = vadd.f32 %v678_v18, %v667_v16  ;;  %v688_v27 = vadd.f32 %v678_v18, %v668_v17 }
 0x36b   : > { %v693_v28 = vmax.f32 %v685_v23, 0.0  ;;  %v694_v30 = vmax.f32 %v686_v25, 0.0  ;;  %v695_v31 = vmax.f32 %v687_v26, 0.0  ;;  %v696_v35 = vmax.f32 %v688_v27, 0.0 }
 0x36c   : > { %v683_v24 = vpop.permute.xlu0 %682 }
 0x36d   : > { %v701_v29 = vmul.f32 %v693_v28, %v996_v12  ;;  %v702_v39 = vmul.f32 %v694_v30, %v998_v13  ;;  %v703_v40 = vmul.f32 %v695_v31, %v1000_v15  ;;  %v704_v41 = vmul.f32 %v696_v35, %v1002_v20 }
 0x36e   : > { %v689_v42 = vadd.f32 %v683_v24, %v669_v36  ;;  %v690_v43 = vadd.f32 %v683_v24, %v670_v38  ;;  %v691_v44 = vadd.f32 %v683_v24, %v671_v21  ;;  %v692_v32 = vadd.f32 %v683_v24, %v672_v22 }
 0x36f   : > { %v709_v45 = vmax.f32 %v701_v29, %v702_v39  ;;  %v711_v33 = vmax.f32 %v703_v40, %v704_v41 }
 0x370   : > { %v697_v34 = vmax.f32 %v689_v42, 0.0  ;;  %v698_v37 = vmax.f32 %v690_v43, 0.0  ;;  %v699_v46 = vmax.f32 %v691_v44, 0.0  ;;  %v700_v47 = vmax.f32 %v692_v32, 0.0 }
 0x371   : > { %v713_v48 = vmax.f32 %v709_v45, %v711_v33 }
 0x372   : > { %v705_v49 = vmul.f32 %v697_v34, %v996_v12  ;;  %v706_v50 = vmul.f32 %v698_v37, %v998_v13  ;;  %v707_v51 = vmul.f32 %v699_v46, %v1000_v15  ;;  %v708_v52 = vmul.f32 %v700_v47, %v1002_v20 }
 0x373   : > { %715 = vst [vmem:[%s224_s16] sm:$0xff] %v713_v48 }
 0x374   : > { %v710_v53 = vmax.f32 %v705_v49, %v706_v50  ;;  %v712_v54 = vmax.f32 %v707_v51, %v708_v52 }
 0x376   : > { %v714_v55 = vmax.f32 %v710_v53, %v712_v54 }
 0x378   : > { %716 = vst [vmem:[%s224_s16 + $0x8] sm:$0xff] %v714_v55 }
 0x379 PF: > { %s15_s18 = sadd.s32 1, %s902_s18  }
 0x37a   : > { %p12_p4 = scmp.ge.s32.totalorder %s15_s18, 4  }
 0x37c   :  { %14 = sbr.rel (!%p12_p4) target bundleno = 1 (0x1), region = 70 }

</bundles_post_ra>
